<compile_context>
chip_gen: v5e
topology: v5e:2x2
jax: 0.10.0
libtpu: 0.0.40
codegen_flags: <defaults>
</compile_context>

<pallas_src>
import jax
import jax.numpy as jnp
from jax.experimental import pallas as pl
from jax.experimental.pallas import tpu as pltpu


_DROP_P = 0.3
_DROP_THRESHOLD = int(_DROP_P * (1 << 32))       # drop when bits < threshold
_DROP_SCALE = 1.0 / (1.0 - _DROP_P)


def _random_bits_u32(shape, seed_u32, salt, row_offset):
    """Counter-based uniform uint32 bits: lowbias32 finalizer over a global element index."""
    rows = jax.lax.broadcasted_iota(jnp.int32, shape, 0) + row_offset
    cols = jax.lax.broadcasted_iota(jnp.int32, shape, 1)
    x = (rows * shape[1] + cols).astype(jnp.uint32)
    x = x ^ (seed_u32 * jnp.uint32(0x9E3779B9)) ^ jnp.uint32((salt * 0x85EBCA6B) & 0xFFFFFFFF)
    x = x ^ (x >> 16)
    x = x * jnp.uint32(0x7FEB352D)
    x = x ^ (x >> 15)
    x = x * jnp.uint32(0x846CA68B)
    x = x ^ (x >> 16)
    return x


def _dropout(h, seed_u32, salt, row_offset):
    """Inverted dropout, same semantics as torch.nn.functional.dropout(p=0.3, training=True)."""
    bits = _random_bits_u32(h.shape, seed_u32, salt, row_offset)
    keep = bits >= jnp.uint32(_DROP_THRESHOLD)   # P(keep) = 1 - p, pure integer compare
    return jnp.where(keep, h * _DROP_SCALE, 0.0)


def disc_kernel(seed_ref,                         # SMEM scalar seed
                x_ref,
                w1_ref, b1_ref, w2_ref, b2_ref,
                w3_ref, b3_ref, w4_ref, b4_ref,
                o_ref):
    seed_u32 = seed_ref[0].astype(jnp.uint32)
    tile_rows = x_ref.shape[0]
    row_offset = pl.program_id(0) * tile_rows     # global row index of this batch tile

    def linear(h, w_ref, b_ref):
        # bf16 MXU matmul with f32 accumulation; bias add in f32.
        return jnp.dot(h.astype(jnp.bfloat16), w_ref[...],
                       preferred_element_type=jnp.float32) + b_ref[...]

    def lrelu(h):
        return jnp.where(h >= 0.0, h, 0.2 * h)

    h = x_ref[...]
    h = _dropout(lrelu(linear(h, w1_ref, b1_ref)), seed_u32, 1, row_offset)
    h = _dropout(lrelu(linear(h, w2_ref, b2_ref)), seed_u32, 2, row_offset)
    h = _dropout(lrelu(linear(h, w3_ref, b3_ref)), seed_u32, 3, row_offset)

    # Final 256 -> 1 layer: VPU multiply + lane reduce (avoids an N=1 MXU matmul).
    z = jnp.sum(h * w4_ref[...], axis=-1, keepdims=True) + b4_ref[...]
    o_ref[...] = jax.nn.sigmoid(z)


def discriminator_forward(x, params, seed=0):
    B, D_in = x.shape
    w1, b1, w2, b2, w3, b3, w4, b4 = params

    # Cast the three MXU weights to bf16 once (wrapper-side, not per grid step).
    w1b = w1.astype(jnp.bfloat16)
    w2b = w2.astype(jnp.bfloat16)
    w3b = w3.astype(jnp.bfloat16)
    w4_row = w4.reshape(1, -1).astype(jnp.float32)     # (1, 256) row used on the VPU
    seed_arr = jnp.array([seed], dtype=jnp.int32)

    # Batch tile: fill the MXU M axis when the batch is big enough; otherwise one tile.
    TILE_B = B if B <= 256 else 256
    grid = (pl.cdiv(B, TILE_B),)

    const2 = lambda i: (0, 0)
    in_specs = [
        pl.BlockSpec(memory_space=pltpu.MemorySpace.SMEM),        # seed
        pl.BlockSpec((TILE_B, D_in), lambda i: (i, 0)),           # x (pipelined over batch)
        pl.BlockSpec(w1b.shape, const2), pl.BlockSpec(b1.shape, const2),
        pl.BlockSpec(w2b.shape, const2), pl.BlockSpec(b2.shape, const2),
        pl.BlockSpec(w3b.shape, const2), pl.BlockSpec(b3.shape, const2),
        pl.BlockSpec(w4_row.shape, const2), pl.BlockSpec(b4.shape, const2),
    ]
    out_specs = pl.BlockSpec((TILE_B, 1), lambda i: (i, 0))

    flops = 2 * B * (D_in * 1024 + 1024 * 512 + 512 * 256 + 256)
    bytes_accessed = (
        x.size * 4 + B * 4
        + (w1b.size + w2b.size + w3b.size) * 2 + w4_row.size * 4
        + (b1.size + b2.size + b3.size + b4.size) * 4
    )

    return pl.pallas_call(
        disc_kernel,
        out_shape=jax.ShapeDtypeStruct((B, 1), jnp.float32),
        grid=grid,
        in_specs=in_specs,
        out_specs=out_specs,
        compiler_params=pltpu.CompilerParams(dimension_semantics=("parallel",)),
        cost_estimate=pl.CostEstimate(flops=flops, transcendentals=B,
                                      bytes_accessed=bytes_accessed),
    )(seed_arr, x, w1b, b1, w2b, b2, w3b, b3, w4_row, b4)


def init_params(key, d_input_dim):
    """Deterministic init mimicking torch.nn.Linear default U(-1/sqrt(fan_in), 1/sqrt(fan_in))."""
    layer_dims = [(d_input_dim, 1024), (1024, 512), (512, 256), (256, 1)]
    params = []
    for fan_in, fan_out in layer_dims:
        key, kw, kb = jax.random.split(key, 3)
        bound = 1.0 / (fan_in ** 0.5)
        w = jax.random.uniform(kw, (fan_in, fan_out), jnp.float32, -bound, bound)
        b = jax.random.uniform(kb, (1, fan_out), jnp.float32, -bound, bound)
        params += [w, b]
    return params


if __name__ == "__main__":
    key = jax.random.PRNGKey(0)
    d_input_dim = 128
    batch = 8

    k_params, k_x = jax.random.split(key)
    params = init_params(k_params, d_input_dim)
    x = jax.random.normal(k_x, (batch, d_input_dim), dtype=jnp.float32)

    out = discriminator_forward(x, params, seed=0)
    out = jax.block_until_ready(out)

    assert out.shape == (batch, 1)
    assert bool(jnp.all((out >= 0.0) & (out <= 1.0)))
    print("KERNEL_OK")
</pallas_src>

<mosaic_0001>
module attributes {stable_mosaic.version = 11 : i64} {
  func.func @disc_kernel(%arg0: i32, %arg1: memref<1xi32, #tpu.memory_space<smem>>, %arg2: memref<8x128xf32, #tpu.memory_space<vmem>>, %arg3: memref<128x1024xbf16, #tpu.memory_space<vmem>>, %arg4: memref<1x1024xf32, #tpu.memory_space<vmem>>, %arg5: memref<1024x512xbf16, #tpu.memory_space<vmem>>, %arg6: memref<1x512xf32, #tpu.memory_space<vmem>>, %arg7: memref<512x256xbf16, #tpu.memory_space<vmem>>, %arg8: memref<1x256xf32, #tpu.memory_space<vmem>>, %arg9: memref<1x256xf32, #tpu.memory_space<vmem>>, %arg10: memref<1x1xf32, #tpu.memory_space<vmem>>, %arg11: memref<8x1xf32, #tpu.memory_space<vmem>>) attributes {dimension_semantics = [#tpu.dimension_semantics<parallel>], iteration_bounds = array<i64: 1>, scalar_prefetch = 0 : i64, scratch_operands = 0 : i64, tpu.core_type = #tpu.core_type<tc>, window_params = [{transform_indices = @transform_0, window_bounds = array<i64: 1>}, {transform_indices = @transform_1, window_bounds = array<i64: 8, 128>}, {pipeline_mode = #tpu.pipeline_mode<synchronous>, transform_indices = @transform_2, window_bounds = array<i64: 128, 1024>}, {pipeline_mode = #tpu.pipeline_mode<synchronous>, transform_indices = @transform_3, window_bounds = array<i64: 1, 1024>}, {pipeline_mode = #tpu.pipeline_mode<synchronous>, transform_indices = @transform_4, window_bounds = array<i64: 1024, 512>}, {pipeline_mode = #tpu.pipeline_mode<synchronous>, transform_indices = @transform_5, window_bounds = array<i64: 1, 512>}, {pipeline_mode = #tpu.pipeline_mode<synchronous>, transform_indices = @transform_6, window_bounds = array<i64: 512, 256>}, {pipeline_mode = #tpu.pipeline_mode<synchronous>, transform_indices = @transform_7, window_bounds = array<i64: 1, 256>}, {pipeline_mode = #tpu.pipeline_mode<synchronous>, transform_indices = @transform_8, window_bounds = array<i64: 1, 256>}, {pipeline_mode = #tpu.pipeline_mode<synchronous>, transform_indices = @transform_9, window_bounds = array<i64: 1, 1>}, {transform_indices = @transform_10, window_bounds = array<i64: 8, 1>}]} {
    %c0 = arith.constant 0 : index
    %0 = memref.load %arg1[%c0] : memref<1xi32, #tpu.memory_space<smem>>
    %c8_i32 = arith.constant 8 : i32
    %1 = arith.muli %arg0, %c8_i32 : i32
    %c0_0 = arith.constant 0 : index
    %c0_1 = arith.constant 0 : index
    %2 = vector.load %arg2[%c0_0, %c0_1] : memref<8x128xf32, #tpu.memory_space<vmem>>, vector<8x128xf32>
    %3 = arith.truncf %2 : vector<8x128xf32> to vector<8x128xbf16>
    %c0_2 = arith.constant 0 : index
    %c0_3 = arith.constant 0 : index
    %4 = vector.load %arg3[%c0_2, %c0_3] : memref<128x1024xbf16, #tpu.memory_space<vmem>>, vector<128x1024xbf16>
    %cst = arith.constant dense<0.000000e+00> : vector<8x1024xf32>
    %5 = tpu.matmul %3, %4, %cst {dimension_numbers = #tpu.dot_dimension_numbers<[1], [0], [0], [1], [0, 0, 1, 1], [], []>} : vector<8x128xbf16>, vector<128x1024xbf16>, vector<8x1024xf32> -> vector<8x1024xf32>
    %c0_4 = arith.constant 0 : index
    %c0_5 = arith.constant 0 : index
    %6 = vector.load %arg4[%c0_4, %c0_5] : memref<1x1024xf32, #tpu.memory_space<vmem>>, vector<1x1024xf32>
    %7 = vector.broadcast %6 : vector<1x1024xf32> to vector<8x1024xf32>
    %8 = arith.addf %5, %7 : vector<8x1024xf32>
    %cst_6 = arith.constant 0.000000e+00 : f32
    %9 = vector.broadcast %cst_6 : f32 to vector<8x1024xf32>
    %10 = arith.cmpf oge, %8, %9 : vector<8x1024xf32>
    %cst_7 = arith.constant 2.000000e-01 : f32
    %11 = vector.broadcast %cst_7 : f32 to vector<8x1024xf32>
    %12 = arith.mulf %11, %8 : vector<8x1024xf32>
    %13 = arith.select %10, %8, %12 : vector<8x1024xi1>, vector<8x1024xf32>
    %14 = tpu.iota {dimensions = array<i32: 0>} : vector<8x1024xi32>
    %15 = vector.broadcast %1 : i32 to vector<8x1024xi32>
    %16 = arith.addi %14, %15 : vector<8x1024xi32>
    %17 = tpu.iota {dimensions = array<i32: 1>} : vector<8x1024xi32>
    %c1024_i32 = arith.constant 1024 : i32
    %18 = vector.broadcast %c1024_i32 : i32 to vector<8x1024xi32>
    %19 = arith.muli %16, %18 : vector<8x1024xi32>
    %20 = arith.addi %19, %17 : vector<8x1024xi32>
    %c-1640531527_i32 = arith.constant -1640531527 : i32
    %21 = arith.muli %0, %c-1640531527_i32 : i32
    %22 = vector.broadcast %21 : i32 to vector<8x1024xi32>
    %23 = arith.xori %20, %22 : vector<8x1024xi32>
    %c-2048144789_i32 = arith.constant -2048144789 : i32
    %24 = vector.broadcast %c-2048144789_i32 : i32 to vector<8x1024xi32>
    %25 = arith.xori %23, %24 : vector<8x1024xi32>
    %c16_i32 = arith.constant 16 : i32
    %26 = vector.broadcast %c16_i32 : i32 to vector<8x1024xi32>
    %27 = arith.shrui %25, %26 : vector<8x1024xi32>
    %28 = arith.xori %25, %27 : vector<8x1024xi32>
    %c2146121005_i32 = arith.constant 2146121005 : i32
    %29 = vector.broadcast %c2146121005_i32 : i32 to vector<8x1024xi32>
    %30 = arith.muli %28, %29 : vector<8x1024xi32>
    %c15_i32 = arith.constant 15 : i32
    %31 = vector.broadcast %c15_i32 : i32 to vector<8x1024xi32>
    %32 = arith.shrui %30, %31 : vector<8x1024xi32>
    %33 = arith.xori %30, %32 : vector<8x1024xi32>
    %c-2073254261_i32 = arith.constant -2073254261 : i32
    %34 = vector.broadcast %c-2073254261_i32 : i32 to vector<8x1024xi32>
    %35 = arith.muli %33, %34 : vector<8x1024xi32>
    %c16_i32_8 = arith.constant 16 : i32
    %36 = vector.broadcast %c16_i32_8 : i32 to vector<8x1024xi32>
    %37 = arith.shrui %35, %36 : vector<8x1024xi32>
    %38 = arith.xori %35, %37 : vector<8x1024xi32>
    %c1288490188_i32 = arith.constant 1288490188 : i32
    %39 = vector.broadcast %c1288490188_i32 : i32 to vector<8x1024xi32>
    %40 = arith.cmpi uge, %38, %39 : vector<8x1024xi32>
    %cst_9 = arith.constant 1.42857146 : f32
    %41 = vector.broadcast %cst_9 : f32 to vector<8x1024xf32>
    %42 = arith.mulf %13, %41 : vector<8x1024xf32>
    %cst_10 = arith.constant 0.000000e+00 : f32
    %43 = vector.broadcast %cst_10 : f32 to vector<8x1024xf32>
    %44 = arith.select %40, %42, %43 : vector<8x1024xi1>, vector<8x1024xf32>
    %45 = arith.truncf %44 : vector<8x1024xf32> to vector<8x1024xbf16>
    %c0_11 = arith.constant 0 : index
    %c0_12 = arith.constant 0 : index
    %46 = vector.load %arg5[%c0_11, %c0_12] : memref<1024x512xbf16, #tpu.memory_space<vmem>>, vector<1024x512xbf16>
    %cst_13 = arith.constant dense<0.000000e+00> : vector<8x512xf32>
    %47 = tpu.matmul %45, %46, %cst_13 {dimension_numbers = #tpu.dot_dimension_numbers<[1], [0], [0], [1], [0, 0, 1, 1], [], []>} : vector<8x1024xbf16>, vector<1024x512xbf16>, vector<8x512xf32> -> vector<8x512xf32>
    %c0_14 = arith.constant 0 : index
    %c0_15 = arith.constant 0 : index
    %48 = vector.load %arg6[%c0_14, %c0_15] : memref<1x512xf32, #tpu.memory_space<vmem>>, vector<1x512xf32>
    %49 = vector.broadcast %48 : vector<1x512xf32> to vector<8x512xf32>
    %50 = arith.addf %47, %49 : vector<8x512xf32>
    %cst_16 = arith.constant 0.000000e+00 : f32
    %51 = vector.broadcast %cst_16 : f32 to vector<8x512xf32>
    %52 = arith.cmpf oge, %50, %51 : vector<8x512xf32>
    %cst_17 = arith.constant 2.000000e-01 : f32
    %53 = vector.broadcast %cst_17 : f32 to vector<8x512xf32>
    %54 = arith.mulf %53, %50 : vector<8x512xf32>
    %55 = arith.select %52, %50, %54 : vector<8x512xi1>, vector<8x512xf32>
    %56 = tpu.iota {dimensions = array<i32: 0>} : vector<8x512xi32>
    %57 = vector.broadcast %1 : i32 to vector<8x512xi32>
    %58 = arith.addi %56, %57 : vector<8x512xi32>
    %59 = tpu.iota {dimensions = array<i32: 1>} : vector<8x512xi32>
    %c512_i32 = arith.constant 512 : i32
    %60 = vector.broadcast %c512_i32 : i32 to vector<8x512xi32>
    %61 = arith.muli %58, %60 : vector<8x512xi32>
    %62 = arith.addi %61, %59 : vector<8x512xi32>
    %c-1640531527_i32_18 = arith.constant -1640531527 : i32
    %63 = arith.muli %0, %c-1640531527_i32_18 : i32
    %64 = vector.broadcast %63 : i32 to vector<8x512xi32>
    %65 = arith.xori %62, %64 : vector<8x512xi32>
    %c198677718_i32 = arith.constant 198677718 : i32
    %66 = vector.broadcast %c198677718_i32 : i32 to vector<8x512xi32>
    %67 = arith.xori %65, %66 : vector<8x512xi32>
    %c16_i32_19 = arith.constant 16 : i32
    %68 = vector.broadcast %c16_i32_19 : i32 to vector<8x512xi32>
    %69 = arith.shrui %67, %68 : vector<8x512xi32>
    %70 = arith.xori %67, %69 : vector<8x512xi32>
    %c2146121005_i32_20 = arith.constant 2146121005 : i32
    %71 = vector.broadcast %c2146121005_i32_20 : i32 to vector<8x512xi32>
    %72 = arith.muli %70, %71 : vector<8x512xi32>
    %c15_i32_21 = arith.constant 15 : i32
    %73 = vector.broadcast %c15_i32_21 : i32 to vector<8x512xi32>
    %74 = arith.shrui %72, %73 : vector<8x512xi32>
    %75 = arith.xori %72, %74 : vector<8x512xi32>
    %c-2073254261_i32_22 = arith.constant -2073254261 : i32
    %76 = vector.broadcast %c-2073254261_i32_22 : i32 to vector<8x512xi32>
    %77 = arith.muli %75, %76 : vector<8x512xi32>
    %c16_i32_23 = arith.constant 16 : i32
    %78 = vector.broadcast %c16_i32_23 : i32 to vector<8x512xi32>
    %79 = arith.shrui %77, %78 : vector<8x512xi32>
    %80 = arith.xori %77, %79 : vector<8x512xi32>
    %c1288490188_i32_24 = arith.constant 1288490188 : i32
    %81 = vector.broadcast %c1288490188_i32_24 : i32 to vector<8x512xi32>
    %82 = arith.cmpi uge, %80, %81 : vector<8x512xi32>
    %cst_25 = arith.constant 1.42857146 : f32
    %83 = vector.broadcast %cst_25 : f32 to vector<8x512xf32>
    %84 = arith.mulf %55, %83 : vector<8x512xf32>
    %cst_26 = arith.constant 0.000000e+00 : f32
    %85 = vector.broadcast %cst_26 : f32 to vector<8x512xf32>
    %86 = arith.select %82, %84, %85 : vector<8x512xi1>, vector<8x512xf32>
    %87 = arith.truncf %86 : vector<8x512xf32> to vector<8x512xbf16>
    %c0_27 = arith.constant 0 : index
    %c0_28 = arith.constant 0 : index
    %88 = vector.load %arg7[%c0_27, %c0_28] : memref<512x256xbf16, #tpu.memory_space<vmem>>, vector<512x256xbf16>
    %cst_29 = arith.constant dense<0.000000e+00> : vector<8x256xf32>
    %89 = tpu.matmul %87, %88, %cst_29 {dimension_numbers = #tpu.dot_dimension_numbers<[1], [0], [0], [1], [0, 0, 1, 1], [], []>} : vector<8x512xbf16>, vector<512x256xbf16>, vector<8x256xf32> -> vector<8x256xf32>
    %c0_30 = arith.constant 0 : index
    %c0_31 = arith.constant 0 : index
    %90 = vector.load %arg8[%c0_30, %c0_31] : memref<1x256xf32, #tpu.memory_space<vmem>>, vector<1x256xf32>
    %91 = vector.broadcast %90 : vector<1x256xf32> to vector<8x256xf32>
    %92 = arith.addf %89, %91 : vector<8x256xf32>
    %cst_32 = arith.constant 0.000000e+00 : f32
    %93 = vector.broadcast %cst_32 : f32 to vector<8x256xf32>
    %94 = arith.cmpf oge, %92, %93 : vector<8x256xf32>
    %cst_33 = arith.constant 2.000000e-01 : f32
    %95 = vector.broadcast %cst_33 : f32 to vector<8x256xf32>
    %96 = arith.mulf %95, %92 : vector<8x256xf32>
    %97 = arith.select %94, %92, %96 : vector<8x256xi1>, vector<8x256xf32>
    %98 = tpu.iota {dimensions = array<i32: 0>} : vector<8x256xi32>
    %99 = vector.broadcast %1 : i32 to vector<8x256xi32>
    %100 = arith.addi %98, %99 : vector<8x256xi32>
    %101 = tpu.iota {dimensions = array<i32: 1>} : vector<8x256xi32>
    %c256_i32 = arith.constant 256 : i32
    %102 = vector.broadcast %c256_i32 : i32 to vector<8x256xi32>
    %103 = arith.muli %100, %102 : vector<8x256xi32>
    %104 = arith.addi %103, %101 : vector<8x256xi32>
    %c-1640531527_i32_34 = arith.constant -1640531527 : i32
    %105 = arith.muli %0, %c-1640531527_i32_34 : i32
    %106 = vector.broadcast %105 : i32 to vector<8x256xi32>
    %107 = arith.xori %104, %106 : vector<8x256xi32>
    %c-1849467071_i32 = arith.constant -1849467071 : i32
    %108 = vector.broadcast %c-1849467071_i32 : i32 to vector<8x256xi32>
    %109 = arith.xori %107, %108 : vector<8x256xi32>
    %c16_i32_35 = arith.constant 16 : i32
    %110 = vector.broadcast %c16_i32_35 : i32 to vector<8x256xi32>
    %111 = arith.shrui %109, %110 : vector<8x256xi32>
    %112 = arith.xori %109, %111 : vector<8x256xi32>
    %c2146121005_i32_36 = arith.constant 2146121005 : i32
    %113 = vector.broadcast %c2146121005_i32_36 : i32 to vector<8x256xi32>
    %114 = arith.muli %112, %113 : vector<8x256xi32>
    %c15_i32_37 = arith.constant 15 : i32
    %115 = vector.broadcast %c15_i32_37 : i32 to vector<8x256xi32>
    %116 = arith.shrui %114, %115 : vector<8x256xi32>
    %117 = arith.xori %114, %116 : vector<8x256xi32>
    %c-2073254261_i32_38 = arith.constant -2073254261 : i32
    %118 = vector.broadcast %c-2073254261_i32_38 : i32 to vector<8x256xi32>
    %119 = arith.muli %117, %118 : vector<8x256xi32>
    %c16_i32_39 = arith.constant 16 : i32
    %120 = vector.broadcast %c16_i32_39 : i32 to vector<8x256xi32>
    %121 = arith.shrui %119, %120 : vector<8x256xi32>
    %122 = arith.xori %119, %121 : vector<8x256xi32>
    %c1288490188_i32_40 = arith.constant 1288490188 : i32
    %123 = vector.broadcast %c1288490188_i32_40 : i32 to vector<8x256xi32>
    %124 = arith.cmpi uge, %122, %123 : vector<8x256xi32>
    %cst_41 = arith.constant 1.42857146 : f32
    %125 = vector.broadcast %cst_41 : f32 to vector<8x256xf32>
    %126 = arith.mulf %97, %125 : vector<8x256xf32>
    %cst_42 = arith.constant 0.000000e+00 : f32
    %127 = vector.broadcast %cst_42 : f32 to vector<8x256xf32>
    %128 = arith.select %124, %126, %127 : vector<8x256xi1>, vector<8x256xf32>
    %c0_43 = arith.constant 0 : index
    %c0_44 = arith.constant 0 : index
    %129 = vector.load %arg9[%c0_43, %c0_44] : memref<1x256xf32, #tpu.memory_space<vmem>>, vector<1x256xf32>
    %130 = vector.broadcast %129 : vector<1x256xf32> to vector<8x256xf32>
    %131 = arith.mulf %128, %130 : vector<8x256xf32>
    %cst_45 = arith.constant dense<0.000000e+00> : vector<8xf32>
    %132 = vector.multi_reduction <add>, %131, %cst_45 [1] : vector<8x256xf32> to vector<8xf32>
    %133 = vector.shape_cast %132 : vector<8xf32> to vector<8x1xf32>
    %c0_46 = arith.constant 0 : index
    %c0_47 = arith.constant 0 : index
    %134 = vector.load %arg10[%c0_46, %c0_47] : memref<1x1xf32, #tpu.memory_space<vmem>>, vector<1x1xf32>
    %135 = vector.broadcast %134 : vector<1x1xf32> to vector<8x1xf32>
    %136 = arith.addf %133, %135 : vector<8x1xf32>
    %137 = arith.negf %136 : vector<8x1xf32>
    %138 = math.exp %137 : vector<8x1xf32>
    %cst_48 = arith.constant 1.000000e+00 : f32
    %139 = vector.broadcast %cst_48 : f32 to vector<8x1xf32>
    %140 = arith.addf %139, %138 : vector<8x1xf32>
    %141 = arith.divf %139, %140 : vector<8x1xf32>
    %c0_49 = arith.constant 0 : index
    %c0_50 = arith.constant 0 : index
    %142 = vector.load %arg11[%c0_49, %c0_50] : memref<8x1xf32, #tpu.memory_space<vmem>>, vector<8x1xf32>
    tpu.vector_store %arg11[%c0_49, %c0_50], %141 {strides = array<i32>} : memref<8x1xf32, #tpu.memory_space<vmem>>, vector<8x1xf32>,
    return
  }
  func.func @transform_0(%arg0: i32) -> i32 {
    %c0_i32 = arith.constant 0 : i32
    %c0_i32_0 = arith.constant 0 : i32
    return %c0_i32 : i32
  }
  func.func @transform_1(%arg0: i32) -> (i32, i32) {
    %c0_i32 = arith.constant 0 : i32
    %c0_i32_0 = arith.constant 0 : i32
    return %arg0, %c0_i32 : i32, i32
  }
  func.func @transform_2(%arg0: i32) -> (i32, i32) {
    %c0_i32 = arith.constant 0 : i32
    %c0_i32_0 = arith.constant 0 : i32
    %c0_i32_1 = arith.constant 0 : i32
    return %c0_i32, %c0_i32_0 : i32, i32
  }
  func.func @transform_3(%arg0: i32) -> (i32, i32) {
    %c0_i32 = arith.constant 0 : i32
    %c0_i32_0 = arith.constant 0 : i32
    %c0_i32_1 = arith.constant 0 : i32
    return %c0_i32, %c0_i32_0 : i32, i32
  }
  func.func @transform_4(%arg0: i32) -> (i32, i32) {
    %c0_i32 = arith.constant 0 : i32
    %c0_i32_0 = arith.constant 0 : i32
    %c0_i32_1 = arith.constant 0 : i32
    return %c0_i32, %c0_i32_0 : i32, i32
  }
  func.func @transform_5(%arg0: i32) -> (i32, i32) {
    %c0_i32 = arith.constant 0 : i32
    %c0_i32_0 = arith.constant 0 : i32
    %c0_i32_1 = arith.constant 0 : i32
    return %c0_i32, %c0_i32_0 : i32, i32
  }
  func.func @transform_6(%arg0: i32) -> (i32, i32) {
    %c0_i32 = arith.constant 0 : i32
    %c0_i32_0 = arith.constant 0 : i32
    %c0_i32_1 = arith.constant 0 : i32
    return %c0_i32, %c0_i32_0 : i32, i32
  }
  func.func @transform_7(%arg0: i32) -> (i32, i32) {
    %c0_i32 = arith.constant 0 : i32
    %c0_i32_0 = arith.constant 0 : i32
    %c0_i32_1 = arith.constant 0 : i32
    return %c0_i32, %c0_i32_0 : i32, i32
  }
  func.func @transform_8(%arg0: i32) -> (i32, i32) {
    %c0_i32 = arith.constant 0 : i32
    %c0_i32_0 = arith.constant 0 : i32
    %c0_i32_1 = arith.constant 0 : i32
    return %c0_i32, %c0_i32_0 : i32, i32
  }
  func.func @transform_9(%arg0: i32) -> (i32, i32) {
    %c0_i32 = arith.constant 0 : i32
    %c0_i32_0 = arith.constant 0 : i32
    %c0_i32_1 = arith.constant 0 : i32
    return %c0_i32, %c0_i32_0 : i32, i32
  }
  func.func @transform_10(%arg0: i32) -> (i32, i32) {
    %c0_i32 = arith.constant 0 : i32
    %c0_i32_0 = arith.constant 0 : i32
    return %arg0, %c0_i32 : i32, i32
  }
}

</mosaic_0001>

<bundles_post_ra>
// kernel: tpu_custom_call.1
= control target key start
LH: loop header
LB: loop body
LE: loop exit
PB: predicated region body
PF: predicated region fallthrough
CT: control target
= control target key end

     0   :  { %s6168_s0 = inlined_call_operand.<no memory space> [shape: s32[1], index: 0, kind: input, shape index: {}]   ;;  %s6169_s1 = inlined_call_operand.hbm [shape: f32[8,128], index: 1, kind: input, shape index: {}]   ;;  %s6170_s2 = inlined_call_operand.hbm [shape: bf16[128,1024], index: 2, kind: input, shape index: {}]   ;;  %s6171_s3 = inlined_call_operand.hbm [shape: f32[1,1024], index: 3, kind: input, shape index: {}]   ;;  %s6172_s4 = inlined_call_operand.hbm [shape: bf16[1024,512], index: 4, kind: input, shape index: {}]   ;;  %s6173_s5 = inlined_call_operand.vmem [shape: f32[1,512], index: 5, kind: input, shape index: {}]   ;;  %s6174_s6 = inlined_call_operand.hbm [shape: bf16[512,256], index: 6, kind: input, shape index: {}]   ;;  %s6175_s7 = inlined_call_operand.vmem [shape: f32[1,256], index: 7, kind: input, shape index: {}]   ;;  %s6176_s8 = inlined_call_operand.vmem [shape: f32[1,256], index: 8, kind: input, shape index: {}]   ;;  %s6177_s9 = inlined_call_operand.<no memory space> [shape: f32[1,1], index: 9, kind: input, shape index: {}]   ;;  %s6178_s10 = inlined_call_operand.vmem [shape: f32[8,1], index: 10, kind: output, shape index: {}]  }
   0x1   :  { %v16_v0 = vstv %s6177_s9 }
   0x2   :  { %17 = vst [vmem:[#allocation3] sm:$0x1] %v16_v0 }
   0x3   :  { %18 = vsyncpa [#allocation5], 0 }
   0x4   :  { %19 = vsyncpa [#allocation7], 0  ;;  %s38_s17 = sshll.u32 %s6170_s2, 4  ;;  %s39_s17 = int_to_ptr.hbm [resolvable:$true] %s38_s17 }
   0x5   :  { %20 = vsyncpa [#allocation10], 0  ;;  %s5615_s18 = smov [#allocation6]   ;;  %s62_s22 = sshll.u32 %s6172_s4, 4  ;;  %s63_s22 = int_to_ptr.hbm [resolvable:$true] %s62_s22 }
   0x6   :  { %s40_s19 = sshll.u32 %s5615_s18, 4  ;;  %s5616_s23 = smov 512   ;;  %s41_s19 = int_to_ptr.vmem [resolvable:$true] %s40_s19 }
   0x7   :  { %s5617_s24 = smov 32   ;;  %s5618_s9 = smov [#allocation9]  }
   0x8   :  { %46 = dma.hbm_to_vmem [thread:$0]  %s39_s17, 8192, %s41_s19, [#allocation7], %s5616_s23, %s5616_s23, %s5617_s24  }
   0x9   :  { %s64_s25 = sshll.u32 %s5618_s9, 4  ;;  %s5619_s26 = smov 256   ;;  %s65_s25 = int_to_ptr.vmem [resolvable:$true] %s64_s25 }
   0xa   :  { %s5620_s27 = smov 16   ;;  %s28_s29 = sshll.u32 %s6169_s1, 4  ;;  %s29_s29 = int_to_ptr.hbm [resolvable:$true] %s28_s29 }
   0xb   :  { %70 = dma.hbm_to_vmem [thread:$0]  %s63_s22, 32768, %s65_s25, [#allocation10], %s5619_s26, %s5619_s26, %s5620_s27  }
   0xc   :  { %s5621_s30 = smov [#allocation4]   ;;  %s52_s13 = sshll.u32 %s6171_s3, 4  ;;  %s53_s13 = int_to_ptr.hbm [resolvable:$true] %s52_s13 }
   0xd   :  { %s30_s11 = sshll.u32 %s5621_s30, 4  ;;  %s5622_s14 = smov [#allocation8]   ;;  %s31_s11 = int_to_ptr.vmem [resolvable:$true] %s30_s11 }
   0xe   :  { %33 = dma.hbm_to_vmem [thread:$0]  %s29_s29, 128, %s31_s11, [#allocation5]  }
   0xf   :  { %s54_s15 = sshll.u32 %s5622_s14, 4  ;;  %s77_s18 = sshll.u32 %s6174_s6, 4  ;;  %s55_s15 = int_to_ptr.vmem [resolvable:$true] %s54_s15  ;;  %s78_s18 = int_to_ptr.hbm [resolvable:$true] %s77_s18 }
  0x10   :  { %57 = dma.hbm_to_vmem [thread:$0]  %s53_s13, 128, %s55_s15, [#allocation7]  }
  0x11   :  { %s5623_s1 = smov [#allocation11]   ;;  %s5624_s20 = smov 128  }
  0x12   :  { %s79_s19 = sshll.u32 %s5623_s1, 4  ;;  %s5625_s21 = smov 8   ;;  %s80_s19 = int_to_ptr.vmem [resolvable:$true] %s79_s19 }
  0x13   :  { %85 = dma.hbm_to_vmem [thread:$0]  %s78_s18, 8192, %s80_s19, [#allocation10], %s5624_s20, %s5624_s20, %s5625_s21  }
  0x14   :  { %5609 = dma.done.wait [#allocation5], 128  }
  0x15   :  { %5610 = vsyncadd [#allocation5], 4294967168 }
  0x16   :  { %5611 = dma.done.wait [#allocation7], 8320  }
  0x17   :  { %5612 = vsyncadd [#allocation7], 4294958976 }
  0x18   :  { %5613 = dma.done.wait [#allocation10], 40960  }
  0x19   :  { %5614 = vsyncadd [#allocation10], 4294926336  ;;  %v3644_v1 = vld [vmem:[#allocation6 + $0x1c0] sm:$0xf]  ;;  %v5145_v3 = vld [vmem:[#allocation6 + $0x1c4] sm:$0xf] }
  0x1a   :  { %v5149_v2 = vld [vmem:[#allocation6 + $0x1dc] sm:$0xf0]  ;;  %v3646_v5 = vld [vmem:[#allocation6 + $0x1e0] sm:$0xf0]  ;;  %v3652_v6 = vld [vmem:[#allocation6 + $0x1c8] sm:$0xf] }
  0x1b   :  { %v3645_v4 = vor.u32 %v5149_v2, %v3644_v1  ;;  %v5150_v7 = vld [vmem:[#allocation6 + $0x1e4] sm:$0xf0]  ;;  %v3649_v8 = vor.u32 %v5145_v3, %v3646_v5  ;;  %v5146_v10 = vld [vmem:[#allocation6 + $0x1cc] sm:$0xf]  ;;  %v3612_v12 = vld [vmem:[#allocation6 + $0x180] sm:$0xf] }
  0x1c   :  { %v3653_v9 = vor.u32 %v5150_v7, %v3652_v6  ;;  %v3654_v11 = vld [vmem:[#allocation6 + $0x1e8] sm:$0xf0]  ;;  %v5141_v14 = vld [vmem:[#allocation6 + $0x19c] sm:$0xf0]  ;;  %v5137_v15 = vld [vmem:[#allocation6 + $0x184] sm:$0xf] }
  0x1d   :  { %518 = vmatpush.bf16.msra.mxu0 %v3645_v4  ;;  %v3657_v13 = vor.u32 %v5146_v10, %v3654_v11  ;;  %v3614_v16 = vld [vmem:[#allocation6 + $0x1a0] sm:$0xf0]  ;;  %531 = vmatpush.bf16.msra.mxu1 %v3649_v8  ;;  %v3613_v17 = vor.u32 %v5141_v14, %v3612_v12  ;;  %v3620_v19 = vld [vmem:[#allocation6 + $0x188] sm:$0xf]  ;;  %v5138_v21 = vld [vmem:[#allocation6 + $0x18c] sm:$0xf] }
  0x1e   :  { %544 = vmatpush.bf16.msra.mxu2 %v3653_v9  ;;  %v3617_v18 = vor.u32 %v5137_v15, %v3614_v16  ;;  %v5142_v20 = vld [vmem:[#allocation6 + $0x1a4] sm:$0xf0]  ;;  %v3622_v23 = vld [vmem:[#allocation6 + $0x1a8] sm:$0xf0]  ;;  %v3580_v24 = vld [vmem:[#allocation6 + $0x140] sm:$0xf] }
  0x1f   :  { %557 = vmatpush.bf16.msra.mxu3 %v3657_v13  ;;  %v3621_v22 = vor.u32 %v5142_v20, %v3620_v19  ;;  %v5133_v25 = vld [vmem:[#allocation6 + $0x15c] sm:$0xf0]  ;;  %v3625_v26 = vor.u32 %v5138_v21, %v3622_v23  ;;  %v5129_v27 = vld [vmem:[#allocation6 + $0x144] sm:$0xf]  ;;  %v3588_v29 = vld [vmem:[#allocation6 + $0x148] sm:$0xf] }
  0x20   :  { %v3582_v28 = vld [vmem:[#allocation6 + $0x160] sm:$0xf0]  ;;  %v3581_v30 = vor.u32 %v5133_v25, %v3580_v24  ;;  %v5134_v31 = vld [vmem:[#allocation6 + $0x164] sm:$0xf0]  ;;  %v5130_v32 = vld [vmem:[#allocation6 + $0x14c] sm:$0xf] }
  0x21   :  { %519 = vmatpush.bf16.msra.mxu0 %v3613_v17  ;;  %v3590_v33 = vld [vmem:[#allocation6 + $0x168] sm:$0xf0]  ;;  %532 = vmatpush.bf16.msra.mxu1 %v3617_v18  ;;  %v3585_v34 = vor.u32 %v5129_v27, %v3582_v28  ;;  %v3589_v35 = vor.u32 %v5134_v31, %v3588_v29  ;;  %v3548_v36 = vld [vmem:[#allocation6 + $0x100] sm:$0xf]  ;;  %v5121_v38 = vld [vmem:[#allocation6 + $0x104] sm:$0xf] }
  0x22   :  { %545 = vmatpush.bf16.msra.mxu2 %v3621_v22  ;;  %v5125_v37 = vld [vmem:[#allocation6 + $0x11c] sm:$0xf0]  ;;  %v3593_v39 = vor.u32 %v5130_v32, %v3590_v33  ;;  %v3550_v40 = vld [vmem:[#allocation6 + $0x120] sm:$0xf0]  ;;  %v3556_v41 = vld [vmem:[#allocation6 + $0x108] sm:$0xf] }
  0x23   :  { %558 = vmatpush.bf16.msra.mxu3 %v3625_v26  ;;  %v5126_v42 = vld [vmem:[#allocation6 + $0x124] sm:$0xf0]  ;;  %v5122_v43 = vld [vmem:[#allocation6 + $0x10c] sm:$0xf]  ;;  %v3549_v45 = vor.u32 %v5125_v37, %v3548_v36  ;;  %v3553_v46 = vor.u32 %v5121_v38, %v3550_v40  ;;  %v3516_v48 = vld [vmem:[#allocation6 + $0xc0] sm:$0xf] }
  0x24   :  { %v3558_v44 = vld [vmem:[#allocation6 + $0x128] sm:$0xf0]  ;;  %v3557_v47 = vor.u32 %v5126_v42, %v3556_v41  ;;  %v5117_v49 = vld [vmem:[#allocation6 + $0xdc] sm:$0xf0]  ;;  %v5113_v50 = vld [vmem:[#allocation6 + $0xc4] sm:$0xf] }
  0x25   :  { %520 = vmatpush.bf16.msra.mxu0 %v3581_v30  ;;  %533 = vmatpush.bf16.msra.mxu1 %v3585_v34  ;;  %v3561_v51 = vor.u32 %v5122_v43, %v3558_v44  ;;  %v3518_v52 = vld [vmem:[#allocation6 + $0xe0] sm:$0xf0]  ;;  %v3524_v53 = vld [vmem:[#allocation6 + $0xc8] sm:$0xf]  ;;  %v5114_v55 = vld [vmem:[#allocation6 + $0xcc] sm:$0xf]  ;;  %v3517_v57 = vor.u32 %v5117_v49, %v3516_v48 }
  0x26   :  { %546 = vmatpush.bf16.msra.mxu2 %v3589_v35  ;;  %v5118_v54 = vld [vmem:[#allocation6 + $0xe4] sm:$0xf0]  ;;  %v3526_v56 = vld [vmem:[#allocation6 + $0xe8] sm:$0xf0]  ;;  %v3521_v58 = vor.u32 %v5113_v50, %v3518_v52  ;;  %v3484_v60 = vld [vmem:[#allocation6 + $0x80] sm:$0xf] }
  0x27   :  { %559 = vmatpush.bf16.msra.mxu3 %v3593_v39  ;;  %v3525_v59 = vor.u32 %v5118_v54, %v3524_v53  ;;  %v5109_v61 = vld [vmem:[#allocation6 + $0x9c] sm:$0xf0]  ;;  %v5105_v62 = vld [vmem:[#allocation6 + $0x84] sm:$0xf]  ;;  %v3529_v63 = vor.u32 %v5114_v55, %v3526_v56  ;;  %v3492_v1 = vld [vmem:[#allocation6 + $0x88] sm:$0xf] }
  0x28   :  { %v3486_v0 = vld [vmem:[#allocation6 + $0xa0] sm:$0xf0]  ;;  %v5110_v2 = vld [vmem:[#allocation6 + $0xa4] sm:$0xf0]  ;;  %v5106_v3 = vld [vmem:[#allocation6 + $0x8c] sm:$0xf]  ;;  %v3485_v5 = vor.u32 %v5109_v61, %v3484_v60 }
  0x29   :  { %521 = vmatpush.bf16.msra.mxu0 %v3549_v45  ;;  %534 = vmatpush.bf16.msra.mxu1 %v3553_v46  ;;  %v3494_v4 = vld [vmem:[#allocation6 + $0xa8] sm:$0xf0]  ;;  %v3489_v6 = vor.u32 %v5105_v62, %v3486_v0  ;;  %v3493_v7 = vor.u32 %v5110_v2, %v3492_v1  ;;  %v3452_v8 = vld [vmem:[#allocation6 + $0x40] sm:$0xf]  ;;  %v5097_v10 = vld [vmem:[#allocation6 + $0x44] sm:$0xf] }
  0x2a   :  { %547 = vmatpush.bf16.msra.mxu2 %v3557_v47  ;;  %v5101_v9 = vld [vmem:[#allocation6 + $0x5c] sm:$0xf0]  ;;  %v3497_v11 = vor.u32 %v5106_v3, %v3494_v4  ;;  %v3454_v12 = vld [vmem:[#allocation6 + $0x60] sm:$0xf0]  ;;  %v3460_v13 = vld [vmem:[#allocation6 + $0x48] sm:$0xf] }
  0x2b   :  { %560 = vmatpush.bf16.msra.mxu3 %v3561_v51  ;;  %v5102_v14 = vld [vmem:[#allocation6 + $0x64] sm:$0xf0]  ;;  %v5098_v15 = vld [vmem:[#allocation6 + $0x4c] sm:$0xf]  ;;  %v3453_v17 = vor.u32 %v5101_v9, %v3452_v8  ;;  %v3420_v18 = vld [vmem:[#allocation6] sm:$0xf]  ;;  %v3457_v20 = vor.u32 %v5097_v10, %v3454_v12 }
  0x2c   :  { %v3462_v16 = vld [vmem:[#allocation6 + $0x68] sm:$0xf0]  ;;  %v5093_v19 = vld [vmem:[#allocation6 + $0x1c] sm:$0xf0]  ;;  %v3461_v21 = vor.u32 %v5102_v14, %v3460_v13  ;;  %v5089_v22 = vld [vmem:[#allocation6 + $0x4] sm:$0xf] }
  0x2d   :  { %522 = vmatpush.bf16.msra.mxu0 %v3517_v57  ;;  %535 = vmatpush.bf16.msra.mxu1 %v3521_v58  ;;  %v3422_v23 = vld [vmem:[#allocation6 + $0x20] sm:$0xf0]  ;;  %v3428_v24 = vld [vmem:[#allocation6 + $0x8] sm:$0xf]  ;;  %v3465_v25 = vor.u32 %v5098_v15, %v3462_v16  ;;  %v5090_v27 = vld [vmem:[#allocation6 + $0xc] sm:$0xf]  ;;  %v3421_v32 = vor.u32 %v5093_v19, %v3420_v18 }
  0x2e   :  { %548 = vmatpush.bf16.msra.mxu2 %v3525_v59  ;;  %v5094_v26 = vld [vmem:[#allocation6 + $0x24] sm:$0xf0]  ;;  %v3430_v28 = vld [vmem:[#allocation6 + $0x28] sm:$0xf0]  ;;  %v3660_v29 = vld [vmem:[#allocation6 + $0x1d0] sm:$0xf]  ;;  %v3425_v36 = vor.u32 %v5089_v22, %v3422_v23 }
  0x2f   :  { %561 = vmatpush.bf16.msra.mxu3 %v3529_v63  ;;  %v5151_v30 = vld [vmem:[#allocation6 + $0x1ec] sm:$0xf0]  ;;  %v5147_v31 = vld [vmem:[#allocation6 + $0x1d4] sm:$0xf]  ;;  %v3668_v34 = vld [vmem:[#allocation6 + $0x1d8] sm:$0xf]  ;;  %v3429_v37 = vor.u32 %v5094_v26, %v3428_v24  ;;  %v3433_v41 = vor.u32 %v5090_v27, %v3430_v28 }
  0x30   :  { %v3662_v33 = vld [vmem:[#allocation6 + $0x1f0] sm:$0xf0]  ;;  %v5152_v35 = vld [vmem:[#allocation6 + $0x1f4] sm:$0xf0]  ;;  %v5148_v38 = vld [vmem:[#allocation6 + $0x1dc] sm:$0xf]  ;;  %v3661_v42 = vor.u32 %v5151_v30, %v3660_v29 }
  0x31   :  { %523 = vmatpush.bf16.msra.mxu0 %v3485_v5  ;;  %536 = vmatpush.bf16.msra.mxu1 %v3489_v6  ;;  %v3670_v39 = vld [vmem:[#allocation6 + $0x1f8] sm:$0xf0]  ;;  %v3665_v43 = vor.u32 %v5147_v31, %v3662_v33  ;;  %v3669_v44 = vor.u32 %v5152_v35, %v3668_v34  ;;  %v3628_v45 = vld [vmem:[#allocation6 + $0x190] sm:$0xf]  ;;  %v5139_v47 = vld [vmem:[#allocation6 + $0x194] sm:$0xf] }
  0x32   :  { %549 = vmatpush.bf16.msra.mxu2 %v3493_v7  ;;  %v114_v40 = vld [vmem:[#allocation4] sm:$0xff]  ;;  %v5143_v46 = vld [vmem:[#allocation6 + $0x1ac] sm:$0xf0]  ;;  %v3673_v48 = vor.u32 %v5148_v38, %v3670_v39  ;;  %v3630_v50 = vld [vmem:[#allocation6 + $0x1b0] sm:$0xf0] }
  0x33   :  { %562 = vmatpush.bf16.msra.mxu3 %v3497_v11  ;;  %v5699_v49 = vpack.c.bf16 %v114_v40, %v114_v40  ;;  %v3636_v51 = vld [vmem:[#allocation6 + $0x198] sm:$0xf]  ;;  %v5140_v53 = vld [vmem:[#allocation6 + $0x19c] sm:$0xf]  ;;  %v3629_v55 = vor.u32 %v5143_v46, %v3628_v45  ;;  %v3633_v56 = vor.u32 %v5139_v47, %v3630_v50  ;;  %v3596_v58 = vld [vmem:[#allocation6 + $0x150] sm:$0xf] }
  0x34   :  { %v5144_v52 = vld [vmem:[#allocation6 + $0x1b4] sm:$0xf0]  ;;  %v3638_v54 = vld [vmem:[#allocation6 + $0x1b8] sm:$0xf0]  ;;  %v5135_v59 = vld [vmem:[#allocation6 + $0x16c] sm:$0xf0] }
  0x35   :  { %524 = vmatpush.bf16.msra.mxu0 %v3453_v17  ;;  %537 = vmatpush.bf16.msra.mxu1 %v3457_v20  ;;  %v3637_v57 = vor.u32 %v5144_v52, %v3636_v51  ;;  %v5131_v60 = vld [vmem:[#allocation6 + $0x154] sm:$0xf]  ;;  %v3641_v61 = vor.u32 %v5140_v53, %v3638_v54  ;;  %v3604_v63 = vld [vmem:[#allocation6 + $0x158] sm:$0xf]  ;;  %v5132_v1 = vld [vmem:[#allocation6 + $0x15c] sm:$0xf]  ;;  %v3597_v3 = vor.u32 %v5135_v59, %v3596_v58 }
  0x36   :  { %550 = vmatpush.bf16.msra.mxu2 %v3461_v21  ;;  %v3598_v62 = vld [vmem:[#allocation6 + $0x170] sm:$0xf0]  ;;  %v5136_v0 = vld [vmem:[#allocation6 + $0x174] sm:$0xf0]  ;;  %v3606_v2 = vld [vmem:[#allocation6 + $0x178] sm:$0xf0] }
  0x37   :  { %563 = vmatpush.bf16.msra.mxu3 %v3465_v25  ;;  %v3601_v4 = vor.u32 %v5131_v60, %v3598_v62  ;;  %v3605_v5 = vor.u32 %v5136_v0, %v3604_v63  ;;  %v3564_v6 = vld [vmem:[#allocation6 + $0x110] sm:$0xf]  ;;  %v5123_v8 = vld [vmem:[#allocation6 + $0x114] sm:$0xf]  ;;  %v3609_v9 = vor.u32 %v5132_v1, %v3606_v2  ;;  %v3572_v11 = vld [vmem:[#allocation6 + $0x118] sm:$0xf] }
  0x38   :  { %v5127_v7 = vld [vmem:[#allocation6 + $0x12c] sm:$0xf0]  ;;  %v3566_v10 = vld [vmem:[#allocation6 + $0x130] sm:$0xf0]  ;;  %v5128_v12 = vld [vmem:[#allocation6 + $0x134] sm:$0xf0] }
  0x39   :  { %525 = vmatpush.bf16.msra.mxu0 %v3421_v32  ;;  %538 = vmatpush.bf16.msra.mxu1 %v3425_v36  ;;  %v5124_v13 = vld [vmem:[#allocation6 + $0x11c] sm:$0xf]  ;;  %v3565_v15 = vor.u32 %v5127_v7, %v3564_v6  ;;  %v3569_v16 = vor.u32 %v5123_v8, %v3566_v10  ;;  %v3573_v17 = vor.u32 %v5128_v12, %v3572_v11  ;;  %v3532_v18 = vld [vmem:[#allocation6 + $0xd0] sm:$0xf]  ;;  %v5115_v20 = vld [vmem:[#allocation6 + $0xd4] sm:$0xf] }
  0x3a   :  { %551 = vmatpush.bf16.msra.mxu2 %v3429_v37  ;;  %v3574_v14 = vld [vmem:[#allocation6 + $0x138] sm:$0xf0]  ;;  %v5119_v19 = vld [vmem:[#allocation6 + $0xec] sm:$0xf0]  ;;  %v3534_v22 = vld [vmem:[#allocation6 + $0xf0] sm:$0xf0] }
  0x3b   :  { %564 = vmatpush.bf16.msra.mxu3 %v3433_v41  ;;  %v3577_v21 = vor.u32 %v5124_v13, %v3574_v14  ;;  %v3540_v23 = vld [vmem:[#allocation6 + $0xd8] sm:$0xf]  ;;  %v5116_v25 = vld [vmem:[#allocation6 + $0xdc] sm:$0xf]  ;;  %v3533_v27 = vor.u32 %v5119_v19, %v3532_v18  ;;  %v3537_v28 = vor.u32 %v5115_v20, %v3534_v22  ;;  %v3500_v30 = vld [vmem:[#allocation6 + $0x90] sm:$0xf] }
  0x3c   :  { %526 = vmatmul.bf16.vlgmr.msra.gmra.mxu0 %v5699_v49  ;;  %539 = vmatmul.bf16.vlgmr.msra.gmra.mxu1 %v5699_v49  ;;  %v5120_v24 = vld [vmem:[#allocation6 + $0xf4] sm:$0xf0]  ;;  %v3542_v26 = vld [vmem:[#allocation6 + $0xf8] sm:$0xf0]  ;;  %v5111_v31 = vld [vmem:[#allocation6 + $0xac] sm:$0xf0] }
  0x3d   :  { %570 = vmatpush.bf16.msrb.mxu0 %v3661_v42  ;;  %583 = vmatpush.bf16.msrb.mxu1 %v3665_v43  ;;  %v3541_v29 = vor.u32 %v5120_v24, %v3540_v23  ;;  %v5107_v32 = vld [vmem:[#allocation6 + $0x94] sm:$0xf]  ;;  %v3545_v33 = vor.u32 %v5116_v25, %v3542_v26  ;;  %v3508_v35 = vld [vmem:[#allocation6 + $0x98] sm:$0xf]  ;;  %v5108_v37 = vld [vmem:[#allocation6 + $0x9c] sm:$0xf]  ;;  %v3501_v39 = vor.u32 %v5111_v31, %v3500_v30 }
  0x3e   :  { %596 = vmatpush.bf16.msrb.mxu2 %v3669_v44  ;;  %565 = vmatmul.bf16.vlgmr.msra.gmra.mxu3 %v5699_v49  ;;  %v3502_v34 = vld [vmem:[#allocation6 + $0xb0] sm:$0xf0]  ;;  %v5112_v36 = vld [vmem:[#allocation6 + $0xb4] sm:$0xf0]  ;;  %v3510_v38 = vld [vmem:[#allocation6 + $0xb8] sm:$0xf0] }
  0x3f   :  { %609 = vmatpush.bf16.msrb.mxu3 %v3673_v48  ;;  %552 = vmatmul.bf16.vlgmr.msra.gmra.mxu2 %v5699_v49  ;;  %v3505_v40 = vor.u32 %v5107_v32, %v3502_v34  ;;  %v3509_v41 = vor.u32 %v5112_v36, %v3508_v35  ;;  %v3468_v42 = vld [vmem:[#allocation6 + $0x50] sm:$0xf]  ;;  %v5099_v44 = vld [vmem:[#allocation6 + $0x54] sm:$0xf]  ;;  %v3513_v45 = vor.u32 %v5108_v37, %v3510_v38  ;;  %v3476_v47 = vld [vmem:[#allocation6 + $0x58] sm:$0xf] }
  0x40   :  { %v5103_v43 = vld [vmem:[#allocation6 + $0x6c] sm:$0xf0]  ;;  %v3470_v46 = vld [vmem:[#allocation6 + $0x70] sm:$0xf0]  ;;  %v5104_v48 = vld [vmem:[#allocation6 + $0x74] sm:$0xf0] }
  0x41   :  { %571 = vmatpush.bf16.msrb.mxu0 %v3629_v55  ;;  %584 = vmatpush.bf16.msrb.mxu1 %v3633_v56  ;;  %v5100_v50 = vld [vmem:[#allocation6 + $0x5c] sm:$0xf]  ;;  %v3469_v52 = vor.u32 %v5103_v43, %v3468_v42  ;;  %v3436_v53 = vld [vmem:[#allocation6 + $0x10] sm:$0xf]  ;;  %v3473_v54 = vor.u32 %v5099_v44, %v3470_v46  ;;  %v3477_v55 = vor.u32 %v5104_v48, %v3476_v47  ;;  %v3438_v58 = vld [vmem:[#allocation6 + $0x30] sm:$0xf0] }
  0x42   :  { %597 = vmatpush.bf16.msrb.mxu2 %v3637_v57  ;;  %v3478_v51 = vld [vmem:[#allocation6 + $0x78] sm:$0xf0]  ;;  %v5095_v56 = vld [vmem:[#allocation6 + $0x2c] sm:$0xf0]  ;;  %v5091_v57 = vld [vmem:[#allocation6 + $0x14] sm:$0xf] }
  0x43   :  { %610 = vmatpush.bf16.msrb.mxu3 %v3641_v61  ;;  %v3481_v59 = vor.u32 %v5100_v50, %v3478_v51  ;;  %v3444_v60 = vld [vmem:[#allocation6 + $0x18] sm:$0xf]  ;;  %v5092_v62 = vld [vmem:[#allocation6 + $0x1c] sm:$0xf]  ;;  %v3796_v0 = vld [vmem:[#allocation9 + $0xe0] sm:$0xf]  ;;  %v3437_v2 = vor.u32 %v5095_v56, %v3436_v53 }
  0x44   :  { %v5096_v61 = vld [vmem:[#allocation6 + $0x34] sm:$0xf0]  ;;  %v3446_v63 = vld [vmem:[#allocation6 + $0x38] sm:$0xf0]  ;;  %v4052_v10 = vld [vmem:[#allocation9 + $0x2e0] sm:$0xf] }
  0x45   :  { %572 = vmatpush.bf16.msrb.mxu0 %v3597_v3  ;;  %585 = vmatpush.bf16.msrb.mxu1 %v3601_v4  ;;  %v5183_v1 = vld [vmem:[#allocation9 + $0xec] sm:$0xf0]  ;;  %v3924_v3 = vld [vmem:[#allocation9 + $0x1e0] sm:$0xf]  ;;  %v3445_v6 = vor.u32 %v5096_v61, %v3444_v60  ;;  %v3449_v7 = vor.u32 %v5092_v62, %v3446_v63  ;;  %s668_s22 = smul.u32 2654435769, %s6168_s0 }
  0x46   :  { %598 = vmatpush.bf16.msrb.mxu2 %v3605_v5  ;;  %v5215_v4 = vld [vmem:[#allocation9 + $0x1ec] sm:$0xf0]  ;;  %v3441_v5 = vor.u32 %v5091_v57, %v3438_v58  ;;  %v3797_v8 = vor.u32 %v5183_v1, %v3796_v0  ;;  %v4180_v14 = vld [vmem:[#allocation9 + $0x3e0] sm:$0xf] }
  0x47   :  { %611 = vmatpush.bf16.msrb.mxu3 %v3609_v9  ;;  %v3780_v9 = vld [vmem:[#allocation9 + $0xc0] sm:$0xf]  ;;  %v5247_v11 = vld [vmem:[#allocation9 + $0x2ec] sm:$0xf0]  ;;  %v3925_v12 = vor.u32 %v5215_v4, %v3924_v3 }
  0x48   :  { %v5179_v13 = vld [vmem:[#allocation9 + $0xcc] sm:$0xf0]  ;;  %v4053_v18 = vor.u32 %v5247_v11, %v4052_v10  ;;  %v4036_v22 = vld [vmem:[#allocation9 + $0x2c0] sm:$0xf] }
  0x49   :  { %573 = vmatpush.bf16.msrb.mxu0 %v3565_v15  ;;  %586 = vmatpush.bf16.msrb.mxu1 %v3569_v16  ;;  %v5279_v15 = vld [vmem:[#allocation9 + $0x3ec] sm:$0xf0]  ;;  %v3908_v16 = vld [vmem:[#allocation9 + $0x1c0] sm:$0xf]  ;;  %v3781_v19 = vor.u32 %v5179_v13, %v3780_v9 }
  0x4a   :  { %599 = vmatpush.bf16.msrb.mxu2 %v3573_v17  ;;  %v5211_v17 = vld [vmem:[#allocation9 + $0x1cc] sm:$0xf0]  ;;  %v4181_v20 = vor.u32 %v5279_v15, %v4180_v14  ;;  %v4164_v26 = vld [vmem:[#allocation9 + $0x3c0] sm:$0xf] }
  0x4b   :  { %612 = vmatpush.bf16.msrb.mxu3 %v3577_v21  ;;  %v3764_v21 = vld [vmem:[#allocation9 + $0xa0] sm:$0xf]  ;;  %v5243_v23 = vld [vmem:[#allocation9 + $0x2cc] sm:$0xf0]  ;;  %v3909_v24 = vor.u32 %v5211_v17, %v3908_v16 }
  0x4c   :  { %v5175_v25 = vld [vmem:[#allocation9 + $0xac] sm:$0xf0]  ;;  %v4037_v30 = vor.u32 %v5243_v23, %v4036_v22  ;;  %v4020_v34 = vld [vmem:[#allocation9 + $0x2a0] sm:$0xf] }
  0x4d   :  { %574 = vmatpush.bf16.msrb.mxu0 %v3533_v27  ;;  %587 = vmatpush.bf16.msrb.mxu1 %v3537_v28  ;;  %v5275_v27 = vld [vmem:[#allocation9 + $0x3cc] sm:$0xf0]  ;;  %v3892_v28 = vld [vmem:[#allocation9 + $0x1a0] sm:$0xf]  ;;  %v3765_v31 = vor.u32 %v5175_v25, %v3764_v21 }
  0x4e   :  { %600 = vmatpush.bf16.msrb.mxu2 %v3541_v29  ;;  %v5207_v29 = vld [vmem:[#allocation9 + $0x1ac] sm:$0xf0]  ;;  %v4165_v32 = vor.u32 %v5275_v27, %v4164_v26  ;;  %v4148_v38 = vld [vmem:[#allocation9 + $0x3a0] sm:$0xf] }
  0x4f   :  { %613 = vmatpush.bf16.msrb.mxu3 %v3545_v33  ;;  %v3748_v33 = vld [vmem:[#allocation9 + $0x80] sm:$0xf]  ;;  %v5239_v35 = vld [vmem:[#allocation9 + $0x2ac] sm:$0xf0]  ;;  %v3893_v36 = vor.u32 %v5207_v29, %v3892_v28 }
  0x50   :  { %v5171_v37 = vld [vmem:[#allocation9 + $0x8c] sm:$0xf0]  ;;  %v4021_v42 = vor.u32 %v5239_v35, %v4020_v34  ;;  %v3732_v43 = vld [vmem:[#allocation9 + $0x60] sm:$0xf] }
  0x51   :  { %575 = vmatpush.bf16.msrb.mxu0 %v3501_v39  ;;  %588 = vmatpush.bf16.msrb.mxu1 %v3505_v40  ;;  %v5271_v39 = vld [vmem:[#allocation9 + $0x3ac] sm:$0xf0]  ;;  %v3876_v40 = vld [vmem:[#allocation9 + $0x180] sm:$0xf] }
  0x52   :  { %601 = vmatpush.bf16.msrb.mxu2 %v3509_v41  ;;  %v5203_v41 = vld [vmem:[#allocation9 + $0x18c] sm:$0xf0]  ;;  %v4149_v44 = vor.u32 %v5271_v39, %v4148_v38  ;;  %v4004_v46 = vld [vmem:[#allocation9 + $0x280] sm:$0xf] }
  0x53   :  { %614 = vmatpush.bf16.msrb.mxu3 %v3513_v45  ;;  %v5167_v45 = vld [vmem:[#allocation9 + $0x6c] sm:$0xf0]  ;;  %v3877_v48 = vor.u32 %v5203_v41, %v3876_v40  ;;  %v4132_v50 = vld [vmem:[#allocation9 + $0x380] sm:$0xf] }
  0x54   :  { %v5235_v47 = vld [vmem:[#allocation9 + $0x28c] sm:$0xf0]  ;;  %v3716_v57 = vld [vmem:[#allocation9 + $0x40] sm:$0xf] }
  0x55   :  { %576 = vmatpush.bf16.msrb.mxu0 %v3469_v52  ;;  %589 = vmatpush.bf16.msrb.mxu1 %v3473_v54  ;;  %v5267_v51 = vld [vmem:[#allocation9 + $0x38c] sm:$0xf0]  ;;  %v3860_v52 = vld [vmem:[#allocation9 + $0x160] sm:$0xf]  ;;  %v4005_v54 = vor.u32 %v5235_v47, %v4004_v46 }
  0x56   :  { %602 = vmatpush.bf16.msrb.mxu2 %v3477_v55  ;;  %v5199_v53 = vld [vmem:[#allocation9 + $0x16c] sm:$0xf0]  ;;  %v3733_v55 = vor.u32 %v5167_v45, %v3732_v43  ;;  %v4133_v56 = vor.u32 %v5267_v51, %v4132_v50  ;;  %v3988_v58 = vld [vmem:[#allocation9 + $0x260] sm:$0xf] }
  0x57   :  { %615 = vmatpush.bf16.msrb.mxu3 %v3481_v59  ;;  %v5231_v59 = vld [vmem:[#allocation9 + $0x26c] sm:$0xf0]  ;;  %v3861_v60 = vor.u32 %v5199_v53, %v3860_v52  ;;  %v4116_v62 = vld [vmem:[#allocation9 + $0x360] sm:$0xf] }
  0x58   :  { %v5163_v61 = vld [vmem:[#allocation9 + $0x4c] sm:$0xf0]  ;;  %v3844_v0 = vld [vmem:[#allocation9 + $0x140] sm:$0xf] }
  0x59   :  { %577 = vmatpush.bf16.msrb.mxu0 %v3437_v2  ;;  %590 = vmatpush.bf16.msrb.mxu1 %v3441_v5  ;;  %v5263_v63 = vld [vmem:[#allocation9 + $0x36c] sm:$0xf0]  ;;  %v3989_v2 = vor.u32 %v5231_v59, %v3988_v58  ;;  %v3717_v3 = vor.u32 %v5163_v61, %v3716_v57  ;;  %v3700_v5 = vld [vmem:[#allocation9 + $0x20] sm:$0xf] }
  0x5a   :  { %603 = vmatpush.bf16.msrb.mxu2 %v3445_v6  ;;  %v5195_v1 = vld [vmem:[#allocation9 + $0x14c] sm:$0xf0]  ;;  %v4117_v4 = vor.u32 %v5263_v63, %v4116_v62  ;;  %v3972_v6 = vld [vmem:[#allocation9 + $0x240] sm:$0xf] }
  0x5b   :  { %616 = vmatpush.bf16.msrb.mxu3 %v3449_v7  ;;  %v5227_v7 = vld [vmem:[#allocation9 + $0x24c] sm:$0xf0]  ;;  %v4100_v10 = vld [vmem:[#allocation9 + $0x340] sm:$0xf] }
  0x5c   :  { %578 = vmatmul.bf16.vlgmr.msrb.gmra.mxu0 %v5699_v49  ;;  %591 = vmatmul.bf16.vlgmr.msrb.gmra.mxu1 %v5699_v49  ;;  %v5159_v9 = vld [vmem:[#allocation9 + $0x2c] sm:$0xf0]  ;;  %v3973_v14 = vor.u32 %v5227_v7, %v3972_v6  ;;  %v3684_v15 = vld [vmem:[#allocation9] sm:$0xf] }
  0x5d   :  { %2344 = vmatpush.bf16.msra.mxu0 %v3797_v8  ;;  %2357 = vmatpush.bf16.msra.mxu1 %v3925_v12  ;;  %v3845_v8 = vor.u32 %v5195_v1, %v3844_v0  ;;  %v5259_v11 = vld [vmem:[#allocation9 + $0x34c] sm:$0xf0]  ;;  %v3828_v12 = vld [vmem:[#allocation9 + $0x120] sm:$0xf]  ;;  %v3701_v16 = vor.u32 %v5159_v9, %v3700_v5 }
  0x5e   :  { %604 = vmatmul.bf16.vlgmr.msrb.gmra.mxu2 %v5699_v49  ;;  %617 = vmatmul.bf16.vlgmr.msrb.gmra.mxu3 %v5699_v49  ;;  %v3749_v49 = vor.u32 %v5171_v37, %v3748_v33  ;;  %v5191_v13 = vld [vmem:[#allocation9 + $0x12c] sm:$0xf0]  ;;  %v4101_v17 = vor.u32 %v5259_v11, %v4100_v10  ;;  %v3812_v22 = vld [vmem:[#allocation9 + $0x100] sm:$0xf] }
  0x5f   :  { %2370 = vmatpush.bf16.msra.mxu2 %v4053_v18  ;;  %2383 = vmatpush.bf16.msra.mxu3 %v4181_v20  ;;  %v5155_v18 = vld [vmem:[#allocation9 + $0xc] sm:$0xf0]  ;;  %v3829_v21 = vor.u32 %v5191_v13, %v3828_v12  ;;  %v4084_v23 = vld [vmem:[#allocation9 + $0x320] sm:$0xf] }
  0x60   :  { %v5223_v20 = vld [vmem:[#allocation9 + $0x22c] sm:$0xf0]  ;;  %v4308_v26 = vld [vmem:[#allocation9 + $0x4e0] sm:$0xf] }
  0x61   :  { %2345 = vmatpush.bf16.msra.mxu0 %v3781_v19  ;;  %2358 = vmatpush.bf16.msra.mxu1 %v3909_v24  ;;  %v3956_v19 = vld [vmem:[#allocation9 + $0x220] sm:$0xf]  ;;  %v5255_v24 = vld [vmem:[#allocation9 + $0x32c] sm:$0xf0] }
  0x62   :  { %v5187_v25 = vld [vmem:[#allocation9 + $0x10c] sm:$0xf0]  ;;  %v4436_v28 = vld [vmem:[#allocation9 + $0x5e0] sm:$0xf] }
  0x63   :  { %2371 = vmatpush.bf16.msra.mxu2 %v4037_v30  ;;  %2384 = vmatpush.bf16.msra.mxu3 %v4165_v32  ;;  %v5311_v27 = vld [vmem:[#allocation9 + $0x4ec] sm:$0xf0]  ;;  %v3957_v30 = vor.u32 %v5223_v20, %v3956_v19  ;;  %v4085_v32 = vor.u32 %v5255_v24, %v4084_v23  ;;  %v4292_v33 = vld [vmem:[#allocation9 + $0x4c0] sm:$0xf]  ;;  %v3813_v37 = vor.u32 %v5187_v25, %v3812_v22 }
  0x64   :  { %v5343_v29 = vld [vmem:[#allocation9 + $0x5ec] sm:$0xf0]  ;;  %v3940_v34 = vld [vmem:[#allocation9 + $0x200] sm:$0xf]  ;;  %v4309_v38 = vor.u32 %v5311_v27, %v4308_v26  ;;  %v646_v26 = vlaneseq }
  0x65   :  { %2346 = vmatpush.bf16.msra.mxu0 %v3765_v31  ;;  %2359 = vmatpush.bf16.msra.mxu1 %v3893_v36  ;;  %v3685_v31 = vor.u32 %v5155_v18, %v3684_v15  ;;  %v5219_v35 = vld [vmem:[#allocation9 + $0x20c] sm:$0xf0]  ;;  %v4068_v36 = vld [vmem:[#allocation9 + $0x300] sm:$0xf] }
  0x66   :  { %v5251_v39 = vld [vmem:[#allocation9 + $0x30c] sm:$0xf0]  ;;  %v4564_v40 = vld [vmem:[#allocation9 + $0x6e0] sm:$0xf]  ;;  %v3941_v47 = vor.u32 %v5219_v35, %v3940_v34  ;;  %v5709_v27 = vshrl.u32 %v646_v26, 7 }
  0x67   :  { %2372 = vmatpush.bf16.msra.mxu2 %v4021_v42  ;;  %2385 = vmatpush.bf16.msra.mxu3 %v4149_v44  ;;  %v5375_v41 = vld [vmem:[#allocation9 + $0x6ec] sm:$0xf0]  ;;  %v4437_v42 = vor.u32 %v5343_v29, %v4436_v28  ;;  %v4420_v45 = vld [vmem:[#allocation9 + $0x5c0] sm:$0xf]  ;;  %v5711_v28 = vand.u32 127, %v646_v26 }
  0x68   :  { %v5307_v43 = vld [vmem:[#allocation9 + $0x4cc] sm:$0xf0]  ;;  %v4565_v50 = vor.u32 %v5375_v41, %v4564_v40  ;;  %v4276_v53 = vld [vmem:[#allocation9 + $0x4a0] sm:$0xf]  ;;  %v5717_v29 = vmul.u32 1024, %v5709_v27 }
  0x69   :  { %2347 = vmatpush.bf16.msra.mxu0 %v3749_v49  ;;  %2360 = vmatpush.bf16.msra.mxu1 %v3877_v48  ;;  %v4692_v49 = vld [vmem:[#allocation9 + $0x7e0] sm:$0xf]  ;;  %v5407_v44 = vld [vmem:[#allocation9 + $0x7ec] sm:$0xf0]  ;;  %v4069_v48 = vor.u32 %v5251_v39, %v4068_v36  ;;  %v4293_v51 = vor.u32 %v5307_v43, %v4292_v33  ;;  %v5730_v35 = vadd.s32 256, %v5711_v28 }
  0x6a   :  { %v5339_v46 = vld [vmem:[#allocation9 + $0x5cc] sm:$0xf0]  ;;  %v4693_v52 = vor.u32 %v5407_v44, %v4692_v49  ;;  %v4676_v58 = vld [vmem:[#allocation9 + $0x7c0] sm:$0xf] }
  0x6b   :  { %2373 = vmatpush.bf16.msra.mxu2 %v4005_v54  ;;  %2386 = vmatpush.bf16.msra.mxu3 %v4133_v56  ;;  %v4548_v54 = vld [vmem:[#allocation9 + $0x6c0] sm:$0xf]  ;;  %v4421_v56 = vor.u32 %v5339_v46, %v4420_v45  ;;  %v5303_v57 = vld [vmem:[#allocation9 + $0x4ac] sm:$0xf0]  ;;  %v662_v39 = vadd.s32 %v5717_v29, %v5730_v35 }
  0x6c   :  { %v5403_v59 = vld [vmem:[#allocation9 + $0x7cc] sm:$0xf0]  ;;  %v4277_v63 = vor.u32 %v5303_v57, %v4276_v53  ;;  %v4260_v1 = vld [vmem:[#allocation9 + $0x480] sm:$0xf] }
  0x6d   :  { %2348 = vmatpush.bf16.msra.mxu0 %v3733_v55  ;;  %2361 = vmatpush.bf16.msra.mxu1 %v3861_v60  ;;  %v5371_v55 = vld [vmem:[#allocation9 + $0x6cc] sm:$0xf0]  ;;  %v4404_v60 = vld [vmem:[#allocation9 + $0x5a0] sm:$0xf]  ;;  %v4677_v0 = vor.u32 %v5403_v59, %v4676_v58 }
  0x6e   :  { %v5335_v61 = vld [vmem:[#allocation9 + $0x5ac] sm:$0xf0]  ;;  %v4549_v62 = vor.u32 %v5371_v55, %v4548_v54  ;;  %v4660_v6 = vld [vmem:[#allocation9 + $0x7a0] sm:$0xf] }
  0x6f   :  { %2374 = vmatpush.bf16.msra.mxu2 %v3989_v2  ;;  %2387 = vmatpush.bf16.msra.mxu3 %v4117_v4  ;;  %v4532_v2 = vld [vmem:[#allocation9 + $0x6a0] sm:$0xf]  ;;  %v4405_v4 = vor.u32 %v5335_v61, %v4404_v60  ;;  %v5299_v5 = vld [vmem:[#allocation9 + $0x48c] sm:$0xf0] }
  0x70   :  { %v5399_v7 = vld [vmem:[#allocation9 + $0x7ac] sm:$0xf0]  ;;  %v4261_v11 = vor.u32 %v5299_v5, %v4260_v1  ;;  %v4244_v13 = vld [vmem:[#allocation9 + $0x460] sm:$0xf] }
  0x71   :  { %2349 = vmatpush.bf16.msra.mxu0 %v3717_v3  ;;  %2362 = vmatpush.bf16.msra.mxu1 %v3845_v8  ;;  %v5367_v3 = vld [vmem:[#allocation9 + $0x6ac] sm:$0xf0]  ;;  %v4388_v8 = vld [vmem:[#allocation9 + $0x580] sm:$0xf]  ;;  %v4661_v12 = vor.u32 %v5399_v7, %v4660_v6 }
  0x72   :  { %v5331_v9 = vld [vmem:[#allocation9 + $0x58c] sm:$0xf0]  ;;  %v4533_v10 = vor.u32 %v5367_v3, %v4532_v2  ;;  %v4644_v18 = vld [vmem:[#allocation9 + $0x780] sm:$0xf] }
  0x73   :  { %2375 = vmatpush.bf16.msra.mxu2 %v3973_v14  ;;  %2388 = vmatpush.bf16.msra.mxu3 %v4101_v17  ;;  %v4516_v14 = vld [vmem:[#allocation9 + $0x680] sm:$0xf]  ;;  %v5363_v15 = vld [vmem:[#allocation9 + $0x68c] sm:$0xf0] }
  0x74   :  { %v5295_v17 = vld [vmem:[#allocation9 + $0x46c] sm:$0xf0]  ;;  %v4372_v20 = vld [vmem:[#allocation9 + $0x560] sm:$0xf]  ;;  %v4517_v22 = vor.u32 %v5363_v15, %v4516_v14 }
  0x75   :  { %2350 = vmatpush.bf16.msra.mxu0 %v3701_v16  ;;  %2363 = vmatpush.bf16.msra.mxu1 %v3829_v21  ;;  %v4389_v16 = vor.u32 %v5331_v9, %v4388_v8  ;;  %v5395_v19 = vld [vmem:[#allocation9 + $0x78c] sm:$0xf0]  ;;  %v4245_v23 = vor.u32 %v5295_v17, %v4244_v13  ;;  %v4228_v45 = vld [vmem:[#allocation9 + $0x440] sm:$0xf] }
  0x76   :  { %v5327_v21 = vld [vmem:[#allocation9 + $0x56c] sm:$0xf0]  ;;  %v4645_v24 = vor.u32 %v5395_v19, %v4644_v18  ;;  %v4500_v54 = vld [vmem:[#allocation9 + $0x660] sm:$0xf] }
  0x77   :  { %2376 = vmatpush.bf16.msra.mxu2 %v3957_v30  ;;  %2389 = vmatpush.bf16.msra.mxu3 %v4085_v32  ;;  %v4373_v25 = vor.u32 %v5327_v21, %v4372_v20  ;;  %v5720_v30 = vadd.s32 128, %v5711_v28  ;;  %v5724_v32 = vstv %s668_s22  ;;  %v5291_v46 = vld [vmem:[#allocation9 + $0x44c] sm:$0xf0]  ;;  %v4484_v6 = vld [vmem:[#allocation9 + $0x640] sm:$0xf] }
  0x78   :  { %v672_v43 = vxor.u32 %v5724_v32, %v662_v39  ;;  %v5359_v55 = vld [vmem:[#allocation9 + $0x66c] sm:$0xf0]  ;;  %v4612_v8 = vld [vmem:[#allocation9 + $0x740] sm:$0xf] }
  0x79   :  { %2351 = vmatpush.bf16.msra.mxu0 %v3685_v31  ;;  %2364 = vmatpush.bf16.msra.mxu1 %v3813_v37  ;;  %v660_v31 = vadd.s32 %v5717_v29, %v5711_v28  ;;  %v661_v33 = vadd.s32 %v5717_v29, %v5720_v30  ;;  %v5734_v37 = vadd.s32 384, %v5711_v28  ;;  %v4501_v57 = vor.u32 %v5359_v55, %v4500_v54  ;;  %v5391_v58 = vld [vmem:[#allocation9 + $0x76c] sm:$0xf0]  ;;  %v4196_v14 = vld [vmem:[#allocation9 + $0x400] sm:$0xf] }
  0x7a   :  { %v5319_v2 = vld [vmem:[#allocation9 + $0x52c] sm:$0xf0]  ;;  %v4452_v39 = vld [vmem:[#allocation9 + $0x600] sm:$0xf] }
  0x7b   :  { %2377 = vmatpush.bf16.msra.mxu2 %v3941_v47  ;;  %2390 = vmatpush.bf16.msra.mxu3 %v4069_v48  ;;  %v670_v34 = vxor.u32 %v5724_v32, %v660_v31  ;;  %v671_v36 = vxor.u32 %v5724_v32, %v661_v33  ;;  %v663_v41 = vadd.s32 %v5717_v29, %v5734_v37  ;;  %v4356_v47 = vld [vmem:[#allocation9 + $0x540] sm:$0xf]  ;;  %v5355_v7 = vld [vmem:[#allocation9 + $0x64c] sm:$0xf0] }
  0x7c   :  { %v4229_v48 = vor.u32 %v5291_v46, %v4228_v45  ;;  %v4485_v9 = vor.u32 %v5355_v7, %v4484_v6  ;;  %v5283_v15 = vld [vmem:[#allocation9 + $0x40c] sm:$0xf0]  ;;  %v655_v45 = vadd.s32 512, %v5711_v28 }
  0x7d   :  { %2396 = vmatpush.bf16.msrb.mxu0 %v4309_v38  ;;  %2409 = vmatpush.bf16.msrb.mxu1 %v4437_v42  ;;  %v678_v38 = vxor.u32 2246822507, %v670_v34  ;;  %v679_v40 = vxor.u32 2246822507, %v671_v36  ;;  %v673_v44 = vxor.u32 %v5724_v32, %v663_v41  ;;  %v4197_v17 = vor.u32 %v5283_v15, %v4196_v14  ;;  %v5315_v18 = vld [vmem:[#allocation9 + $0x50c] sm:$0xf0] }
  0x7e   :  { %v5383_v33 = vld [vmem:[#allocation9 + $0x72c] sm:$0xf0]  ;;  %v4580_v41 = vld [vmem:[#allocation9 + $0x700] sm:$0xf] }
  0x7f   :  { %2422 = vmatpush.bf16.msrb.mxu2 %v4565_v50  ;;  %2435 = vmatpush.bf16.msrb.mxu3 %v4693_v52  ;;  %v686_v42 = vshrl.u32 %v678_v38, 16  ;;  %v687_v49 = vshrl.u32 %v679_v40, 16  ;;  %v5323_v50 = vld [vmem:[#allocation9 + $0x54c] sm:$0xf0]  ;;  %v680_v52 = vxor.u32 2246822507, %v672_v43 }
  0x80   :  { %v4357_v53 = vor.u32 %v5323_v50, %v4356_v47  ;;  %v681_v60 = vxor.u32 2246822507, %v673_v44 }
  0x81   :  { %2397 = vmatpush.bf16.msrb.mxu0 %v4293_v51  ;;  %2410 = vmatpush.bf16.msrb.mxu1 %v4421_v56  ;;  %v694_v51 = vxor.u32 %v686_v42, %v678_v38  ;;  %v4628_v56 = vld [vmem:[#allocation9 + $0x760] sm:$0xf]  ;;  %v695_v59 = vxor.u32 %v687_v49, %v679_v40  ;;  %v5347_v40 = vld [vmem:[#allocation9 + $0x60c] sm:$0xf0] }
  0x82   :  { %v4629_v61 = vor.u32 %v5391_v58, %v4628_v56  ;;  %v4453_v43 = vor.u32 %v5347_v40, %v4452_v39  ;;  %v5379_v49 = vld [vmem:[#allocation9 + $0x70c] sm:$0xf0]  ;;  %v3782_v39 = vld [vmem:[#allocation9 + $0xd0] sm:$0xf0]  ;;  %v657_v40 = vadd.s32 768, %v5711_v28 }
  0x83   :  { %2423 = vmatpush.bf16.msrb.mxu2 %v4549_v62  ;;  %2436 = vmatpush.bf16.msrb.mxu3 %v4677_v0  ;;  %v4212_v62 = vld [vmem:[#allocation9 + $0x420] sm:$0xf]  ;;  %v702_v3 = vmul.u32 2146121005, %v694_v51  ;;  %v4581_v46 = vor.u32 %v5379_v49, %v4580_v41  ;;  %v658_v49 = vadd.s32 896, %v5711_v28 }
  0x84   :  { %v4340_v0 = vld [vmem:[#allocation9 + $0x520] sm:$0xf] }
  0x85   :  { %2398 = vmatpush.bf16.msrb.mxu0 %v4277_v63  ;;  %2411 = vmatpush.bf16.msrb.mxu1 %v4405_v4  ;;  %v5287_v63 = vld [vmem:[#allocation9 + $0x42c] sm:$0xf0]  ;;  %v688_v4 = vshrl.u32 %v680_v52, 16  ;;  %v4341_v5 = vor.u32 %v5319_v2, %v4340_v0  ;;  %v710_v20 = vshrl.u32 %v702_v3, 15 }
  0x86   :  { %v4213_v1 = vor.u32 %v5287_v63, %v4212_v62 }
  0x87   :  { %2424 = vmatpush.bf16.msrb.mxu2 %v4533_v10  ;;  %2437 = vmatpush.bf16.msrb.mxu3 %v4661_v12  ;;  %v5387_v10 = vld [vmem:[#allocation9 + $0x74c] sm:$0xf0]  ;;  %v689_v12 = vshrl.u32 %v681_v60, 16  ;;  %v696_v21 = vxor.u32 %v688_v4, %v680_v52  ;;  %v718_v34 = vxor.u32 %v710_v20, %v702_v3 }
  0x88   :  { %v4613_v13 = vor.u32 %v5387_v10, %v4612_v8 }
  0x89   :  { %2399 = vmatpush.bf16.msrb.mxu0 %v4261_v11  ;;  %2412 = vmatpush.bf16.msrb.mxu1 %v4389_v16  ;;  %v703_v11 = vmul.u32 2146121005, %v695_v59  ;;  %v4324_v16 = vld [vmem:[#allocation9 + $0x500] sm:$0xf]  ;;  %v697_v26 = vxor.u32 %v689_v12, %v681_v60  ;;  %v704_v38 = vmul.u32 2146121005, %v696_v21 }
  0x8a   :  { %v4325_v19 = vor.u32 %v5315_v18, %v4324_v16  ;;  %v726_v47 = vmul.u32 2221713035, %v718_v34  ;;  %v5181_v18 = vld [vmem:[#allocation9 + $0xe4] sm:$0xf] }
  0x8b   :  { %2425 = vmatpush.bf16.msrb.mxu2 %v4517_v22  ;;  %2438 = vmatpush.bf16.msrb.mxu3 %v4645_v24  ;;  %v4468_v22 = vld [vmem:[#allocation9 + $0x620] sm:$0xf]  ;;  %v5351_v24 = vld [vmem:[#allocation9 + $0x62c] sm:$0xf0]  ;;  %v705_v44 = vmul.u32 2146121005, %v697_v26 }
  0x8c   :  { %v4469_v31 = vor.u32 %v5351_v24, %v4468_v22  ;;  %v712_v50 = vshrl.u32 %v704_v38, 15  ;;  %v734_v54 = vshrl.u32 %v726_v47, 16  ;;  %v5213_v22 = vld [vmem:[#allocation9 + $0x1e4] sm:$0xf] }
  0x8d   :  { %2400 = vmatpush.bf16.msrb.mxu0 %v4245_v23  ;;  %2413 = vmatpush.bf16.msrb.mxu1 %v4373_v25  ;;  %v711_v23 = vshrl.u32 %v703_v11, 15  ;;  %v4596_v25 = vld [vmem:[#allocation9 + $0x720] sm:$0xf]  ;;  %v713_v52 = vshrl.u32 %v705_v44, 15 }
  0x8e   :  { %v4597_v36 = vor.u32 %v5383_v33, %v4596_v25  ;;  %v720_v56 = vxor.u32 %v712_v50, %v704_v38  ;;  %v742_v62 = vxor.u32 %v734_v54, %v726_v47  ;;  %v5766_v38 = vld [vmem:[#allocation9 + $0xc4] sm:$0xf] }
  0x8f   :  { %2426 = vmatpush.bf16.msrb.mxu2 %v4501_v57  ;;  %2439 = vmatpush.bf16.msrb.mxu3 %v4629_v61  ;;  %v719_v42 = vxor.u32 %v711_v23, %v703_v11  ;;  %v721_v59 = vxor.u32 %v713_v52, %v705_v44  ;;  %v5748_v61 = vld [vmem:[#allocation8] sm:$0xff]  ;;  %v3926_v23 = vld [vmem:[#allocation9 + $0x1f0] sm:$0xf0] }
  0x90   :  { %v728_v0 = vmul.u32 2221713035, %v720_v56  ;;  %v182_v4 = vperm.slane %v5748_v61, 0  ;;  %v3674_v6 = vxor.u32 2147483648, %v742_v62  ;;  %v184_v15 = vperm.slane %v5748_v61, 2 }
  0x91   :  { %2401 = vmatpush.bf16.msrb.mxu0 %v4229_v48  ;;  %2414 = vmatpush.bf16.msrb.mxu1 %v4357_v53  ;;  %v664_v48 = vadd.s32 %v5717_v29, %v655_v45  ;;  %v727_v51 = vmul.u32 2221713035, %v719_v42  ;;  %v656_v53 = vadd.s32 640, %v5711_v28  ;;  %v729_v3 = vmul.u32 2221713035, %v721_v59 }
  0x92   :  { %v736_v8 = vshrl.u32 %v728_v0, 16  ;;  %vm5753_vm0 = vcmp.ge.s32.totalorder %v3674_v6, 3435973836  ;;  %v3929_v56 = vor.u32 %v5213_v22, %v3926_v23  ;;  %v4182_v6 = vld [vmem:[#allocation9 + $0x3f0] sm:$0xf0] }
  0x93   :  { %2427 = vmatpush.bf16.msrb.mxu2 %v4485_v9  ;;  %2440 = vmatpush.bf16.msrb.mxu3 %v4613_v13  ;;  %v674_v55 = vxor.u32 %v5724_v32, %v664_v48  ;;  %v665_v57 = vadd.s32 %v5717_v29, %v656_v53  ;;  %v735_v58 = vshrl.u32 %v727_v51, 16  ;;  %v737_v12 = vshrl.u32 %v729_v3, 16  ;;  %vm5774_vm4 = vmpackc.low %vm5753_vm0, %vm5753_vm0 }
  0x94   :  { %v744_v24 = vxor.u32 %v736_v8, %v728_v0  ;;  %v3910_v0 = vld [vmem:[#allocation9 + $0x1d0] sm:$0xf0] }
  0x95   :  { %2402 = vmatpush.bf16.msrb.mxu0 %v4213_v1  ;;  %2415 = vmatpush.bf16.msrb.mxu1 %v4341_v5  ;;  %v675_v60 = vxor.u32 %v5724_v32, %v665_v57  ;;  %v682_v63 = vxor.u32 2246822507, %v674_v55  ;;  %v743_v2 = vxor.u32 %v735_v58, %v727_v51  ;;  %v183_v5 = vperm.slane %v5748_v61, 1  ;;  %v5209_v57 = vld [vmem:[#allocation9 + $0x1c4] sm:$0xf] }
  0x96   :  { %v745_v33 = vxor.u32 %v737_v12, %v729_v3  ;;  %v3676_v48 = vxor.u32 2147483648, %v744_v24  ;;  %v666_v3 = vadd.s32 %v5717_v29, %v657_v40  ;;  %v4038_v24 = vld [vmem:[#allocation9 + $0x2d0] sm:$0xf0] }
  0x97   :  { %2428 = vmatpush.bf16.msrb.mxu2 %v4469_v31  ;;  %2441 = vmatpush.bf16.msrb.mxu3 %v4597_v36  ;;  %v683_v1 = vxor.u32 2246822507, %v675_v60  ;;  %v690_v7 = vshrl.u32 %v682_v63, 16  ;;  %v3675_v11 = vxor.u32 2147483648, %v743_v2  ;;  %v185_v36 = vperm.slane %v5748_v61, 3 }
  0x98   :  { %v3677_v58 = vxor.u32 2147483648, %v745_v33  ;;  %v4054_v2 = vld [vmem:[#allocation9 + $0x2f0] sm:$0xf0]  ;;  %vm758_vm8 = vcmp.ge.s32.totalorder %v3676_v48, 3435973836 }
  0x99   :  { %2403 = vmatpush.bf16.msrb.mxu0 %v4197_v17  ;;  %2416 = vmatpush.bf16.msrb.mxu1 %v4325_v19  ;;  %v691_v9 = vshrl.u32 %v683_v1, 16  ;;  %v3798_v19 = vld [vmem:[#allocation9 + $0xf0] sm:$0xf0]  ;;  %v5757_v20 = vxor.u32 %v690_v7, %v682_v63  ;;  %vm5761_vm3 = vcmp.ge.s32.totalorder %v3675_v11, 3435973836  ;;  %v3785_v63 = vor.u32 %v5766_v38, %v3782_v39  ;;  %vm5804_vm10 = vmpackc.low %vm758_vm8, %vm758_vm8 }
  0x9a   :  { %v3801_v47 = vor.u32 %v5181_v18, %v3798_v19  ;;  %vm5784_vm5 = vmpackc.low %vm5761_vm3, %vm5761_vm3  ;;  %v5173_v7 = vld [vmem:[#allocation9 + $0xa4] sm:$0xf]  ;;  %vm5799_vm9 = vcmp.ge.s32.totalorder %v3677_v58, 3435973836  ;;  %v3894_v18 = vld [vmem:[#allocation9 + $0x1b0] sm:$0xf0] }
  0x9b   :  { %2429 = vmatpush.bf16.msrb.mxu2 %v4453_v43  ;;  %2442 = vmatpush.bf16.msrb.mxu3 %v4581_v46  ;;  %v5759_v25 = vxor.u32 %v691_v9, %v683_v1  ;;  %v706_v43 = vmul.u32 2146121005, %v5757_v20  ;;  %v5245_v1 = vld [vmem:[#allocation9 + $0x2e4] sm:$0xf]  ;;  %v667_v9 = vadd.s32 %v5717_v29, %v658_v49  ;;  %v676_v20 = vxor.u32 %v5724_v32, %v666_v3  ;;  %vm5816_vm11 = vmpackc.low %vm5799_vm9, %vm5799_vm9  ;;  %v4166_v40 = vld [vmem:[#allocation9 + $0x3d0] sm:$0xf0] }
  0x9c   :  { %v5241_v19 = vld [vmem:[#allocation9 + $0x2c4] sm:$0xf]  ;;  %v4057_v23 = vor.u32 %v5245_v1, %v4054_v2  ;;  %v3878_v48 = vld [vmem:[#allocation9 + $0x190] sm:$0xf0] }
  0x9d   :  { %v707_v50 = vmul.u32 2146121005, %v5759_v25  ;;  %v714_v8 = vshrl.u32 %v706_v43, 15  ;;  %v5273_v25 = vld [vmem:[#allocation9 + $0x3c4] sm:$0xf]  ;;  %v677_v31 = vxor.u32 %v5724_v32, %v667_v9 }
  0x9e   :  { %v5165_v58 = vld [vmem:[#allocation9 + $0x64] sm:$0xf]  ;;  %v4006_v9 = vld [vmem:[#allocation9 + $0x290] sm:$0xf0] }
  0x9f   :  { %v715_v11 = vshrl.u32 %v707_v50, 15  ;;  %v5197_v2 = vld [vmem:[#allocation9 + $0x164] sm:$0xf] }
  0xb9   :  { %v527_v10 = vpop.f32.mrf.mxu0  ;;  %v540_v14 = vpop.f32.mrf.mxu1 }
  0xba   :  { %v528_v13 = vadd.f32 %v527_v10, %v182_v4  ;;  %v541_v16 = vadd.f32 %v540_v14, %v183_v5  ;;  %v5277_v5 = vld [vmem:[#allocation9 + $0x3e4] sm:$0xf] }
  0xbb   :  { %v4185_v38 = vor.u32 %v5277_v5, %v4182_v6  ;;  %v3862_v6 = vld [vmem:[#allocation9 + $0x170] sm:$0xf0]  ;;  %v5161_v14 = vld [vmem:[#allocation9 + $0x44] sm:$0xf] }
  0xbc   :  { %vm622_vm1 = vcmp.ge.f32.partialorder %v528_v13, 0.0  ;;  %v630_v21 = vmul.f32 0.2, %v528_v13  ;;  %vm623_vm2 = vcmp.ge.f32.partialorder %v541_v16, 0.0  ;;  %v631_v26 = vmul.f32 0.2, %v541_v16 }
  0xbe   :  { %v638_v34 = vsel %vm622_vm1, %v528_v13, %v630_v21  ;;  %v639_v42 = vsel %vm623_vm2, %v541_v16, %v631_v26  ;;  %v3913_v13 = vor.u32 %v5209_v57, %v3910_v0  ;;  %v5205_v16 = vld [vmem:[#allocation9 + $0x1a4] sm:$0xf]  ;;  %v5808_v26 = vxor.u32 %v714_v8, %v706_v43  ;;  %v4150_v57 = vld [vmem:[#allocation9 + $0x3b0] sm:$0xf0] }
  0xbf   :  { %v774_v41 = vmul.f32 1.4285715, %v638_v34  ;;  %v775_v44 = vmul.f32 1.4285715, %v639_v42  ;;  %v5820_v42 = vxor.u32 %v715_v11, %v707_v50  ;;  %v4041_v50 = vor.u32 %v5241_v19, %v4038_v24  ;;  %v4134_v11 = vld [vmem:[#allocation9 + $0x390] sm:$0xf0] }
  0xc0   :  { %v4169_v0 = vor.u32 %v5273_v25, %v4166_v40  ;;  %v5193_v19 = vld [vmem:[#allocation9 + $0x144] sm:$0xf]  ;;  %v3846_v24 = vld [vmem:[#allocation9 + $0x150] sm:$0xf0] }
  0xc1   :  { %v5779_v51 = vpack.c.bf16 %v774_v41, %v774_v41  ;;  %v566_v53 = vpop.f32.mrf.mxu3  ;;  %v529_v54 = vpop.f32.mrf.mxu0  ;;  %v5788_v59 = vpack.c.bf16 %v775_v44, %v775_v44  ;;  %v5169_v41 = vld [vmem:[#allocation9 + $0x84] sm:$0xf]  ;;  %v3897_v44 = vor.u32 %v5205_v16, %v3894_v18  ;;  %v731_v3 = vmul.u32 2221713035, %v5820_v42 }
  0xc2   :  { %v553_v45 = vpop.f32.mrf.mxu2  ;;  %v567_v60 = vadd.f32 %v566_v53, %v185_v36  ;;  %v542_v62 = vpop.f32.mrf.mxu1  ;;  %v4022_v53 = vld [vmem:[#allocation9 + $0x2b0] sm:$0xf0]  ;;  %v684_v54 = vxor.u32 2246822507, %v676_v20  ;;  %v5832_v25 = vld [vmem:[#allocation9 + $0x264] sm:$0xf] }
  0xc3   :  { %v554_v52 = vadd.f32 %v553_v45, %v184_v15  ;;  %4708 = vmatmul.msk.bf16.vlgmr.msra.gmra.mxu0 %vm5774_vm4, %v5779_v51  ;;  %4711 = vmatmul.msk.bf16.vlgmr.msra.gmra.mxu1 %vm5784_vm5, %v5788_v59  ;;  %v3766_v15 = vld [vmem:[#allocation9 + $0xb0] sm:$0xf0]  ;;  %v730_v62 = vmul.u32 2221713035, %v5808_v26  ;;  %v739_v20 = vshrl.u32 %v731_v3, 16  ;;  %v187_v42 = vperm.slane %v5748_v61, 5 }
  0xc4   :  { %vm625_vm7 = vcmp.ge.f32.partialorder %v567_v60, 0.0  ;;  %v633_v10 = vmul.f32 0.2, %v567_v60  ;;  %2448 = vmatpush.bf16.msra.mxu0 %v3801_v47  ;;  %2461 = vmatpush.bf16.msra.mxu1 %v3929_v56  ;;  %v3769_v39 = vor.u32 %v5173_v7, %v3766_v15  ;;  %v3750_v45 = vld [vmem:[#allocation9 + $0x90] sm:$0xf0] }
  0xc5   :  { %vm624_vm6 = vcmp.ge.f32.partialorder %v554_v52, 0.0  ;;  %v632_v4 = vmul.f32 0.2, %v554_v52  ;;  %v5201_v47 = vld [vmem:[#allocation9 + $0x184] sm:$0xf]  ;;  %v3753_v1 = vor.u32 %v5169_v41, %v3750_v45  ;;  %v738_v16 = vshrl.u32 %v730_v62, 16 }
  0xc6   :  { %v641_v29 = vsel %vm625_vm7, %v567_v60, %v633_v10  ;;  %v5269_v56 = vld [vmem:[#allocation9 + $0x3a4] sm:$0xf]  ;;  %v3734_v60 = vld [vmem:[#allocation9 + $0x70] sm:$0xf0]  ;;  %v3881_v5 = vor.u32 %v5201_v47, %v3878_v48 }
  0xc7   :  { %v640_v12 = vsel %vm624_vm6, %v554_v52, %v632_v4  ;;  %v777_v21 = vmul.f32 1.4285715, %v641_v29  ;;  %v5237_v52 = vld [vmem:[#allocation9 + $0x2a4] sm:$0xf]  ;;  %v692_v4 = vshrl.u32 %v684_v54, 16  ;;  %v4153_v29 = vor.u32 %v5269_v56, %v4150_v57 }
  0xc8   :  { %v776_v17 = vmul.f32 1.4285715, %v640_v12  ;;  %2449 = vmatpush.bf16.msra.mxu0 %v3785_v63  ;;  %2462 = vmatpush.bf16.msra.mxu1 %v3913_v13  ;;  %v685_v63 = vxor.u32 2246822507, %v677_v31  ;;  %v5233_v7 = vld [vmem:[#allocation9 + $0x284] sm:$0xf]  ;;  %v4025_v13 = vor.u32 %v5237_v52, %v4022_v53  ;;  %v3737_v18 = vor.u32 %v5165_v58, %v3734_v60 }
  0xc9   :  { %v5822_v43 = vpack.c.bf16 %v777_v21, %v777_v21  ;;  %v568_v49 = vpop.f32.mrf.mxu3  ;;  %v5265_v10 = vld [vmem:[#allocation9 + $0x384] sm:$0xf]  ;;  %v700_v12 = vxor.u32 %v692_v4, %v684_v54  ;;  %v3718_v15 = vld [vmem:[#allocation9 + $0x50] sm:$0xf0]  ;;  %v4009_v31 = vor.u32 %v5233_v7, %v4006_v9  ;;  %v746_v45 = vxor.u32 %v738_v16, %v730_v62 }
  0xca   :  { %v5811_v33 = vpack.c.bf16 %v776_v17, %v776_v17  ;;  %v555_v34 = vpop.f32.mrf.mxu2  ;;  %v693_v8 = vshrl.u32 %v685_v63, 16  ;;  %v4137_v41 = vor.u32 %v5265_v10, %v4134_v11  ;;  %v5838_v49 = vld [vmem:[#allocation9 + $0x370] sm:$0xf0]  ;;  %v3721_v48 = vor.u32 %v5161_v14, %v3718_v15  ;;  %v5189_v53 = vld [vmem:[#allocation9 + $0x124] sm:$0xf] }
  0xcb   :  { %4717 = vmatmul.msk.bf16.vlgmr.msra.gmra.mxu3 %vm5816_vm11, %v5822_v43  ;;  %v708_v21 = vmul.u32 2146121005, %v700_v12  ;;  %v186_v34 = vperm.slane %v5748_v61, 4  ;;  %v3702_v52 = vld [vmem:[#allocation9 + $0x30] sm:$0xf0]  ;;  %v3849_v57 = vor.u32 %v5193_v19, %v3846_v24  ;;  %v188_v58 = vperm.slane %v5748_v61, 6 }
  0xcc   :  { %4714 = vmatmul.msk.bf16.vlgmr.msra.gmra.mxu2 %vm5804_vm10, %v5811_v33  ;;  %2487 = vmatpush.bf16.msra.mxu3 %v4185_v38  ;;  %v701_v17 = vxor.u32 %v693_v8, %v685_v63  ;;  %v3990_v38 = vld [vmem:[#allocation9 + $0x270] sm:$0xf0]  ;;  %v5843_v60 = vld [vmem:[#allocation9 + $0x244] sm:$0xf]  ;;  %v189_v8 = vperm.slane %v5748_v61, 7  ;;  %v3678_v11 = vxor.u32 2147483648, %v746_v45 }
  0xcd   :  { %2474 = vmatpush.bf16.msra.mxu2 %v4057_v23  ;;  %2450 = vmatpush.bf16.msra.mxu0 %v3769_v39  ;;  %v3865_v23 = vor.u32 %v5197_v2, %v3862_v6  ;;  %v5835_v39 = vld [vmem:[#allocation9 + $0x364] sm:$0xf]  ;;  %v716_v40 = vshrl.u32 %v708_v21, 15  ;;  %v3830_v54 = vld [vmem:[#allocation9 + $0x130] sm:$0xf0]  ;;  %v3993_v62 = vor.u32 %v5832_v25, %v3990_v38 }
  0xce   :  { %2463 = vmatpush.bf16.msra.mxu1 %v3897_v44  ;;  %v709_v26 = vmul.u32 2146121005, %v701_v17  ;;  %v5840_v44 = vld [vmem:[#allocation9 + $0x24] sm:$0xf]  ;;  %v5845_v63 = vld [vmem:[#allocation9 + $0x250] sm:$0xf0]  ;;  %v4121_v2 = vor.u32 %v5835_v39, %v5838_v49 }
  0xcf   :  { %v724_v56 = vxor.u32 %v716_v40, %v708_v21  ;;  %v5850_v4 = vld [vmem:[#allocation9 + $0x344] sm:$0xf]  ;;  %v5857_v10 = vld [vmem:[#allocation9 + $0x10] sm:$0xf0]  ;;  %v3705_v14 = vor.u32 %v5840_v44, %v3702_v52  ;;  %v3833_v21 = vor.u32 %v5189_v53, %v3830_v54  ;;  %vm5878_vm14 = vcmp.ge.s32.totalorder %v3678_v11, 3435973836 }
  0xd0   :  { %2488 = vmatpush.bf16.msra.mxu3 %v4169_v0  ;;  %v717_v47 = vshrl.u32 %v709_v26, 15  ;;  %v5855_v9 = vld [vmem:[#allocation9 + $0x4] sm:$0xf]  ;;  %v5862_v16 = vld [vmem:[#allocation9 + $0x110] sm:$0xf0]  ;;  %vm5905_vm0 = vmpackc.low %vm5878_vm14, %vm5878_vm14 }
  0xd1   :  { %2475 = vmatpush.bf16.msra.mxu2 %v4041_v50  ;;  %2451 = vmatpush.bf16.msra.mxu0 %v3753_v1  ;;  %v747_v50 = vxor.u32 %v739_v20, %v731_v3  ;;  %v732_v3 = vmul.u32 2221713035, %v724_v56  ;;  %v5860_v15 = vld [vmem:[#allocation9 + $0x104] sm:$0xf]  ;;  %v5870_v24 = vld [vmem:[#allocation9 + $0x5f0] sm:$0xf0] }
  0xd2   :  { %2464 = vmatpush.bf16.msra.mxu1 %v3881_v5  ;;  %v725_v0 = vxor.u32 %v717_v47, %v709_v26  ;;  %v5852_v5 = vld [vmem:[#allocation9 + $0x350] sm:$0xf0]  ;;  %v5882_v49 = vld [vmem:[#allocation9 + $0x324] sm:$0xf]  ;;  %v3817_v56 = vor.u32 %v5860_v15, %v5862_v16 }
  0xd3   :  { %v3679_v17 = vxor.u32 2147483648, %v747_v50  ;;  %v740_v19 = vshrl.u32 %v732_v3, 16  ;;  %v4105_v40 = vor.u32 %v5850_v4, %v5852_v5  ;;  %v4086_v53 = vld [vmem:[#allocation9 + $0x330] sm:$0xf0] }
  0xd4   :  { %2489 = vmatpush.bf16.msra.mxu3 %v4153_v29  ;;  %v733_v12 = vmul.u32 2221713035, %v725_v0  ;;  %v5864_v29 = vld [vmem:[#allocation9 + $0x4e4] sm:$0xf]  ;;  %v4070_v15 = vld [vmem:[#allocation9 + $0x310] sm:$0xf0] }
  0xd5   :  { %2476 = vmatpush.bf16.msra.mxu2 %v4025_v13  ;;  %2452 = vmatpush.bf16.msra.mxu0 %v3737_v18  ;;  %v5866_v18 = vld [vmem:[#allocation9 + $0x4f0] sm:$0xf0]  ;;  %v748_v38 = vxor.u32 %v740_v19, %v732_v3  ;;  %vm5886_vm15 = vcmp.ge.s32.totalorder %v3679_v17, 3435973836  ;;  %v5894_v0 = vld [vmem:[#allocation9 + $0x5c4] sm:$0xf] }
  0xd6   :  { %2465 = vmatpush.bf16.msra.mxu1 %v3865_v23  ;;  %v5868_v23 = vld [vmem:[#allocation9 + $0x5e4] sm:$0xf]  ;;  %v741_v25 = vshrl.u32 %v733_v12, 16  ;;  %vm5916_vm1 = vmpackc.low %vm5886_vm15, %vm5886_vm15  ;;  %v4840_v3 = vld [vmem:[#allocation11 + $0x40] sm:$0xf] }
  0xd8   :  { %2490 = vmatpush.bf16.msra.mxu3 %v4137_v41  ;;  %v749_v44 = vxor.u32 %v741_v25, %v733_v12 }
  0xd9   :  { %v579_v1 = vpop.f32.mrf.mxu0  ;;  %2477 = vmatpush.bf16.msra.mxu2 %v4009_v31  ;;  %v592_v7 = vpop.f32.mrf.mxu1  ;;  %2453 = vmatpush.bf16.msra.mxu0 %v3721_v48  ;;  %v3977_v31 = vor.u32 %v5843_v60, %v5845_v63  ;;  %v3689_v48 = vor.u32 %v5855_v9, %v5857_v10  ;;  %v5305_v60 = vld [vmem:[#allocation9 + $0x4c4] sm:$0xf]  ;;  %v4294_v63 = vld [vmem:[#allocation9 + $0x4d0] sm:$0xf0]  ;;  %v3680_v10 = vxor.u32 2147483648, %v748_v38 }
  0xda   :  { %v580_v6 = vadd.f32 %v579_v1, %v186_v34  ;;  %v593_v13 = vadd.f32 %v592_v7, %v187_v42  ;;  %2466 = vmatpush.bf16.msra.mxu1 %v3849_v57  ;;  %v5874_v34 = vld [vmem:[#allocation9 + $0x224] sm:$0xf]  ;;  %v3958_v42 = vld [vmem:[#allocation9 + $0x230] sm:$0xf0]  ;;  %v4313_v57 = vor.u32 %v5864_v29, %v5866_v18  ;;  %v3681_v16 = vxor.u32 2147483648, %v749_v44 }
  0xdb   :  { %v5896_v1 = vld [vmem:[#allocation9 + $0x5d0] sm:$0xf0]  ;;  %v5217_v7 = vld [vmem:[#allocation9 + $0x204] sm:$0xf]  ;;  %vm5930_vm6 = vcmp.ge.s32.totalorder %v3680_v10, 3435973836 }
  0xdc   :  { %vm626_vm12 = vcmp.ge.f32.partialorder %v580_v6, 0.0  ;;  %v634_v20 = vmul.f32 0.2, %v580_v6  ;;  %vm627_vm13 = vcmp.ge.f32.partialorder %v593_v13, 0.0  ;;  %v635_v26 = vmul.f32 0.2, %v593_v13  ;;  %2491 = vmatpush.bf16.msra.mxu3 %v4121_v2  ;;  %vm5939_vm8 = vmpackc.low %vm5930_vm6, %vm5930_vm6 }
  0xdd   :  { %2478 = vmatpush.bf16.msra.mxu2 %v3993_v62  ;;  %2454 = vmatpush.bf16.msra.mxu0 %v3705_v14  ;;  %v3942_v9 = vld [vmem:[#allocation9 + $0x210] sm:$0xf0]  ;;  %v5249_v14 = vld [vmem:[#allocation9 + $0x304] sm:$0xf]  ;;  %vm773_vm7 = vcmp.ge.s32.totalorder %v3681_v16, 3435973836 }
  0xde   :  { %v642_v39 = vsel %vm626_vm12, %v580_v6, %v634_v20  ;;  %v643_v47 = vsel %vm627_vm13, %v593_v13, %v635_v26  ;;  %2467 = vmatpush.bf16.msra.mxu1 %v3833_v21  ;;  %v4441_v6 = vor.u32 %v5868_v23, %v5870_v24  ;;  %v3961_v13 = vor.u32 %v5874_v34, %v3958_v42  ;;  %v5373_v29 = vld [vmem:[#allocation9 + $0x6e4] sm:$0xf]  ;;  %v4566_v18 = vld [vmem:[#allocation9 + $0x6f0] sm:$0xf0]  ;;  %vm5945_vm9 = vmpackc.low %vm773_vm7, %vm773_vm7 }
  0xdf   :  { %v778_v45 = vmul.f32 1.4285715, %v642_v39  ;;  %v779_v54 = vmul.f32 1.4285715, %v643_v47  ;;  %v5405_v20 = vld [vmem:[#allocation9 + $0x7e4] sm:$0xf]  ;;  %v4297_v23 = vor.u32 %v5305_v60, %v4294_v63  ;;  %v4425_v24 = vor.u32 %v5894_v0, %v5896_v1 }
  0xe0   :  { %2492 = vmatpush.bf16.msra.mxu3 %v4105_v40  ;;  %v4694_v26 = vld [vmem:[#allocation9 + $0x7f0] sm:$0xf0]  ;;  %v3945_v39 = vor.u32 %v5217_v7, %v3942_v9  ;;  %v4073_v42 = vor.u32 %v5249_v14, %v4070_v15  ;;  %v4569_v52 = vor.u32 %v5373_v29, %v4566_v18  ;;  %v5401_v0 = vld [vmem:[#allocation9 + $0x7c4] sm:$0xf] }
  0xe1   :  { %v605_v50 = vpop.f32.mrf.mxu2  ;;  %v5898_v62 = vpack.c.bf16 %v778_v45, %v778_v45  ;;  %v618_v4 = vpop.f32.mrf.mxu3  ;;  %v5911_v11 = vpack.c.bf16 %v779_v54, %v779_v54  ;;  %2479 = vmatpush.bf16.msra.mxu2 %v3977_v31  ;;  %2455 = vmatpush.bf16.msra.mxu0 %v3689_v48  ;;  %v5301_v31 = vld [vmem:[#allocation9 + $0x4a4] sm:$0xf]  ;;  %v4278_v40 = vld [vmem:[#allocation9 + $0x4b0] sm:$0xf0] }
  0xe2   :  { %v606_v2 = vadd.f32 %v605_v50, %v188_v58  ;;  %v581_v5 = vpop.f32.mrf.mxu0  ;;  %v619_v12 = vadd.f32 %v618_v4, %v189_v8  ;;  %v594_v61 = vpop.f32.mrf.mxu1  ;;  %v4089_v8 = vor.u32 %v5882_v49, %v4086_v53  ;;  %2468 = vmatpush.bf16.msra.mxu1 %v3817_v56  ;;  %v5333_v49 = vld [vmem:[#allocation9 + $0x5a4] sm:$0xf]  ;;  %v4406_v44 = vld [vmem:[#allocation9 + $0x5b0] sm:$0xf0]  ;;  %v4281_v60 = vor.u32 %v5301_v31, %v4278_v40  ;;  %v5414_v56 = vld [vmem:[#allocation11 + $0x24] sm:$0xf0] }
  0xe3   :  { %4720 = vmatmul.msk.bf16.vlgmr.msrb.gmra.mxu0 %vm5905_vm0, %v5898_v62  ;;  %4723 = vmatmul.msk.bf16.vlgmr.msrb.gmra.mxu1 %vm5916_vm1, %v5911_v11  ;;  %v5369_v53 = vld [vmem:[#allocation9 + $0x6c4] sm:$0xf]  ;;  %v4550_v63 = vld [vmem:[#allocation9 + $0x6d0] sm:$0xf0]  ;;  %v4409_v1 = vor.u32 %v5333_v49, %v4406_v44 }
  0xe4   :  { %vm628_vm2 = vcmp.ge.f32.partialorder %v606_v2, 0.0  ;;  %v636_v17 = vmul.f32 0.2, %v606_v2  ;;  %vm629_vm3 = vcmp.ge.f32.partialorder %v619_v12, 0.0  ;;  %v637_v19 = vmul.f32 0.2, %v619_v12  ;;  %2493 = vmatpush.bf16.msra.mxu3 %v4089_v8 }
  0xe5   :  { %2500 = vmatpush.bf16.msrb.mxu0 %v4313_v57  ;;  %2480 = vmatpush.bf16.msra.mxu2 %v3961_v13  ;;  %v4697_v57 = vor.u32 %v5405_v20, %v4694_v26  ;;  %v5297_v4 = vld [vmem:[#allocation9 + $0x484] sm:$0xf]  ;;  %v4262_v5 = vld [vmem:[#allocation9 + $0x490] sm:$0xf0]  ;;  %v4553_v9 = vor.u32 %v5369_v53, %v4550_v63 }
  0xe6   :  { %v644_v21 = vsel %vm628_vm2, %v606_v2, %v636_v17  ;;  %v645_v38 = vsel %vm629_vm3, %v619_v12, %v637_v19  ;;  %2513 = vmatpush.bf16.msrb.mxu1 %v4441_v6  ;;  %v4678_v2 = vld [vmem:[#allocation9 + $0x7d0] sm:$0xf0]  ;;  %v5329_v6 = vld [vmem:[#allocation9 + $0x584] sm:$0xf]  ;;  %v4265_v12 = vor.u32 %v5297_v4, %v4262_v5 }
  0xe7   :  { %v780_v34 = vmul.f32 1.4285715, %v644_v21  ;;  %v781_v41 = vmul.f32 1.4285715, %v645_v38  ;;  %v4390_v7 = vld [vmem:[#allocation9 + $0x590] sm:$0xf0]  ;;  %v4681_v10 = vor.u32 %v5401_v0, %v4678_v2 }
  0xe8   :  { %2494 = vmatpush.bf16.msra.mxu3 %v4073_v42  ;;  %v5365_v61 = vld [vmem:[#allocation9 + $0x6a4] sm:$0xf]  ;;  %v4534_v13 = vld [vmem:[#allocation9 + $0x6b0] sm:$0xf0]  ;;  %v4393_v14 = vor.u32 %v5329_v6, %v4390_v7 }
  0xe9   :  { %v5934_v45 = vpack.c.bf16 %v780_v34, %v780_v34  ;;  %v607_v47 = vpop.f32.mrf.mxu2  ;;  %v5943_v54 = vpack.c.bf16 %v781_v41, %v781_v41  ;;  %v620_v50 = vpop.f32.mrf.mxu3  ;;  %2501 = vmatpush.bf16.msrb.mxu0 %v4297_v23  ;;  %2481 = vmatpush.bf16.msra.mxu2 %v3945_v39  ;;  %v5397_v15 = vld [vmem:[#allocation9 + $0x7a4] sm:$0xf]  ;;  %v4662_v16 = vld [vmem:[#allocation9 + $0x7b0] sm:$0xf0]  ;;  %v4537_v19 = vor.u32 %v5365_v61, %v4534_v13 }
  0xea   :  { %2514 = vmatpush.bf16.msrb.mxu1 %v4425_v24  ;;  %v5293_v17 = vld [vmem:[#allocation9 + $0x464] sm:$0xf]  ;;  %v4246_v8 = vld [vmem:[#allocation9 + $0x470] sm:$0xf0]  ;;  %v4665_v20 = vor.u32 %v5397_v15, %v4662_v16  ;;  %v3804_v15 = vld [vmem:[#allocation9 + $0xe8] sm:$0xf] }
  0xeb   :  { %4726 = vmatmul.msk.bf16.vlgmr.msrb.gmra.mxu2 %vm5939_vm8, %v5934_v45  ;;  %4729 = vmatmul.msk.bf16.vlgmr.msrb.gmra.mxu3 %vm5945_vm9, %v5943_v54  ;;  %v5325_v29 = vld [vmem:[#allocation9 + $0x564] sm:$0xf]  ;;  %v4374_v18 = vld [vmem:[#allocation9 + $0x570] sm:$0xf0]  ;;  %v4249_v24 = vor.u32 %v5293_v17, %v4246_v8  ;;  %v5184_v17 = vld [vmem:[#allocation9 + $0xf4] sm:$0xf0] }
  0xec   :  { %2539 = vmatpush.bf16.msrb.mxu3 %v4697_v57  ;;  %v5361_v21 = vld [vmem:[#allocation9 + $0x684] sm:$0xf]  ;;  %v4518_v23 = vld [vmem:[#allocation9 + $0x690] sm:$0xf0]  ;;  %v4377_v25 = vor.u32 %v5325_v29, %v4374_v18  ;;  %v3932_v8 = vld [vmem:[#allocation9 + $0x1e8] sm:$0xf] }
  0xed   :  { %2526 = vmatpush.bf16.msrb.mxu2 %v4569_v52  ;;  %2502 = vmatpush.bf16.msrb.mxu0 %v4281_v60  ;;  %v5393_v26 = vld [vmem:[#allocation9 + $0x784] sm:$0xf]  ;;  %v4646_v31 = vld [vmem:[#allocation9 + $0x790] sm:$0xf0]  ;;  %v4521_v41 = vor.u32 %v5361_v21, %v4518_v23  ;;  %v5216_v29 = vld [vmem:[#allocation9 + $0x1f4] sm:$0xf0] }
  0xee   :  { %2515 = vmatpush.bf16.msrb.mxu1 %v4409_v1  ;;  %v5289_v34 = vld [vmem:[#allocation9 + $0x444] sm:$0xf]  ;;  %v4230_v38 = vld [vmem:[#allocation9 + $0x450] sm:$0xf0]  ;;  %v4649_v42 = vor.u32 %v5393_v26, %v4646_v31  ;;  %v3805_v26 = vor.u32 %v5184_v17, %v3804_v15  ;;  %v3933_v31 = vor.u32 %v5216_v29, %v3932_v8  ;;  %v4172_v15 = vld [vmem:[#allocation9 + $0x3c8] sm:$0xf] }
  0xef   :  { %v5321_v39 = vld [vmem:[#allocation9 + $0x544] sm:$0xf]  ;;  %v4358_v40 = vld [vmem:[#allocation9 + $0x550] sm:$0xf0]  ;;  %v4233_v47 = vor.u32 %v5289_v34, %v4230_v38  ;;  %v3788_v34 = vld [vmem:[#allocation9 + $0xc8] sm:$0xf] }
  0xf0   :  { %2540 = vmatpush.bf16.msrb.mxu3 %v4681_v10  ;;  %v5357_v49 = vld [vmem:[#allocation9 + $0x664] sm:$0xf]  ;;  %v4502_v44 = vld [vmem:[#allocation9 + $0x670] sm:$0xf0]  ;;  %v4361_v52 = vor.u32 %v5321_v39, %v4358_v40  ;;  %v5180_v39 = vld [vmem:[#allocation9 + $0xd4] sm:$0xf0] }
  0xf1   :  { %2527 = vmatpush.bf16.msrb.mxu2 %v4553_v9  ;;  %2503 = vmatpush.bf16.msrb.mxu0 %v4265_v12  ;;  %v5389_v53 = vld [vmem:[#allocation9 + $0x764] sm:$0xf]  ;;  %v4630_v50 = vld [vmem:[#allocation9 + $0x770] sm:$0xf0]  ;;  %v4505_v1 = vor.u32 %v5357_v49, %v4502_v44  ;;  %v3916_v40 = vld [vmem:[#allocation9 + $0x1c8] sm:$0xf] }
  0xf2   :  { %2516 = vmatpush.bf16.msrb.mxu1 %v4393_v14  ;;  %v5285_v57 = vld [vmem:[#allocation9 + $0x424] sm:$0xf]  ;;  %v4214_v60 = vld [vmem:[#allocation9 + $0x430] sm:$0xf0]  ;;  %v4633_v2 = vor.u32 %v5389_v53, %v4630_v50  ;;  %v4060_v53 = vld [vmem:[#allocation9 + $0x2e8] sm:$0xf] }
  0xf3   :  { %4732 = vmatmul.msk.bf16.vlgmr.msra.gmra.mxu0 %vm5774_vm4, %v5779_v51  ;;  %4735 = vmatmul.msk.bf16.vlgmr.msra.gmra.mxu1 %vm5784_vm5, %v5788_v59  ;;  %v5317_v63 = vld [vmem:[#allocation9 + $0x524] sm:$0xf]  ;;  %v4342_v0 = vld [vmem:[#allocation9 + $0x530] sm:$0xf0]  ;;  %v4217_v7 = vor.u32 %v5285_v57, %v4214_v60  ;;  %v5248_v50 = vld [vmem:[#allocation9 + $0x2f4] sm:$0xf0]  ;;  %v3789_v57 = vor.u32 %v5180_v39, %v3788_v34 }
  0xf4   :  { %2541 = vmatpush.bf16.msrb.mxu3 %v4665_v20  ;;  %v5353_v4 = vld [vmem:[#allocation9 + $0x644] sm:$0xf]  ;;  %v4486_v5 = vld [vmem:[#allocation9 + $0x650] sm:$0xf0]  ;;  %v4345_v9 = vor.u32 %v5317_v63, %v4342_v0  ;;  %v4188_v63 = vld [vmem:[#allocation9 + $0x3e8] sm:$0xf] }
  0xf5   :  { %2528 = vmatpush.bf16.msrb.mxu2 %v4537_v19  ;;  %2504 = vmatpush.bf16.msrb.mxu0 %v4249_v24  ;;  %v5385_v6 = vld [vmem:[#allocation9 + $0x744] sm:$0xf]  ;;  %v4614_v10 = vld [vmem:[#allocation9 + $0x750] sm:$0xf0]  ;;  %v4489_v16 = vor.u32 %v5353_v4, %v4486_v5  ;;  %v5280_v0 = vld [vmem:[#allocation9 + $0x3f4] sm:$0xf0] }
  0xf6   :  { %2517 = vmatpush.bf16.msrb.mxu1 %v4377_v25  ;;  %v5281_v12 = vld [vmem:[#allocation9 + $0x404] sm:$0xf]  ;;  %v4198_v61 = vld [vmem:[#allocation9 + $0x410] sm:$0xf0]  ;;  %v4617_v18 = vor.u32 %v5385_v6, %v4614_v10  ;;  %v5176_v4 = vld [vmem:[#allocation9 + $0xb4] sm:$0xf0]  ;;  %v4189_v10 = vor.u32 %v5280_v0, %v4188_v63 }
  0xf7   :  { %v5313_v13 = vld [vmem:[#allocation9 + $0x504] sm:$0xf]  ;;  %v4326_v14 = vld [vmem:[#allocation9 + $0x510] sm:$0xf0]  ;;  %v4201_v21 = vor.u32 %v5281_v12, %v4198_v61  ;;  %v3900_v5 = vld [vmem:[#allocation9 + $0x1a8] sm:$0xf] }
  0xf8   :  { %2542 = vmatpush.bf16.msrb.mxu3 %v4649_v42  ;;  %v5349_v19 = vld [vmem:[#allocation9 + $0x624] sm:$0xf]  ;;  %v4470_v20 = vld [vmem:[#allocation9 + $0x630] sm:$0xf0]  ;;  %v4329_v23 = vor.u32 %v5313_v13, %v4326_v14  ;;  %v5208_v6 = vld [vmem:[#allocation9 + $0x1b4] sm:$0xf0] }
  0xf9   :  { %2529 = vmatpush.bf16.msrb.mxu2 %v4521_v41  ;;  %2505 = vmatpush.bf16.msrb.mxu0 %v4233_v47  ;;  %v5381_v24 = vld [vmem:[#allocation9 + $0x724] sm:$0xf]  ;;  %v4598_v25 = vld [vmem:[#allocation9 + $0x730] sm:$0xf0]  ;;  %v4473_v38 = vor.u32 %v5349_v19, %v4470_v20  ;;  %v5212_v41 = vld [vmem:[#allocation9 + $0x1d4] sm:$0xf0]  ;;  %v3901_v14 = vor.u32 %v5208_v6, %v3900_v5 }
  0xfa   :  { %2518 = vmatpush.bf16.msrb.mxu1 %v4361_v52  ;;  %v4601_v42 = vor.u32 %v5381_v24, %v4598_v25  ;;  %v5345_v49 = vld [vmem:[#allocation9 + $0x604] sm:$0xf]  ;;  %v4454_v44 = vld [vmem:[#allocation9 + $0x610] sm:$0xf0]  ;;  %v3917_v60 = vor.u32 %v5212_v41, %v3916_v40  ;;  %v4044_v12 = vld [vmem:[#allocation9 + $0x2c8] sm:$0xf] }
  0xfb   :  { %4738 = vmatmul.msk.bf16.vlgmr.msra.gmra.mxu2 %vm5804_vm10, %v5811_v33  ;;  %4741 = vmatmul.msk.bf16.vlgmr.msra.gmra.mxu3 %vm5816_vm11, %v5822_v43  ;;  %v5377_v47 = vld [vmem:[#allocation9 + $0x704] sm:$0xf]  ;;  %v4582_v52 = vld [vmem:[#allocation9 + $0x710] sm:$0xf0]  ;;  %v5244_v61 = vld [vmem:[#allocation9 + $0x2d4] sm:$0xf0] }
  0xfc   :  { %2543 = vmatpush.bf16.msrb.mxu3 %v4633_v2  ;;  %v4457_v2 = vor.u32 %v5345_v49, %v4454_v44  ;;  %v3756_v17 = vld [vmem:[#allocation9 + $0x88] sm:$0xf]  ;;  %v5172_v8 = vld [vmem:[#allocation9 + $0x94] sm:$0xf0]  ;;  %v4045_v19 = vor.u32 %v5244_v61, %v4044_v12 }
  0xfd   :  { %2530 = vmatpush.bf16.msrb.mxu2 %v4505_v1  ;;  %2506 = vmatpush.bf16.msrb.mxu0 %v4217_v7  ;;  %v3772_v1 = vld [vmem:[#allocation9 + $0xa8] sm:$0xf]  ;;  %v4585_v7 = vor.u32 %v5377_v47, %v4582_v52  ;;  %v3757_v24 = vor.u32 %v5172_v8, %v3756_v17  ;;  %v5200_v40 = vld [vmem:[#allocation9 + $0x174] sm:$0xf0] }
  0xfe   :  { %2519 = vmatpush.bf16.msrb.mxu1 %v4345_v9  ;;  %v4061_v9 = vor.u32 %v5248_v50, %v4060_v53  ;;  %v3773_v13 = vor.u32 %v5176_v4, %v3772_v1  ;;  %v3884_v29 = vld [vmem:[#allocation9 + $0x188] sm:$0xf]  ;;  %v5236_v44 = vld [vmem:[#allocation9 + $0x294] sm:$0xf0] }
  0xff   :  { %v3740_v34 = vld [vmem:[#allocation9 + $0x68] sm:$0xf]  ;;  %v5268_v50 = vld [vmem:[#allocation9 + $0x394] sm:$0xf0] }
 0x100   :  { %2544 = vmatpush.bf16.msrb.mxu3 %v4617_v18  ;;  %v5204_v18 = vld [vmem:[#allocation9 + $0x194] sm:$0xf0]  ;;  %v3868_v39 = vld [vmem:[#allocation9 + $0x168] sm:$0xf] }
 0x101   :  { %2531 = vmatpush.bf16.msrb.mxu2 %v4489_v16  ;;  %2507 = vmatpush.bf16.msrb.mxu0 %v4201_v21  ;;  %v5276_v16 = vld [vmem:[#allocation9 + $0x3d4] sm:$0xf0]  ;;  %v4028_v21 = vld [vmem:[#allocation9 + $0x2a8] sm:$0xf]  ;;  %v3885_v25 = vor.u32 %v5204_v18, %v3884_v29  ;;  %v3869_v52 = vor.u32 %v5200_v40, %v3868_v39 }
 0x102   :  { %2520 = vmatpush.bf16.msrb.mxu1 %v4329_v23  ;;  %v4173_v20 = vor.u32 %v5276_v16, %v4172_v15  ;;  %v5240_v23 = vld [vmem:[#allocation9 + $0x2b4] sm:$0xf0]  ;;  %v4012_v49 = vld [vmem:[#allocation9 + $0x288] sm:$0xf] }
 0x103   :  { %v4029_v41 = vor.u32 %v5240_v23, %v4028_v21  ;;  %v4140_v53 = vld [vmem:[#allocation9 + $0x388] sm:$0xf]  ;;  %v5196_v0 = vld [vmem:[#allocation9 + $0x154] sm:$0xf0]  ;;  %v4013_v1 = vor.u32 %v5236_v44, %v4012_v49 }
 0x104   :  { %2545 = vmatpush.bf16.msrb.mxu3 %v4601_v42  ;;  %4744 = vmatmul.msk.bf16.vlgmr.msrb.gmra.mxu0 %vm5905_vm0, %v5898_v62  ;;  %v3852_v63 = vld [vmem:[#allocation9 + $0x148] sm:$0xf]  ;;  %v5232_v5 = vld [vmem:[#allocation9 + $0x274] sm:$0xf0] }
 0x105   :  { %2552 = vmatpush.bf16.msra.mxu0 %v3805_v26  ;;  %2532 = vmatpush.bf16.msrb.mxu2 %v4473_v38  ;;  %v4156_v26 = vld [vmem:[#allocation9 + $0x3a8] sm:$0xf]  ;;  %v5168_v38 = vld [vmem:[#allocation9 + $0x74] sm:$0xf0] }
 0x106   :  { %2565 = vmatpush.bf16.msra.mxu1 %v3933_v31  ;;  %v5272_v31 = vld [vmem:[#allocation9 + $0x3b4] sm:$0xf0]  ;;  %v3741_v47 = vor.u32 %v5168_v38, %v3740_v34  ;;  %v3996_v4 = vld [vmem:[#allocation9 + $0x268] sm:$0xf] }
 0x107   :  { %4747 = vmatmul.msk.bf16.vlgmr.msrb.gmra.mxu1 %vm5916_vm1, %v5911_v11  ;;  %v4157_v42 = vor.u32 %v5272_v31, %v4156_v26  ;;  %v3708_v12 = vld [vmem:[#allocation9 + $0x28] sm:$0xf]  ;;  %v5160_v61 = vld [vmem:[#allocation9 + $0x34] sm:$0xf0]  ;;  %v3997_v15 = vor.u32 %v5232_v5, %v3996_v4 }
 0x108   :  { %2546 = vmatpush.bf16.msrb.mxu3 %v4585_v7  ;;  %v3853_v7 = vor.u32 %v5196_v0, %v3852_v63  ;;  %v3980_v17 = vld [vmem:[#allocation9 + $0x248] sm:$0xf]  ;;  %v5228_v8 = vld [vmem:[#allocation9 + $0x254] sm:$0xf0]  ;;  %v3709_v18 = vor.u32 %v5160_v61, %v3708_v12 }
 0x109   :  { %2553 = vmatpush.bf16.msra.mxu0 %v3789_v57  ;;  %2533 = vmatpush.bf16.msrb.mxu2 %v4457_v2  ;;  %v3724_v57 = vld [vmem:[#allocation9 + $0x48] sm:$0xf]  ;;  %v4141_v2 = vor.u32 %v5268_v50, %v4140_v53  ;;  %v5156_v23 = vld [vmem:[#allocation9 + $0x14] sm:$0xf0]  ;;  %v3981_v31 = vor.u32 %v5228_v8, %v3980_v17 }
 0x10a   :  { %2566 = vmatpush.bf16.msra.mxu1 %v3917_v60  ;;  %v5164_v60 = vld [vmem:[#allocation9 + $0x54] sm:$0xf0]  ;;  %v4108_v29 = vld [vmem:[#allocation9 + $0x348] sm:$0xf] }
 0x10b   :  { %4753 = vmatmul.msk.bf16.vlgmr.msrb.gmra.mxu3 %vm5945_vm9, %v5943_v54  ;;  %v3725_v6 = vor.u32 %v5164_v60, %v3724_v57  ;;  %v3692_v21 = vld [vmem:[#allocation9 + $0x8] sm:$0xf]  ;;  %v5312_v34 = vld [vmem:[#allocation9 + $0x4f4] sm:$0xf0] }
 0x10c   :  { %2591 = vmatpush.bf16.msra.mxu3 %v4189_v10  ;;  %4750 = vmatmul.msk.bf16.vlgmr.msrb.gmra.mxu2 %vm5939_vm8, %v5934_v45  ;;  %v5264_v10 = vld [vmem:[#allocation9 + $0x374] sm:$0xf0]  ;;  %v4316_v26 = vld [vmem:[#allocation9 + $0x4e8] sm:$0xf]  ;;  %v3693_v49 = vor.u32 %v5156_v23, %v3692_v21 }
 0x10d   :  { %2578 = vmatpush.bf16.msra.mxu2 %v4061_v9  ;;  %2554 = vmatpush.bf16.msra.mxu0 %v3773_v13  ;;  %v4124_v9 = vld [vmem:[#allocation9 + $0x368] sm:$0xf]  ;;  %v5344_v39 = vld [vmem:[#allocation9 + $0x5f4] sm:$0xf0]  ;;  %v4317_v53 = vor.u32 %v5312_v34, %v4316_v26 }
 0x10e   :  { %2567 = vmatpush.bf16.msra.mxu1 %v3901_v14  ;;  %v3836_v13 = vld [vmem:[#allocation9 + $0x128] sm:$0xf]  ;;  %v5192_v14 = vld [vmem:[#allocation9 + $0x134] sm:$0xf0]  ;;  %v4125_v16 = vor.u32 %v5264_v10, %v4124_v9 }
 0x10f   :  { %v4444_v38 = vld [vmem:[#allocation9 + $0x5e8] sm:$0xf]  ;;  %v5308_v63 = vld [vmem:[#allocation9 + $0x4d4] sm:$0xf0] }
 0x110   :  { %2592 = vmatpush.bf16.msra.mxu3 %v4173_v20  ;;  %v5260_v20 = vld [vmem:[#allocation9 + $0x354] sm:$0xf0]  ;;  %v4445_v50 = vor.u32 %v5344_v39, %v4444_v38  ;;  %v4300_v57 = vld [vmem:[#allocation9 + $0x4c8] sm:$0xf] }
 0x111   :  { %2579 = vmatpush.bf16.msra.mxu2 %v4045_v19  ;;  %2555 = vmatpush.bf16.msra.mxu0 %v3757_v24  ;;  %v3837_v19 = vor.u32 %v5192_v14, %v3836_v13  ;;  %v3820_v24 = vld [vmem:[#allocation9 + $0x108] sm:$0xf]  ;;  %v4109_v40 = vor.u32 %v5260_v20, %v4108_v29  ;;  %v5220_v5 = vld [vmem:[#allocation9 + $0x214] sm:$0xf0]  ;;  %v4301_v12 = vor.u32 %v5308_v63, %v4300_v57 }
 0x112   :  { %2568 = vmatpush.bf16.msra.mxu1 %v3885_v25  ;;  %v5188_v25 = vld [vmem:[#allocation9 + $0x114] sm:$0xf0]  ;;  %v4428_v0 = vld [vmem:[#allocation9 + $0x5c8] sm:$0xf] }
 0x113   :  { %v3821_v44 = vor.u32 %v5188_v25, %v3820_v24  ;;  %v3948_v4 = vld [vmem:[#allocation9 + $0x208] sm:$0xf]  ;;  %v5376_v10 = vld [vmem:[#allocation9 + $0x6f4] sm:$0xf0] }
 0x114   :  { %2593 = vmatpush.bf16.msra.mxu3 %v4157_v42  ;;  %v5224_v42 = vld [vmem:[#allocation9 + $0x234] sm:$0xf0]  ;;  %v4572_v9 = vld [vmem:[#allocation9 + $0x6e8] sm:$0xf] }
 0x115   :  { %2580 = vmatpush.bf16.msra.mxu2 %v4029_v41  ;;  %2556 = vmatpush.bf16.msra.mxu0 %v3741_v47  ;;  %v3964_v41 = vld [vmem:[#allocation9 + $0x228] sm:$0xf]  ;;  %v5408_v14 = vld [vmem:[#allocation9 + $0x7f4] sm:$0xf0]  ;;  %v4573_v29 = vor.u32 %v5376_v10, %v4572_v9 }
 0x116   :  { %2569 = vmatpush.bf16.msra.mxu1 %v3869_v52  ;;  %v4092_v47 = vld [vmem:[#allocation9 + $0x328] sm:$0xf]  ;;  %v5256_v52 = vld [vmem:[#allocation9 + $0x334] sm:$0xf0]  ;;  %v3965_v60 = vor.u32 %v5224_v42, %v3964_v41 }
 0x117   :  { %v4700_v13 = vld [vmem:[#allocation9 + $0x7e8] sm:$0xf]  ;;  %v5304_v17 = vld [vmem:[#allocation9 + $0x4b4] sm:$0xf0] }
 0x118   :  { %2594 = vmatpush.bf16.msra.mxu3 %v4141_v2  ;;  %v4093_v2 = vor.u32 %v5256_v52, %v4092_v47  ;;  %v4701_v20 = vor.u32 %v5408_v14, %v4700_v13  ;;  %v4556_v21 = vld [vmem:[#allocation9 + $0x6c8] sm:$0xf]  ;;  %v5372_v23 = vld [vmem:[#allocation9 + $0x6d4] sm:$0xf0] }
 0x119   :  { %2581 = vmatpush.bf16.msra.mxu2 %v4013_v1  ;;  %2557 = vmatpush.bf16.msra.mxu0 %v3725_v6  ;;  %v5340_v1 = vld [vmem:[#allocation9 + $0x5d4] sm:$0xf0]  ;;  %v4076_v6 = vld [vmem:[#allocation9 + $0x308] sm:$0xf]  ;;  %v4557_v39 = vor.u32 %v5372_v23, %v4556_v21 }
 0x11a   :  { %2570 = vmatpush.bf16.msra.mxu1 %v3853_v7  ;;  %v5252_v7 = vld [vmem:[#allocation9 + $0x314] sm:$0xf0]  ;;  %v4429_v61 = vor.u32 %v5340_v1, %v4428_v0  ;;  %v4684_v25 = vld [vmem:[#allocation9 + $0x7c8] sm:$0xf] }
 0x11b   :  { %v4077_v8 = vor.u32 %v5252_v7, %v4076_v6  ;;  %v5404_v26 = vld [vmem:[#allocation9 + $0x7d4] sm:$0xf0]  ;;  %v4268_v34 = vld [vmem:[#allocation9 + $0x488] sm:$0xf] }
 0x11c   :  { %2595 = vmatpush.bf16.msra.mxu3 %v4125_v16  ;;  %v4284_v16 = vld [vmem:[#allocation9 + $0x4a8] sm:$0xf]  ;;  %v5300_v38 = vld [vmem:[#allocation9 + $0x494] sm:$0xf0]  ;;  %v4685_v42 = vor.u32 %v5404_v26, %v4684_v25 }
 0x11d   :  { %2582 = vmatpush.bf16.msra.mxu2 %v3997_v15  ;;  %2558 = vmatpush.bf16.msra.mxu0 %v3709_v18  ;;  %v3949_v15 = vor.u32 %v5220_v5, %v3948_v4  ;;  %v4412_v18 = vld [vmem:[#allocation9 + $0x5a8] sm:$0xf]  ;;  %v4285_v24 = vor.u32 %v5304_v17, %v4284_v16  ;;  %v5332_v41 = vld [vmem:[#allocation9 + $0x594] sm:$0xf0]  ;;  %v4269_v47 = vor.u32 %v5300_v38, %v4268_v34 }
 0x11e   :  { %2571 = vmatpush.bf16.msra.mxu1 %v3837_v19  ;;  %v5336_v19 = vld [vmem:[#allocation9 + $0x5b4] sm:$0xf0]  ;;  %v4668_v52 = vld [vmem:[#allocation9 + $0x7a8] sm:$0xf] }
 0x11f   :  { %v4252_v57 = vld [vmem:[#allocation9 + $0x468] sm:$0xf]  ;;  %v5328_v1 = vld [vmem:[#allocation9 + $0x574] sm:$0xf0] }
 0x120   :  { %2596 = vmatpush.bf16.msra.mxu3 %v4109_v40  ;;  %v4396_v40 = vld [vmem:[#allocation9 + $0x588] sm:$0xf]  ;;  %v5364_v5 = vld [vmem:[#allocation9 + $0x694] sm:$0xf0] }
 0x121   :  { %2583 = vmatpush.bf16.msra.mxu2 %v3981_v31  ;;  %2559 = vmatpush.bf16.msra.mxu0 %v3693_v49  ;;  %v4413_v31 = vor.u32 %v5336_v19, %v4412_v18  ;;  %v4540_v49 = vld [vmem:[#allocation9 + $0x6a8] sm:$0xf]  ;;  %v5396_v9 = vld [vmem:[#allocation9 + $0x794] sm:$0xf0] }
 0x122   :  { %2572 = vmatpush.bf16.msra.mxu1 %v3821_v44  ;;  %v5368_v44 = vld [vmem:[#allocation9 + $0x6b4] sm:$0xf0]  ;;  %v4380_v0 = vld [vmem:[#allocation9 + $0x568] sm:$0xf] }
 0x123   :  { %v4541_v63 = vor.u32 %v5368_v44, %v4540_v49  ;;  %v4524_v4 = vld [vmem:[#allocation9 + $0x688] sm:$0xf]  ;;  %v4381_v10 = vor.u32 %v5328_v1, %v4380_v0  ;;  %v5392_v19 = vld [vmem:[#allocation9 + $0x774] sm:$0xf0]  ;;  %v3934_v0 = vld [vmem:[#allocation9 + $0x1f8] sm:$0xf0] }
 0x124   :  { %2597 = vmatpush.bf16.msra.mxu3 %v4093_v2  ;;  %4756 = vmatmul.msk.bf16.vlgmr.msra.gmra.mxu0 %vm5774_vm4, %v5779_v51  ;;  %v4652_v7 = vld [vmem:[#allocation9 + $0x788] sm:$0xf]  ;;  %v4525_v13 = vor.u32 %v5364_v5, %v4524_v4  ;;  %v5288_v23 = vld [vmem:[#allocation9 + $0x434] sm:$0xf0] }
 0x125   :  { %2604 = vmatpush.bf16.msrb.mxu0 %v4317_v53  ;;  %2584 = vmatpush.bf16.msra.mxu2 %v3965_v60  ;;  %v5400_v53 = vld [vmem:[#allocation9 + $0x7b4] sm:$0xf0]  ;;  %v4364_v14 = vld [vmem:[#allocation9 + $0x548] sm:$0xf]  ;;  %v4653_v16 = vor.u32 %v5396_v9, %v4652_v7 }
 0x126   :  { %2617 = vmatpush.bf16.msrb.mxu1 %v4445_v50  ;;  %v4397_v50 = vor.u32 %v5332_v41, %v4396_v40  ;;  %v5296_v60 = vld [vmem:[#allocation9 + $0x474] sm:$0xf0]  ;;  %v4669_v2 = vor.u32 %v5400_v53, %v4668_v52  ;;  %v4508_v17 = vld [vmem:[#allocation9 + $0x668] sm:$0xf] }
 0x127   :  { %4759 = vmatmul.msk.bf16.vlgmr.msra.gmra.mxu1 %vm5784_vm5, %v5788_v59  ;;  %v4253_v6 = vor.u32 %v5296_v60, %v4252_v57  ;;  %v4636_v18 = vld [vmem:[#allocation9 + $0x768] sm:$0xf]  ;;  %v5320_v26 = vld [vmem:[#allocation9 + $0x534] sm:$0xf0]  ;;  %v3806_v57 = vld [vmem:[#allocation9 + $0xf8] sm:$0xf0] }
 0x128   :  { %2598 = vmatpush.bf16.msra.mxu3 %v4077_v8  ;;  %v5360_v8 = vld [vmem:[#allocation9 + $0x674] sm:$0xf0]  ;;  %v4220_v21 = vld [vmem:[#allocation9 + $0x428] sm:$0xf]  ;;  %v5214_v60 = vld [vmem:[#allocation9 + $0x1ec] sm:$0xf] }
 0x129   :  { %2605 = vmatpush.bf16.msrb.mxu0 %v4301_v12  ;;  %2585 = vmatpush.bf16.msra.mxu2 %v3949_v15  ;;  %v4236_v12 = vld [vmem:[#allocation9 + $0x448] sm:$0xf]  ;;  %v5324_v15 = vld [vmem:[#allocation9 + $0x554] sm:$0xf0] }
 0x12a   :  { %2618 = vmatpush.bf16.msrb.mxu1 %v4429_v61  ;;  %v5292_v61 = vld [vmem:[#allocation9 + $0x454] sm:$0xf0]  ;;  %v4348_v25 = vld [vmem:[#allocation9 + $0x528] sm:$0xf] }
 0x12b   :  { %4765 = vmatmul.msk.bf16.vlgmr.msra.gmra.mxu3 %vm5816_vm11, %v5822_v43  ;;  %v4492_v34 = vld [vmem:[#allocation9 + $0x648] sm:$0xf]  ;;  %v5356_v38 = vld [vmem:[#allocation9 + $0x654] sm:$0xf0]  ;;  %v4349_v49 = vor.u32 %v5320_v26, %v4348_v25 }
 0x12c   :  { %2643 = vmatpush.bf16.msrb.mxu3 %v4701_v20  ;;  %4762 = vmatmul.msk.bf16.vlgmr.msra.gmra.mxu2 %vm5804_vm10, %v5811_v33  ;;  %v4365_v20 = vor.u32 %v5324_v15, %v4364_v14  ;;  %v4620_v40 = vld [vmem:[#allocation9 + $0x748] sm:$0xf]  ;;  %v5388_v41 = vld [vmem:[#allocation9 + $0x754] sm:$0xf0]  ;;  %v4493_v53 = vor.u32 %v5356_v38, %v4492_v34  ;;  %v5210_v14 = vld [vmem:[#allocation9 + $0x1cc] sm:$0xf] }
 0x12d   :  { %2630 = vmatpush.bf16.msrb.mxu2 %v4573_v29  ;;  %2606 = vmatpush.bf16.msrb.mxu0 %v4285_v24  ;;  %v4237_v29 = vor.u32 %v5292_v61, %v4236_v12  ;;  %v4509_v24 = vor.u32 %v5360_v8, %v4508_v17  ;;  %v5284_v44 = vld [vmem:[#allocation9 + $0x414] sm:$0xf0]  ;;  %v4476_v1 = vld [vmem:[#allocation9 + $0x628] sm:$0xf]  ;;  %v3937_v12 = vor.u32 %v5214_v60, %v3934_v0  ;;  %v3918_v15 = vld [vmem:[#allocation9 + $0x1d8] sm:$0xf0] }
 0x12e   :  { %2619 = vmatpush.bf16.msrb.mxu1 %v4413_v31  ;;  %v4637_v31 = vor.u32 %v5392_v19, %v4636_v18  ;;  %v5316_v52 = vld [vmem:[#allocation9 + $0x514] sm:$0xf0]  ;;  %v4604_v5 = vld [vmem:[#allocation9 + $0x728] sm:$0xf]  ;;  %v5246_v19 = vld [vmem:[#allocation9 + $0x2ec] sm:$0xf]  ;;  %v3921_v25 = vor.u32 %v5210_v14, %v3918_v15 }
 0x12f   :  { %v4460_v17 = vld [vmem:[#allocation9 + $0x608] sm:$0xf]  ;;  %v5348_v8 = vld [vmem:[#allocation9 + $0x614] sm:$0xf0]  ;;  %v3774_v34 = vld [vmem:[#allocation9 + $0xb8] sm:$0xf0] }
 0x130   :  { %2644 = vmatpush.bf16.msrb.mxu3 %v4685_v42  ;;  %v4204_v42 = vld [vmem:[#allocation9 + $0x408] sm:$0xf]  ;;  %v5380_v18 = vld [vmem:[#allocation9 + $0x714] sm:$0xf0]  ;;  %v4461_v26 = vor.u32 %v5348_v8, %v4460_v17  ;;  %v3758_v60 = vld [vmem:[#allocation9 + $0x98] sm:$0xf0] }
 0x131   :  { %2631 = vmatpush.bf16.msrb.mxu2 %v4557_v39  ;;  %2607 = vmatpush.bf16.msrb.mxu0 %v4269_v47  ;;  %v4221_v39 = vor.u32 %v5288_v23, %v4220_v21  ;;  %v4332_v47 = vld [vmem:[#allocation9 + $0x508] sm:$0xf]  ;;  %v4205_v4 = vor.u32 %v5284_v44, %v4204_v42  ;;  %v5278_v23 = vld [vmem:[#allocation9 + $0x3ec] sm:$0xf]  ;;  %v4046_v44 = vld [vmem:[#allocation9 + $0x2d8] sm:$0xf0] }
 0x132   :  { %2620 = vmatpush.bf16.msrb.mxu1 %v4397_v50  ;;  %v5182_v50 = vld [vmem:[#allocation9 + $0xec] sm:$0xf]  ;;  %v4333_v7 = vor.u32 %v5316_v52, %v4332_v47  ;;  %v3742_v14 = vld [vmem:[#allocation9 + $0x78] sm:$0xf0] }
 0x133   :  { %v3809_v9 = vor.u32 %v5182_v50, %v3806_v57  ;;  %v5274_v52 = vld [vmem:[#allocation9 + $0x3cc] sm:$0xf]  ;;  %v3870_v17 = vld [vmem:[#allocation9 + $0x178] sm:$0xf0] }
 0x134   :  { %2645 = vmatpush.bf16.msrb.mxu3 %v4669_v2  ;;  %v5352_v2 = vld [vmem:[#allocation9 + $0x634] sm:$0xf0]  ;;  %v5170_v57 = vld [vmem:[#allocation9 + $0x8c] sm:$0xf] }
 0x135   :  { %2632 = vmatpush.bf16.msrb.mxu2 %v4541_v63  ;;  %2608 = vmatpush.bf16.msrb.mxu0 %v4253_v6  ;;  %v4621_v63 = vor.u32 %v5388_v41, %v4620_v40  ;;  %v5384_v6 = vld [vmem:[#allocation9 + $0x734] sm:$0xf0]  ;;  %v4477_v61 = vor.u32 %v5352_v2, %v4476_v1  ;;  %v5206_v40 = vld [vmem:[#allocation9 + $0x1ac] sm:$0xf]  ;;  %v3902_v41 = vld [vmem:[#allocation9 + $0x1b8] sm:$0xf0] }
 0x136   :  { %2621 = vmatpush.bf16.msrb.mxu1 %v4381_v10  ;;  %v5178_v10 = vld [vmem:[#allocation9 + $0xcc] sm:$0xf]  ;;  %v3905_v50 = vor.u32 %v5206_v40, %v3902_v41  ;;  %v3886_v2 = vld [vmem:[#allocation9 + $0x198] sm:$0xf0] }
 0x137   :  { %v5202_v1 = vld [vmem:[#allocation9 + $0x18c] sm:$0xf] }
 0x138   :  { %2646 = vmatpush.bf16.msrb.mxu3 %v4653_v16  ;;  %v4605_v16 = vor.u32 %v5384_v6, %v4604_v5  ;;  %v5238_v6 = vld [vmem:[#allocation9 + $0x2ac] sm:$0xf] }
 0x139   :  { %2633 = vmatpush.bf16.msrb.mxu2 %v4525_v13  ;;  %2609 = vmatpush.bf16.msrb.mxu0 %v4237_v29  ;;  %v3790_v13 = vld [vmem:[#allocation9 + $0xd8] sm:$0xf0]  ;;  %v4588_v29 = vld [vmem:[#allocation9 + $0x708] sm:$0xf]  ;;  %v5230_v41 = vld [vmem:[#allocation9 + $0x26c] sm:$0xf] }
 0x13a   :  { %2622 = vmatpush.bf16.msrb.mxu1 %v4365_v20  ;;  %v4062_v20 = vld [vmem:[#allocation9 + $0x2f8] sm:$0xf0]  ;;  %v3793_v21 = vor.u32 %v5178_v10, %v3790_v13  ;;  %v4589_v38 = vor.u32 %v5380_v18, %v4588_v29  ;;  %v5270_v10 = vld [vmem:[#allocation9 + $0x3ac] sm:$0xf] }
 0x13b   :  { %v5166_v13 = vld [vmem:[#allocation9 + $0x6c] sm:$0xf]  ;;  %v4014_v18 = vld [vmem:[#allocation9 + $0x298] sm:$0xf0] }
 0x13c   :  { %2647 = vmatpush.bf16.msrb.mxu3 %v4637_v31  ;;  %v5174_v31 = vld [vmem:[#allocation9 + $0xac] sm:$0xf] }
 0x13d   :  { %2634 = vmatpush.bf16.msrb.mxu2 %v4509_v24  ;;  %2610 = vmatpush.bf16.msrb.mxu0 %v4221_v39  ;;  %v4190_v24 = vld [vmem:[#allocation9 + $0x3f8] sm:$0xf0]  ;;  %v4065_v39 = vor.u32 %v5246_v19, %v4062_v20  ;;  %v3777_v47 = vor.u32 %v5174_v31, %v3774_v34  ;;  %v5234_v29 = vld [vmem:[#allocation9 + $0x28c] sm:$0xf]  ;;  %v3745_v19 = vor.u32 %v5166_v13, %v3742_v14 }
 0x13e   :  { %2623 = vmatpush.bf16.msrb.mxu1 %v4349_v49  ;;  %v4193_v42 = vor.u32 %v5278_v23, %v4190_v24  ;;  %v5242_v49 = vld [vmem:[#allocation9 + $0x2cc] sm:$0xf]  ;;  %v4017_v31 = vor.u32 %v5234_v29, %v4014_v18  ;;  %v3694_v14 = vld [vmem:[#allocation9 + $0x18] sm:$0xf0] }
 0x13f   :  { %v4049_v0 = vor.u32 %v5242_v49, %v4046_v44  ;;  %v5266_v20 = vld [vmem:[#allocation9 + $0x38c] sm:$0xf]  ;;  %v4318_v29 = vld [vmem:[#allocation9 + $0x4f8] sm:$0xf0] }
 0x140   :  { %2648 = vmatpush.bf16.msrb.mxu3 %v4621_v63  ;;  %v5997_v63 = vpop.f32.mrf.mxu0  ;;  %v5162_v24 = vld [vmem:[#allocation9 + $0x4c] sm:$0xf] }
 0x141   :  { %2635 = vmatpush.bf16.msrb.mxu2 %v4493_v53  ;;  %2611 = vmatpush.bf16.msrb.mxu0 %v4205_v4  ;;  %v4174_v53 = vld [vmem:[#allocation9 + $0x3d8] sm:$0xf0]  ;;  %v5999_v4 = vpop.f32.mrf.mxu1  ;;  %v5194_v34 = vld [vmem:[#allocation9 + $0x14c] sm:$0xf] }
 0x142   :  { %2624 = vmatpush.bf16.msrb.mxu1 %v4333_v7  ;;  %v4177_v5 = vor.u32 %v5274_v52, %v4174_v53  ;;  %v4030_v7 = vld [vmem:[#allocation9 + $0x2b8] sm:$0xf0]  ;;  %v5262_v44 = vld [vmem:[#allocation9 + $0x36c] sm:$0xf] }
 0x143   :  { %v4033_v15 = vor.u32 %v5238_v6, %v4030_v7  ;;  %v5158_v53 = vld [vmem:[#allocation9 + $0x2c] sm:$0xf]  ;;  %v3982_v6 = vld [vmem:[#allocation9 + $0x258] sm:$0xf0] }
 0x144   :  { %2649 = vmatpush.bf16.msrb.mxu3 %v4605_v16  ;;  %4768 = vmatmul.msk.bf16.vlgmr.msrb.gmra.mxu0 %vm5905_vm0, %v5898_v62  ;;  %v5198_v16 = vld [vmem:[#allocation9 + $0x16c] sm:$0xf] }
 0x145   :  { %2656 = vmatpush.bf16.msra.mxu0 %v3809_v9  ;;  %2636 = vmatpush.bf16.msrb.mxu2 %v4477_v61  ;;  %v3761_v9 = vor.u32 %v5170_v57, %v3758_v60  ;;  %v3889_v61 = vor.u32 %v5202_v1, %v3886_v2  ;;  %v3873_v23 = vor.u32 %v5198_v16, %v3870_v17  ;;  %v5190_v60 = vld [vmem:[#allocation9 + $0x12c] sm:$0xf]  ;;  %v3822_v16 = vld [vmem:[#allocation9 + $0x118] sm:$0xf0] }
 0x146   :  { %2669 = vmatpush.bf16.msra.mxu1 %v3937_v12  ;;  %v4158_v12 = vld [vmem:[#allocation9 + $0x3b8] sm:$0xf0]  ;;  %v5342_v18 = vld [vmem:[#allocation9 + $0x5ec] sm:$0xf] }
 0x147   :  { %4771 = vmatmul.msk.bf16.vlgmr.msrb.gmra.mxu1 %vm5916_vm1, %v5911_v11  ;;  %v4161_v8 = vor.u32 %v5270_v10, %v4158_v12  ;;  %v5258_v10 = vld [vmem:[#allocation9 + $0x34c] sm:$0xf]  ;;  %v4110_v12 = vld [vmem:[#allocation9 + $0x358] sm:$0xf0] }
 0x148   :  { %2650 = vmatpush.bf16.msrb.mxu3 %v4589_v38  ;;  %v3854_v38 = vld [vmem:[#allocation9 + $0x158] sm:$0xf0] }
 0x149   :  { %2657 = vmatpush.bf16.msra.mxu0 %v3793_v21  ;;  %2637 = vmatpush.bf16.msrb.mxu2 %v4461_v26  ;;  %v4142_v21 = vld [vmem:[#allocation9 + $0x398] sm:$0xf0]  ;;  %v2355_v26 = vpop.f32.mrf.mxu0  ;;  %v3857_v52 = vor.u32 %v5194_v34, %v3854_v38  ;;  %v5306_v38 = vld [vmem:[#allocation9 + $0x4cc] sm:$0xf] }
 0x14a   :  { %2670 = vmatpush.bf16.msra.mxu1 %v3921_v25  ;;  %v3726_v25 = vld [vmem:[#allocation9 + $0x58] sm:$0xf0]  ;;  %v4145_v40 = vor.u32 %v5266_v20, %v4142_v21  ;;  %v5222_v21 = vld [vmem:[#allocation9 + $0x22c] sm:$0xf] }
 0x14b   :  { %4777 = vmatmul.msk.bf16.vlgmr.msrb.gmra.mxu3 %vm5945_vm9, %v5943_v54  ;;  %v3729_v49 = vor.u32 %v5162_v24, %v3726_v25  ;;  %v4446_v20 = vld [vmem:[#allocation9 + $0x5f8] sm:$0xf0]  ;;  %v5254_v25 = vld [vmem:[#allocation9 + $0x32c] sm:$0xf] }
 0x14c   :  { %2695 = vmatpush.bf16.msra.mxu3 %v4193_v42  ;;  %4774 = vmatmul.msk.bf16.vlgmr.msrb.gmra.mxu2 %vm5939_vm8, %v5934_v45  ;;  %v3998_v42 = vld [vmem:[#allocation9 + $0x278] sm:$0xf0] }
 0x14d   :  { %2682 = vmatpush.bf16.msra.mxu2 %v4065_v39  ;;  %2658 = vmatpush.bf16.msra.mxu0 %v3777_v47  ;;  %v2368_v39 = vpop.f32.mrf.mxu1  ;;  %v4126_v47 = vld [vmem:[#allocation9 + $0x378] sm:$0xf0]  ;;  %v4001_v57 = vor.u32 %v5230_v41, %v3998_v42  ;;  %v5338_v42 = vld [vmem:[#allocation9 + $0x5cc] sm:$0xf] }
 0x14e   :  { %2671 = vmatpush.bf16.msra.mxu1 %v3905_v50  ;;  %v3710_v50 = vld [vmem:[#allocation9 + $0x38] sm:$0xf0]  ;;  %v4129_v2 = vor.u32 %v5262_v44, %v4126_v47  ;;  %v6009_v7 = vpop.f32.mrf.mxu3  ;;  %v4449_v39 = vor.u32 %v5342_v18, %v4446_v20  ;;  %v5370_v18 = vld [vmem:[#allocation9 + $0x6cc] sm:$0xf] }
 0x14f   :  { %v6007_v1 = vpop.f32.mrf.mxu2  ;;  %v4094_v26 = vld [vmem:[#allocation9 + $0x338] sm:$0xf0] }
 0x150   :  { %2696 = vmatpush.bf16.msra.mxu3 %v4177_v5  ;;  %v5226_v5 = vld [vmem:[#allocation9 + $0x24c] sm:$0xf]  ;;  %v4302_v41 = vld [vmem:[#allocation9 + $0x4d8] sm:$0xf0]  ;;  %v4097_v47 = vor.u32 %v5254_v25, %v4094_v26 }
 0x151   :  { %2683 = vmatpush.bf16.msra.mxu2 %v4049_v0  ;;  %2659 = vmatpush.bf16.msra.mxu0 %v3761_v9  ;;  %v3838_v0 = vld [vmem:[#allocation9 + $0x138] sm:$0xf0]  ;;  %v3713_v9 = vor.u32 %v5158_v53, %v3710_v50  ;;  %v3985_v17 = vor.u32 %v5226_v5, %v3982_v6  ;;  %v5250_v50 = vld [vmem:[#allocation9 + $0x30c] sm:$0xf]  ;;  %v4305_v5 = vor.u32 %v5306_v38, %v4302_v41 }
 0x152   :  { %2672 = vmatpush.bf16.msra.mxu1 %v3889_v61  ;;  %v5154_v61 = vld [vmem:[#allocation9 + $0xc] sm:$0xf]  ;;  %v3841_v13 = vor.u32 %v5190_v60, %v3838_v0  ;;  %v3950_v53 = vld [vmem:[#allocation9 + $0x218] sm:$0xf0] }
 0x153   :  { %v3697_v24 = vor.u32 %v5154_v61, %v3694_v14  ;;  %v4078_v60 = vld [vmem:[#allocation9 + $0x318] sm:$0xf0]  ;;  %v5374_v0 = vld [vmem:[#allocation9 + $0x6ec] sm:$0xf] }
 0x154   :  { %2697 = vmatpush.bf16.msra.mxu3 %v4161_v8  ;;  %v5310_v8 = vld [vmem:[#allocation9 + $0x4ec] sm:$0xf]  ;;  %v4081_v14 = vor.u32 %v5250_v50, %v4078_v60 }
 0x155   :  { %2684 = vmatpush.bf16.msra.mxu2 %v4033_v15  ;;  %2660 = vmatpush.bf16.msra.mxu0 %v3745_v19  ;;  %v5186_v15 = vld [vmem:[#allocation9 + $0x10c] sm:$0xf]  ;;  %v4113_v19 = vor.u32 %v5258_v10, %v4110_v12  ;;  %v4321_v34 = vor.u32 %v5310_v8, %v4318_v29  ;;  %v6015_v8 = vmul.u32 512, %v5709_v27 }
 0x156   :  { %2673 = vmatpush.bf16.msra.mxu1 %v3873_v23  ;;  %v3966_v23 = vld [vmem:[#allocation9 + $0x238] sm:$0xf0]  ;;  %v5406_v6 = vld [vmem:[#allocation9 + $0x7ec] sm:$0xf] }
 0x157   :  { %v2381_v44 = vpop.f32.mrf.mxu2  ;;  %v5302_v61 = vld [vmem:[#allocation9 + $0x4ac] sm:$0xf]  ;;  %v2773_v55 = vadd.s32 %v6015_v8, %v5711_v28 }
 0x158   :  { %2698 = vmatpush.bf16.msra.mxu3 %v4145_v40  ;;  %v3969_v40 = vor.u32 %v5222_v21, %v3966_v23  ;;  %v5402_v21 = vld [vmem:[#allocation9 + $0x7cc] sm:$0xf]  ;;  %v4686_v23 = vld [vmem:[#allocation9 + $0x7d8] sm:$0xf0] }
 0x159   :  { %2685 = vmatpush.bf16.msra.mxu2 %v4017_v31  ;;  %2661 = vmatpush.bf16.msra.mxu0 %v3729_v49  ;;  %v3825_v31 = vor.u32 %v5186_v15, %v3822_v16  ;;  %v4430_v49 = vld [vmem:[#allocation9 + $0x5d8] sm:$0xf0]  ;;  %v5334_v16 = vld [vmem:[#allocation9 + $0x5ac] sm:$0xf]  ;;  %v2777_v22 = vxor.u32 %v2773_v55, %v5724_v32 }
 0x15a   :  { %2674 = vmatpush.bf16.msra.mxu1 %v3857_v52  ;;  %v5218_v52 = vld [vmem:[#allocation9 + $0x20c] sm:$0xf]  ;;  %v4433_v10 = vor.u32 %v5338_v42, %v4430_v49  ;;  %v4670_v49 = vld [vmem:[#allocation9 + $0x7b8] sm:$0xf0] }
 0x15b   :  { %v3953_v12 = vor.u32 %v5218_v52, %v3950_v53  ;;  %v5330_v26 = vld [vmem:[#allocation9 + $0x58c] sm:$0xf]  ;;  %v4254_v52 = vld [vmem:[#allocation9 + $0x478] sm:$0xf0] }
 0x15c   :  { %2699 = vmatpush.bf16.msra.mxu3 %v4129_v2  ;;  %v4574_v2 = vld [vmem:[#allocation9 + $0x6f8] sm:$0xf0]  ;;  %v5366_v38 = vld [vmem:[#allocation9 + $0x6ac] sm:$0xf] }
 0x15d   :  { %2686 = vmatpush.bf16.msra.mxu2 %v4001_v57  ;;  %2662 = vmatpush.bf16.msra.mxu0 %v3713_v9  ;;  %v2394_v57 = vpop.f32.mrf.mxu3  ;;  %v4702_v9 = vld [vmem:[#allocation9 + $0x7f8] sm:$0xf0]  ;;  %v4577_v15 = vor.u32 %v5374_v0, %v4574_v2  ;;  %v5398_v42 = vld [vmem:[#allocation9 + $0x7ac] sm:$0xf]  ;;  %v2774_v2 = vadd.s32 %v6015_v8, %v5720_v30 }
 0x15e   :  { %2675 = vmatpush.bf16.msra.mxu1 %v3841_v13  ;;  %v4286_v13 = vld [vmem:[#allocation9 + $0x4b8] sm:$0xf0]  ;;  %v4705_v29 = vor.u32 %v5406_v6, %v4702_v9  ;;  %v5326_v50 = vld [vmem:[#allocation9 + $0x56c] sm:$0xf] }
 0x15f   :  { %v4289_v20 = vor.u32 %v5302_v61, %v4286_v13  ;;  %v4382_v57 = vld [vmem:[#allocation9 + $0x578] sm:$0xf0]  ;;  %v5362_v60 = vld [vmem:[#allocation9 + $0x68c] sm:$0xf] }
 0x160   :  { %2700 = vmatpush.bf16.msra.mxu3 %v4113_v19  ;;  %v4558_v19 = vld [vmem:[#allocation9 + $0x6d8] sm:$0xf0]  ;;  %v6038_v6 = vld [vmem:[%s6173_s5] sm:$0xf]  ;;  %v4385_v9 = vor.u32 %v5326_v50, %v4382_v57 }
 0x161   :  { %2687 = vmatpush.bf16.msra.mxu2 %v3985_v17  ;;  %2663 = vmatpush.bf16.msra.mxu0 %v3697_v24  ;;  %v4414_v17 = vld [vmem:[#allocation9 + $0x5b8] sm:$0xf0]  ;;  %v4561_v25 = vor.u32 %v5370_v18, %v4558_v19  ;;  %v5322_v13 = vld [vmem:[#allocation9 + $0x54c] sm:$0xf]  ;;  %v2778_v19 = vxor.u32 %v2774_v2, %v5724_v32 }
 0x162   :  { %2676 = vmatpush.bf16.msra.mxu1 %v3825_v31  ;;  %v4417_v46 = vor.u32 %v5334_v16, %v4414_v17  ;;  %v4270_v24 = vld [vmem:[#allocation9 + $0x498] sm:$0xf0]  ;;  %v5282_v50 = vld [vmem:[#allocation9 + $0x40c] sm:$0xf] }
 0x163   :  { %v4398_v31 = vld [vmem:[#allocation9 + $0x598] sm:$0xf0] }
 0x164   :  { %2701 = vmatpush.bf16.msra.mxu3 %v4097_v47  ;;  %4780 = vmatmul.msk.bf16.vlgmr.msra.gmra.mxu0 %vm5774_vm4, %v5779_v51  ;;  %v5298_v51 = vld [vmem:[#allocation9 + $0x48c] sm:$0xf]  ;;  %v4401_v44 = vor.u32 %v5330_v26, %v4398_v31  ;;  %v4526_v0 = vld [vmem:[#allocation9 + $0x698] sm:$0xf0] }
 0x165   :  { %2708 = vmatpush.bf16.msrb.mxu0 %v4321_v34  ;;  %2688 = vmatpush.bf16.msra.mxu2 %v3969_v40  ;;  %v4689_v34 = vor.u32 %v5402_v21, %v4686_v23  ;;  %v6027_v40 = vpop.f32.mrf.mxu1  ;;  %v4273_v41 = vor.u32 %v5298_v51, %v4270_v24  ;;  %v5294_v47 = vld [vmem:[#allocation9 + $0x46c] sm:$0xf]  ;;  %v4529_v61 = vor.u32 %v5362_v60, %v4526_v0  ;;  %v4510_v18 = vld [vmem:[#allocation9 + $0x678] sm:$0xf0] }
 0x166   :  { %2721 = vmatpush.bf16.msrb.mxu1 %v4449_v39  ;;  %v4542_v39 = vld [vmem:[#allocation9 + $0x6b8] sm:$0xf0]  ;;  %v4257_v36 = vor.u32 %v5294_v47, %v4254_v52  ;;  %v5318_v31 = vld [vmem:[#allocation9 + $0x52c] sm:$0xf] }
 0x167   :  { %4783 = vmatmul.msk.bf16.vlgmr.msra.gmra.mxu1 %vm5784_vm5, %v5788_v59  ;;  %v6022_v59 = vpop.f32.mrf.mxu0  ;;  %v4545_v53 = vor.u32 %v5366_v38, %v4542_v39  ;;  %v4638_v51 = vld [vmem:[#allocation9 + $0x778] sm:$0xf0]  ;;  %v5354_v38 = vld [vmem:[#allocation9 + $0x64c] sm:$0xf] }
 0x168   :  { %2702 = vmatpush.bf16.msra.mxu3 %v4081_v14  ;;  %v4366_v14 = vld [vmem:[#allocation9 + $0x558] sm:$0xf0]  ;;  %v5314_v0 = vld [vmem:[#allocation9 + $0x50c] sm:$0xf] }
 0x169   :  { %2709 = vmatpush.bf16.msrb.mxu0 %v4305_v5  ;;  %2689 = vmatpush.bf16.msra.mxu2 %v3953_v12  ;;  %v4654_v5 = vld [vmem:[#allocation9 + $0x798] sm:$0xf0]  ;;  %v4369_v24 = vor.u32 %v5322_v13, %v4366_v14  ;;  %v5350_v14 = vld [vmem:[#allocation9 + $0x62c] sm:$0xf] }
 0x16a   :  { %2722 = vmatpush.bf16.msrb.mxu1 %v4433_v10  ;;  %v5290_v10 = vld [vmem:[#allocation9 + $0x44c] sm:$0xf]  ;;  %v4238_v12 = vld [vmem:[#allocation9 + $0x458] sm:$0xf0] }
 0x16b   :  { %4789 = vmatmul.msk.bf16.vlgmr.msra.gmra.mxu3 %vm5816_vm11, %v5822_v43  ;;  %v5394_v43 = vld [vmem:[#allocation9 + $0x78c] sm:$0xf]  ;;  %v4241_v23 = vor.u32 %v5290_v10, %v4238_v12  ;;  %v4222_v26 = vld [vmem:[#allocation9 + $0x438] sm:$0xf0]  ;;  %v5440_v10 = vld [vmem:[#allocation11 + $0xf4] sm:$0xf0] }
 0x16c   :  { %2747 = vmatpush.bf16.msrb.mxu3 %v4705_v29  ;;  %4786 = vmatmul.msk.bf16.vlgmr.msra.gmra.mxu2 %vm5804_vm10, %v5811_v33  ;;  %v4673_v33 = vor.u32 %v5398_v42, %v4670_v49  ;;  %v4657_v17 = vor.u32 %v5394_v43, %v4654_v5  ;;  %v5358_v29 = vld [vmem:[#allocation9 + $0x66c] sm:$0xf]  ;;  %v4494_v42 = vld [vmem:[#allocation9 + $0x658] sm:$0xf0]  ;;  %v5424_v5 = vld [vmem:[#allocation11 + $0x74] sm:$0xf0] }
 0x16d   :  { %2734 = vmatpush.bf16.msrb.mxu2 %v4577_v15  ;;  %2710 = vmatpush.bf16.msrb.mxu0 %v4289_v20  ;;  %v2781_v15 = vxor.u32 198677718, %v2777_v22  ;;  %v1056_v20 = vperm.slane %v6038_v6, 0  ;;  %v2420_v21 = vpop.f32.mrf.mxu1  ;;  %v4513_v55 = vor.u32 %v5358_v29, %v4510_v18  ;;  %v5386_v49 = vld [vmem:[#allocation9 + $0x74c] sm:$0xf]  ;;  %v4497_v43 = vor.u32 %v5354_v38, %v4494_v42 }
 0x16e   :  { %2723 = vmatpush.bf16.msrb.mxu1 %v4417_v46  ;;  %v5390_v46 = vld [vmem:[#allocation9 + $0x76c] sm:$0xf]  ;;  %v6042_v47 = vpop.f32.mrf.mxu2  ;;  %v4206_v57 = vld [vmem:[#allocation9 + $0x418] sm:$0xf0] }
 0x16f   :  { %v2407_v16 = vpop.f32.mrf.mxu0  ;;  %v2785_v39 = vshrl.u32 %v2781_v15, 16  ;;  %v2354_v22 = vadd.f32 %v5997_v63, %v1056_v20  ;;  %v4334_v2 = vld [vmem:[#allocation9 + $0x518] sm:$0xf0]  ;;  %v4209_v29 = vor.u32 %v5282_v50, %v4206_v57  ;;  %v5382_v18 = vld [vmem:[#allocation9 + $0x72c] sm:$0xf]  ;;  %v1057_v50 = vperm.slane %v6038_v6, 1 }
 0x170   :  { %2748 = vmatpush.bf16.msrb.mxu3 %v4689_v34  ;;  %v4350_v34 = vld [vmem:[#allocation9 + $0x538] sm:$0xf0]  ;;  %v4337_v21 = vor.u32 %v5314_v0, %v4334_v2  ;;  %v5346_v38 = vld [vmem:[#allocation9 + $0x60c] sm:$0xf] }
 0x171   :  { %2735 = vmatpush.bf16.msrb.mxu2 %v4561_v25  ;;  %2711 = vmatpush.bf16.msrb.mxu0 %v4273_v41  ;;  %v5286_v25 = vld [vmem:[#allocation9 + $0x42c] sm:$0xf]  ;;  %v4641_v41 = vor.u32 %v5390_v46, %v4638_v51  ;;  %v4353_v60 = vor.u32 %v5318_v31, %v4350_v34  ;;  %v6047_v12 = vxor.u32 %v2785_v39, %v2781_v15  ;;  %v4478_v16 = vld [vmem:[#allocation9 + $0x638] sm:$0xf0]  ;;  %v4856_v46 = vld [vmem:[#allocation11 + $0x60] sm:$0xf] }
 0x172   :  { %2724 = vmatpush.bf16.msrb.mxu1 %v4401_v44  ;;  %v2782_v44 = vxor.u32 198677718, %v2778_v19  ;;  %v4225_v52 = vor.u32 %v5286_v25, %v4222_v26  ;;  %v4606_v19 = vld [vmem:[#allocation9 + $0x738] sm:$0xf0]  ;;  %v2367_v20 = vadd.f32 %v5999_v4, %v2354_v22  ;;  %v4481_v51 = vor.u32 %v5350_v14, %v4478_v16  ;;  %v4920_v25 = vld [vmem:[#allocation11 + $0xe0] sm:$0xf] }
 0x173   :  { %v2793_v26 = vmul.u32 2146121005, %v6047_v12  ;;  %v5438_v34 = vld [vmem:[#allocation11 + $0xe4] sm:$0xf0]  ;;  %v4462_v39 = vld [vmem:[#allocation9 + $0x618] sm:$0xf0] }
 0x174   :  { %2749 = vmatpush.bf16.msrb.mxu3 %v4673_v33  ;;  %v6045_v33 = vpop.f32.mrf.mxu3  ;;  %v2786_v63 = vshrl.u32 %v2782_v44, 16  ;;  %v2380_v31 = vadd.f32 %v6007_v1, %v2367_v20  ;;  %v5378_v42 = vld [vmem:[#allocation9 + $0x70c] sm:$0xf]  ;;  %v4921_v57 = vor.u32 %v5438_v34, %v4920_v25  ;;  %v4465_v1 = vor.u32 %v5346_v38, %v4462_v39  ;;  %v4848_v22 = vld [vmem:[#allocation11 + $0x50] sm:$0xf] }
 0x175   :  { %2736 = vmatpush.bf16.msrb.mxu2 %v4545_v53  ;;  %2712 = vmatpush.bf16.msrb.mxu0 %v4257_v36  ;;  %v4622_v53 = vld [vmem:[#allocation9 + $0x758] sm:$0xf0]  ;;  %v4864_v36 = vld [vmem:[#allocation11 + $0x70] sm:$0xf]  ;;  %v2797_v0 = vshrl.u32 %v2793_v26, 15 }
 0x176   :  { %2725 = vmatpush.bf16.msrb.mxu1 %v4385_v9  ;;  %v4928_v9 = vld [vmem:[#allocation11 + $0xf0] sm:$0xf]  ;;  %v4625_v13 = vor.u32 %v5386_v49, %v4622_v53  ;;  %v2433_v4 = vpop.f32.mrf.mxu2  ;;  %v4590_v49 = vld [vmem:[#allocation9 + $0x718] sm:$0xf0]  ;;  %v2393_v2 = vadd.f32 %v6009_v7, %v2380_v31  ;;  %v4824_v31 = vld [vmem:[#allocation11 + $0x20] sm:$0xf] }
 0x177   :  { %v4929_v15 = vor.u32 %v5440_v10, %v4928_v9  ;;  %v2801_v16 = vxor.u32 %v2797_v0, %v2793_v26  ;;  %v4888_v34 = vld [vmem:[#allocation11 + $0xa0] sm:$0xf]  ;;  %v5430_v38 = vld [vmem:[#allocation11 + $0xa4] sm:$0xf0]  ;;  %v4992_v4 = vld [vmem:[#allocation11 + $0x170] sm:$0xf] }
 0x178   :  { %2750 = vmatpush.bf16.msrb.mxu3 %v4657_v17  ;;  %v6049_v17 = vpop.f32.mrf.mxu1  ;;  %v2406_v12 = vadd.f32 %v6022_v59, %v2393_v2  ;;  %v5428_v2 = vld [vmem:[#allocation11 + $0x94] sm:$0xf0] }
 0x179   :  { %2737 = vmatpush.bf16.msrb.mxu2 %v4529_v61  ;;  %2713 = vmatpush.bf16.msrb.mxu0 %v4241_v23  ;;  %v2457_v61 = vpop.f32.mrf.mxu0  ;;  %v4865_v23 = vor.u32 %v5424_v5, %v4864_v36  ;;  %v4593_v36 = vor.u32 %v5378_v42, %v4590_v49  ;;  %v5436_v5 = vld [vmem:[#allocation11 + $0xd4] sm:$0xf0] }
 0x17a   :  { %2726 = vmatpush.bf16.msrb.mxu1 %v4369_v24  ;;  %v5422_v24 = vld [vmem:[#allocation11 + $0x64] sm:$0xf0]  ;;  %v2458_v7 = vadd.f32 %v2457_v61, %v1057_v50  ;;  %v2419_v58 = vadd.f32 %v6027_v40, %v2406_v12  ;;  %v5456_v42 = vld [vmem:[#allocation11 + $0x174] sm:$0xf0]  ;;  %v4889_v50 = vor.u32 %v5430_v38, %v4888_v34  ;;  %v4808_v12 = vld [vmem:[#allocation11] sm:$0xf] }
 0x17b   :  { %v4857_v53 = vor.u32 %v5422_v24, %v4856_v46  ;;  %v2805_v46 = vmul.u32 2221713035, %v2801_v16  ;;  %v4968_v34 = vld [vmem:[#allocation11 + $0x140] sm:$0xf]  ;;  %v5450_v38 = vld [vmem:[#allocation11 + $0x144] sm:$0xf0] }
 0x17c   :  { %2751 = vmatpush.bf16.msrb.mxu3 %v4641_v41  ;;  %v2790_v41 = vxor.u32 %v2786_v63, %v2782_v44  ;;  %v4904_v63 = vld [vmem:[#allocation11 + $0xc0] sm:$0xf]  ;;  %v2471_v61 = vadd.f32 %v6049_v17, %v2458_v7  ;;  %v2432_v40 = vadd.f32 %v6042_v47, %v2419_v58 }
 0x17d   :  { %2738 = vmatpush.bf16.msrb.mxu2 %v4513_v55  ;;  %2714 = vmatpush.bf16.msrb.mxu0 %v4225_v52  ;;  %v4609_v55 = vor.u32 %v5382_v18, %v4606_v19  ;;  %v2446_v52 = vpop.f32.mrf.mxu3 }
 0x17e   :  { %2727 = vmatpush.bf16.msrb.mxu1 %v4353_v60  ;;  %v5420_v60 = vld [vmem:[#allocation11 + $0x54] sm:$0xf0]  ;;  %v2794_v9 = vmul.u32 2146121005, %v2790_v41  ;;  %v2483_v19 = vpop.f32.mrf.mxu2  ;;  %v4825_v52 = vor.u32 %v5414_v56, %v4824_v31  ;;  %v5437_v31 = vld [vmem:[#allocation11 + $0xe4] sm:$0xf] }
 0x17f   :  { %v2484_v48 = vadd.f32 %v2483_v19, %v2471_v61  ;;  %v5439_v19 = vld [vmem:[#allocation11 + $0xf4] sm:$0xf]  ;;  %v4976_v61 = vld [vmem:[#allocation11 + $0x150] sm:$0xf] }
 0x180   :  { %2752 = vmatpush.bf16.msrb.mxu3 %v4625_v13  ;;  %v2472_v10 = vpop.f32.mrf.mxu1  ;;  %v4849_v13 = vor.u32 %v5420_v60, %v4848_v22  ;;  %v2798_v18 = vshrl.u32 %v2794_v9, 15  ;;  %v4880_v22 = vld [vmem:[#allocation11 + $0x90] sm:$0xf] }
 0x181   :  { %2739 = vmatpush.bf16.msrb.mxu2 %v4497_v43  ;;  %2715 = vmatpush.bf16.msrb.mxu0 %v4209_v29  ;;  %v2459_v44 = vpop.f32.mrf.mxu0  ;;  %v4912_v43 = vld [vmem:[#allocation11 + $0xd0] sm:$0xf]  ;;  %v5434_v29 = vld [vmem:[#allocation11 + $0xc4] sm:$0xf0] }
 0x182   :  { %2728 = vmatpush.bf16.msrb.mxu1 %v4337_v21  ;;  %v4913_v14 = vor.u32 %v5436_v5, %v4912_v43  ;;  %v4905_v20 = vor.u32 %v5434_v29, %v4904_v63  ;;  %v4832_v21 = vld [vmem:[#allocation11 + $0x30] sm:$0xf]  ;;  %v2802_v24 = vxor.u32 %v2798_v18, %v2794_v9  ;;  %v4984_v43 = vld [vmem:[#allocation11 + $0x160] sm:$0xf]  ;;  %v5454_v5 = vld [vmem:[#allocation11 + $0x164] sm:$0xf0] }
 0x183   :  { %v4985_v7 = vor.u32 %v5454_v5, %v4984_v43  ;;  %v5423_v29 = vld [vmem:[#allocation11 + $0x74] sm:$0xf]  ;;  %v4866_v18 = vld [vmem:[#allocation11 + $0x78] sm:$0xf0] }
 0x184   :  { %2753 = vmatpush.bf16.msrb.mxu3 %v4609_v55  ;;  %4792 = vmatmul.msk.bf16.vlgmr.msrb.gmra.mxu0 %vm5905_vm0, %v5898_v62  ;;  %v5418_v62 = vld [vmem:[#allocation11 + $0x44] sm:$0xf0]  ;;  %v2445_v55 = vadd.f32 %v6045_v33, %v2432_v40  ;;  %v2806_v39 = vmul.u32 2221713035, %v2802_v24 }
 0x185   :  { %3231 = vmatpush.bf16.msra.mxu0 %v4865_v23  ;;  %2740 = vmatpush.bf16.msrb.mxu2 %v4481_v51  ;;  %v4841_v59 = vor.u32 %v5418_v62, %v4840_v3  ;;  %v5416_v23 = vld [vmem:[#allocation11 + $0x34] sm:$0xf0]  ;;  %v4872_v3 = vld [vmem:[#allocation11 + $0x80] sm:$0xf]  ;;  %v5426_v62 = vld [vmem:[#allocation11 + $0x84] sm:$0xf0] }
 0x186   :  { %3244 = vmatpush.bf16.msra.mxu1 %v4929_v15  ;;  %v4896_v15 = vld [vmem:[#allocation11 + $0xb0] sm:$0xf]  ;;  %v5432_v51 = vld [vmem:[#allocation11 + $0xb4] sm:$0xf0]  ;;  %v4833_v26 = vor.u32 %v5416_v23, %v4832_v21  ;;  %v2485_v47 = vpop.f32.mrf.mxu2  ;;  %v2764_v0 = vmul.f32 0.2, %v2445_v55  ;;  %v4873_v40 = vor.u32 %v5426_v62, %v4872_v3 }
 0x187   :  { %4795 = vmatmul.msk.bf16.vlgmr.msrb.gmra.mxu1 %vm5916_vm1, %v5911_v11  ;;  %v2496_v11 = vpop.f32.mrf.mxu3  ;;  %v4897_v17 = vor.u32 %v5432_v51, %v4896_v15  ;;  %v2810_v33 = vshrl.u32 %v2806_v39, 16  ;;  %vm2760_vm4 = vcmp.ge.f32.partialorder %v2445_v55, 0.0 }
 0x188   :  { %2754 = vmatpush.bf16.msrb.mxu3 %v4593_v36  ;;  %v2522_v25 = vpop.f32.mrf.mxu1  ;;  %v2497_v41 = vadd.f32 %v2496_v11, %v2484_v48  ;;  %v2768_v63 = vsel %vm2760_vm4, %v2445_v55, %v2764_v0  ;;  %v4869_v48 = vor.u32 %v5423_v29, %v4866_v18  ;;  %v4922_v55 = vld [vmem:[#allocation11 + $0xe8] sm:$0xf0]  ;;  %v4834_v29 = vld [vmem:[#allocation11 + $0x38] sm:$0xf0]  ;;  %v5431_v18 = vld [vmem:[#allocation11 + $0xb4] sm:$0xf] }
 0x189   :  { %3232 = vmatpush.bf16.msra.mxu0 %v4857_v53  ;;  %2741 = vmatpush.bf16.msrb.mxu2 %v4465_v1  ;;  %v4993_v53 = vor.u32 %v5456_v42, %v4992_v4  ;;  %v5412_v1 = vld [vmem:[#allocation11 + $0x14] sm:$0xf0]  ;;  %v2814_v58 = vxor.u32 %v2810_v33, %v2806_v39  ;;  %v2829_v51 = vmul.f32 1.4285715, %v2768_v63  ;;  %v5419_v39 = vld [vmem:[#allocation11 + $0x54] sm:$0xf] }
 0x18a   :  { %3245 = vmatpush.bf16.msra.mxu1 %v4921_v57  ;;  %v4816_v57 = vld [vmem:[#allocation11 + $0x10] sm:$0xf]  ;;  %v5415_v63 = vld [vmem:[#allocation11 + $0x34] sm:$0xf] }
 0x18b   :  { %4801 = vmatmul.msk.bf16.vlgmr.msrb.gmra.mxu3 %vm5945_vm9, %v5943_v54  ;;  %v2809_v54 = vshrl.u32 %v2805_v46, 16  ;;  %v4817_v10 = vor.u32 %v5412_v1, %v4816_v57  ;;  %v4803_v56 = vxor.u32 2147483648, %v2814_v58  ;;  %v6081_v47 = vpack.c.bf16 %v2829_v51, %v2829_v51  ;;  %v5448_v57 = vld [vmem:[#allocation11 + $0x134] sm:$0xf0]  ;;  %v4944_v58 = vld [vmem:[#allocation11 + $0x110] sm:$0xf] }
 0x18c   :  { %4798 = vmatmul.msk.bf16.vlgmr.msrb.gmra.mxu2 %vm5939_vm8, %v5934_v45  ;;  %v2509_v45 = vpop.f32.mrf.mxu0  ;;  %v5429_v51 = vld [vmem:[#allocation11 + $0xa4] sm:$0xf] }
 0x18d   :  { %3233 = vmatpush.bf16.msra.mxu0 %v4849_v13  ;;  %v2813_v60 = vxor.u32 %v2809_v54, %v2805_v46  ;;  %3257 = vmatpush.bf16.msra.mxu2 %v4993_v53  ;;  %v2510_v44 = vadd.f32 %v2509_v45, %v2497_v41  ;;  %v5410_v13 = vld [vmem:[#allocation11 + $0x4] sm:$0xf0]  ;;  %v4969_v41 = vor.u32 %v5450_v38, %v4968_v34  ;;  %vm6083_vm12 = vcmp.ge.s32.totalorder %v4803_v56, 3435973836  ;;  %v5411_v34 = vld [vmem:[#allocation11 + $0x14] sm:$0xf] }
 0x18e   :  { %3246 = vmatpush.bf16.msra.mxu1 %v4913_v14  ;;  %v4881_v14 = vor.u32 %v5428_v2, %v4880_v22  ;;  %v4809_v46 = vor.u32 %v5410_v13, %v4808_v12  ;;  %v5435_v22 = vld [vmem:[#allocation11 + $0xd4] sm:$0xf]  ;;  %vm5065_vm13 = vmpackc.low %vm6083_vm12, %vm6083_vm12  ;;  %v5433_v12 = vld [vmem:[#allocation11 + $0xc4] sm:$0xf] }
 0x18f   :  { %v2498_v49 = vpop.f32.mrf.mxu3  ;;  %v4802_v16 = vxor.u32 2147483648, %v2813_v60  ;;  %v2523_v11 = vadd.f32 %v2522_v25, %v2510_v44  ;;  %v2535_v21 = vpop.f32.mrf.mxu2  ;;  %v4858_v25 = vld [vmem:[#allocation11 + $0x68] sm:$0xf0]  ;;  %v4914_v60 = vld [vmem:[#allocation11 + $0xd8] sm:$0xf0] }
 0x190   :  { %v2524_v9 = vpop.f32.mrf.mxu1  ;;  %v4960_v49 = vld [vmem:[#allocation11 + $0x130] sm:$0xf]  ;;  %v4917_v5 = vor.u32 %v5435_v22, %v4914_v60  ;;  %v4906_v13 = vld [vmem:[#allocation11 + $0xc8] sm:$0xf0]  ;;  %v4818_v38 = vld [vmem:[#allocation11 + $0x18] sm:$0xf0] }
 0x191   :  { %3234 = vmatpush.bf16.msra.mxu0 %v4841_v59  ;;  %3258 = vmatpush.bf16.msra.mxu2 %v4985_v7  ;;  %v4930_v59 = vld [vmem:[#allocation11 + $0xf8] sm:$0xf0]  ;;  %v2536_v24 = vadd.f32 %v2535_v21, %v2523_v11  ;;  %vm6074_vm5 = vcmp.ge.s32.totalorder %v4802_v16, 3435973836  ;;  %v4961_v0 = vor.u32 %v5448_v57, %v4960_v49  ;;  %v5417_v9 = vld [vmem:[#allocation11 + $0x44] sm:$0xf]  ;;  %v4909_v16 = vor.u32 %v5433_v12, %v4906_v13 }
 0x192   :  { %3247 = vmatpush.bf16.msra.mxu1 %v4905_v20  ;;  %v5452_v20 = vld [vmem:[#allocation11 + $0x154] sm:$0xf0]  ;;  %vm5062_vm10 = vmpackc.low %vm6074_vm5, %vm6074_vm5  ;;  %v4952_v7 = vld [vmem:[#allocation11 + $0x120] sm:$0xf]  ;;  %v4821_v57 = vor.u32 %v5411_v34, %v4818_v38 }
 0x193   :  { %v4977_v15 = vor.u32 %v5452_v20, %v4976_v61  ;;  %v5444_v11 = vld [vmem:[#allocation11 + $0x114] sm:$0xf0]  ;;  %v5453_v49 = vld [vmem:[#allocation11 + $0x164] sm:$0xf] }
 0x194   :  { %v2511_v36 = vpop.f32.mrf.mxu0  ;;  %v4945_v20 = vor.u32 %v5444_v11, %v4944_v58  ;;  %v5409_v60 = vld [vmem:[#allocation11 + $0x4] sm:$0xf]  ;;  %v4962_v58 = vld [vmem:[#allocation11 + $0x138] sm:$0xf0] }
 0x195   :  { %3235 = vmatpush.bf16.msra.mxu0 %v4833_v26  ;;  %v5421_v26 = vld [vmem:[#allocation11 + $0x64] sm:$0xf]  ;;  %3259 = vmatpush.bf16.msra.mxu2 %v4977_v15  ;;  %v4826_v15 = vld [vmem:[#allocation11 + $0x28] sm:$0xf0] }
 0x196   :  { %3248 = vmatpush.bf16.msra.mxu1 %v4897_v17  ;;  %v4933_v17 = vor.u32 %v5439_v19, %v4930_v59  ;;  %v4861_v42 = vor.u32 %v5421_v26, %v4858_v25  ;;  %v4898_v19 = vld [vmem:[#allocation11 + $0xb8] sm:$0xf0]  ;;  %v2775_v59 = vadd.s32 %v6015_v8, %v5730_v35  ;;  %v5442_v26 = vld [vmem:[#allocation11 + $0x104] sm:$0xf0]  ;;  %v5455_v35 = vld [vmem:[#allocation11 + $0x174] sm:$0xf] }
 0x197   :  { %v2548_v23 = vpop.f32.mrf.mxu3  ;;  %v2537_v33 = vpop.f32.mrf.mxu2 }
 0x198   :  { %v2549_v54 = vadd.f32 %v2548_v23, %v2536_v24  ;;  %v4837_v23 = vor.u32 %v5415_v63, %v4834_v29  ;;  %v4890_v24 = vld [vmem:[#allocation11 + $0xa8] sm:$0xf0]  ;;  %v1058_v29 = vperm.slane %v6038_v6, 2 }
 0x199   :  { %3236 = vmatpush.bf16.msra.mxu0 %v4825_v52  ;;  %v4925_v52 = vor.u32 %v5437_v31, %v4922_v55  ;;  %3260 = vmatpush.bf16.msra.mxu2 %v4969_v41  ;;  %v4994_v31 = vld [vmem:[#allocation11 + $0x178] sm:$0xf0]  ;;  %v4893_v55 = vor.u32 %v5429_v51, %v4890_v24  ;;  %v4874_v33 = vld [vmem:[#allocation11 + $0x88] sm:$0xf0]  ;;  %v5443_v51 = vld [vmem:[#allocation11 + $0x114] sm:$0xf] }
 0x19a   :  { %3249 = vmatpush.bf16.msra.mxu1 %v4889_v50  ;;  %vm2761_vm11 = vcmp.ge.f32.partialorder %v2549_v54, 0.0  ;;  %v2765_v4 = vmul.f32 0.2, %v2549_v54  ;;  %v4850_v50 = vld [vmem:[#allocation11 + $0x58] sm:$0xf0] }
 0x19b   :  { %v4853_v36 = vor.u32 %v5419_v39, %v4850_v50  ;;  %v5427_v39 = vld [vmem:[#allocation11 + $0x94] sm:$0xf]  ;;  %v4882_v41 = vld [vmem:[#allocation11 + $0x98] sm:$0xf0] }
 0x19c   :  { %v2769_v1 = vsel %vm2761_vm11, %v2549_v54, %v2765_v4  ;;  %v4997_v54 = vor.u32 %v5455_v35, %v4994_v31  ;;  %v4885_v22 = vor.u32 %v5427_v39, %v4882_v41  ;;  %v4946_v24 = vld [vmem:[#allocation11 + $0x118] sm:$0xf0]  ;;  %v4938_v35 = vld [vmem:[#allocation11 + $0x108] sm:$0xf0]  ;;  %v5048_v39 = vld [vmem:[#allocation11 + $0x1e0] sm:$0xf] }
 0x19d   :  { %3237 = vmatpush.bf16.msra.mxu0 %v4817_v10  ;;  %v2830_v2 = vmul.f32 1.4285715, %v2769_v1  ;;  %v4842_v10 = vld [vmem:[#allocation11 + $0x48] sm:$0xf0]  ;;  %3261 = vmatpush.bf16.msra.mxu2 %v4961_v0  ;;  %v5470_v41 = vld [vmem:[#allocation11 + $0x1e4] sm:$0xf0] }
 0x19e   :  { %3250 = vmatpush.bf16.msra.mxu1 %v4881_v14  ;;  %v5446_v14 = vld [vmem:[#allocation11 + $0x124] sm:$0xf0]  ;;  %v4845_v62 = vor.u32 %v5417_v9, %v4842_v10  ;;  %v4810_v0 = vld [vmem:[#allocation11 + $0x8] sm:$0xf0]  ;;  %v4978_v9 = vld [vmem:[#allocation11 + $0x158] sm:$0xf0] }
 0x19f   :  { %v2550_v44 = vpop.f32.mrf.mxu3  ;;  %v6096_v43 = vpack.c.bf16 %v2830_v2, %v2830_v2  ;;  %v4953_v3 = vor.u32 %v5446_v14, %v4952_v7  ;;  %v5425_v2 = vld [vmem:[#allocation11 + $0x84] sm:$0xf]  ;;  %v4813_v12 = vor.u32 %v5409_v60, %v4810_v0  ;;  %vm3409_vm11 = vcmask 7168  }
 0x1a0   :  { %v4877_v7 = vor.u32 %v5425_v2, %v4874_v33 }
 0x1a1   :  { %3238 = vmatpush.bf16.msra.mxu0 %v4809_v46  ;;  %3262 = vmatpush.bf16.msra.mxu2 %v4953_v3  ;;  %v6106_v61 = vpop.f32.mrf.mxu0  ;;  %v4901_v46 = vor.u32 %v5431_v18, %v4898_v19  ;;  %v5449_v3 = vld [vmem:[#allocation11 + $0x144] sm:$0xf]  ;;  %v5447_v19 = vld [vmem:[#allocation11 + $0x134] sm:$0xf] }
 0x1a2   :  { %3251 = vmatpush.bf16.msra.mxu1 %v4873_v40  ;;  %v5413_v40 = vld [vmem:[#allocation11 + $0x24] sm:$0xf] }
 0x1a3   :  { %v4829_v56 = vor.u32 %v5413_v40, %v4826_v15  ;;  %v4954_v40 = vld [vmem:[#allocation11 + $0x128] sm:$0xf0] }
 0x1a4   :  { %5064 = vmatmul.msk.bf16.vlgmr.msra.gmra.mxu0 %vm5062_vm10, %v6081_v47  ;;  %v6108_v21 = vpop.f32.mrf.mxu1 }
 0x1a5   :  { %3283 = vmatpush.bf16.msrb.mxu0 %v4869_v48  ;;  %5067 = vmatmul.msk.bf16.vlgmr.msra.gmra.mxu1 %vm5065_vm13, %v6096_v43  ;;  %v4936_v48 = vld [vmem:[#allocation11 + $0x100] sm:$0xf] }
 0x1a6   :  { %3296 = vmatpush.bf16.msrb.mxu1 %v4933_v17  ;;  %3263 = vmatpush.bf16.msra.mxu2 %v4945_v20  ;;  %v2779_v17 = vxor.u32 %v2775_v59, %v5724_v32  ;;  %v4937_v25 = vor.u32 %v5442_v26, %v4936_v48  ;;  %v4965_v59 = vor.u32 %v5447_v19, %v4962_v58  ;;  %v5008_v58 = vld [vmem:[#allocation11 + $0x190] sm:$0xf] }
 0x1a7   :  { %v4949_v26 = vor.u32 %v5443_v51, %v4946_v24  ;;  %v5471_v51 = vld [vmem:[#allocation11 + $0x1f4] sm:$0xf]  ;;  %v5058_v24 = vld [vmem:[#allocation11 + $0x1f8] sm:$0xf0] }
 0x1a8   :  { %v2783_v4 = vxor.u32 198677718, %v2779_v17 }
 0x1a9   :  { %3284 = vmatpush.bf16.msrb.mxu0 %v4861_v42  ;;  %v2563_v42 = vpop.f32.mrf.mxu0 }
 0x1aa   :  { %3297 = vmatpush.bf16.msrb.mxu1 %v4925_v52  ;;  %3264 = vmatpush.bf16.msra.mxu2 %v4937_v25  ;;  %v4986_v52 = vld [vmem:[#allocation11 + $0x168] sm:$0xf0]  ;;  %v2787_v44 = vshrl.u32 %v2783_v4, 16  ;;  %v5049_v42 = vor.u32 %v5470_v41, %v5048_v39  ;;  %v1059_v41 = vperm.slane %v6038_v6, 3 }
 0x1ab   :  { %v4989_v1 = vor.u32 %v5453_v49, %v4986_v52 }
 0x1ac   :  { %v2576_v50 = vpop.f32.mrf.mxu1  ;;  %v2791_v14 = vxor.u32 %v2787_v44, %v2783_v4  ;;  %v5032_v44 = vld [vmem:[#allocation11 + $0x1c0] sm:$0xf] }
 0x1ad   :  { %3285 = vmatpush.bf16.msrb.mxu0 %v4853_v36 }
 0x1ae   :  { %3298 = vmatpush.bf16.msrb.mxu1 %v4917_v5  ;;  %3309 = vmatpush.bf16.msrb.mxu2 %v4997_v54  ;;  %v5451_v5 = vld [vmem:[#allocation11 + $0x154] sm:$0xf]  ;;  %v2600_v10 = vpop.f32.mrf.mxu3  ;;  %v2795_v63 = vmul.u32 2146121005, %v2791_v14 }
 0x1af   :  { %v2587_v36 = vpop.f32.mrf.mxu2  ;;  %v4981_v13 = vor.u32 %v5451_v5, %v4978_v9 }
 0x1b0   :  { %v2799_v20 = vshrl.u32 %v2795_v63, 15 }
 0x1b1   :  { %3286 = vmatpush.bf16.msrb.mxu0 %v4845_v62  ;;  %v4970_v62 = vld [vmem:[#allocation11 + $0x148] sm:$0xf0] }
 0x1b2   :  { %3299 = vmatpush.bf16.msrb.mxu1 %v4909_v16  ;;  %3310 = vmatpush.bf16.msrb.mxu2 %v4989_v1  ;;  %v4973_v16 = vor.u32 %v5449_v3, %v4970_v62  ;;  %v2803_v15 = vxor.u32 %v2799_v20, %v2795_v63  ;;  %v5468_v1 = vld [vmem:[#allocation11 + $0x1d4] sm:$0xf0] }
 0x1b4   :  { %v2807_v25 = vmul.u32 2221713035, %v2803_v15 }
 0x1b5   :  { %3287 = vmatpush.bf16.msrb.mxu0 %v4837_v23  ;;  %v2562_v23 = vadd.f32 %v6106_v61, %v1058_v29  ;;  %v5472_v61 = vld [vmem:[#allocation11 + $0x1f4] sm:$0xf0]  ;;  %v5016_v29 = vld [vmem:[#allocation11 + $0x1a0] sm:$0xf] }
 0x1b6   :  { %3300 = vmatpush.bf16.msrb.mxu1 %v4901_v46  ;;  %3311 = vmatpush.bf16.msrb.mxu2 %v4981_v13  ;;  %v2602_v11 = vpop.f32.mrf.mxu3  ;;  %v5445_v46 = vld [vmem:[#allocation11 + $0x124] sm:$0xf]  ;;  %v2811_v34 = vshrl.u32 %v2807_v25, 16  ;;  %v5464_v13 = vld [vmem:[#allocation11 + $0x1b4] sm:$0xf0] }
 0x1b7   :  { %v2589_v18 = vpop.f32.mrf.mxu2  ;;  %v4957_v45 = vor.u32 %v5445_v46, %v4954_v40  ;;  %v5460_v11 = vld [vmem:[#allocation11 + $0x194] sm:$0xf0]  ;;  %v5000_v40 = vld [vmem:[#allocation11 + $0x180] sm:$0xf] }
 0x1b8   :  { %v2815_v49 = vxor.u32 %v2811_v34, %v2807_v25  ;;  %v5462_v18 = vld [vmem:[#allocation11 + $0x1a4] sm:$0xf0]  ;;  %v5050_v25 = vld [vmem:[#allocation11 + $0x1e8] sm:$0xf0]  ;;  %v5465_v34 = vld [vmem:[#allocation11 + $0x1c4] sm:$0xf] }
 0x1b9   :  { %3288 = vmatpush.bf16.msrb.mxu0 %v4829_v56  ;;  %v5056_v56 = vld [vmem:[#allocation11 + $0x1f0] sm:$0xf]  ;;  %v5017_v19 = vor.u32 %v5462_v18, %v5016_v29 }
 0x1ba   :  { %3301 = vmatpush.bf16.msrb.mxu1 %v4893_v55  ;;  %3312 = vmatpush.bf16.msrb.mxu2 %v4973_v16  ;;  %v5057_v55 = vor.u32 %v5472_v61, %v5056_v56  ;;  %v4804_v2 = vxor.u32 2147483648, %v2815_v49  ;;  %v5042_v56 = vld [vmem:[#allocation11 + $0x1d8] sm:$0xf0] }
 0x1bb   :  { %v5026_v49 = vld [vmem:[#allocation11 + $0x1b8] sm:$0xf0] }
 0x1bc   :  { %3270 = vmatpush.bf16.msra.mxu3 %v5057_v55  ;;  %vm6126_vm15 = vcmp.ge.s32.totalorder %v4804_v2, 3435973836 }
 0x1bd   :  { %3289 = vmatpush.bf16.msrb.mxu0 %v4821_v57  ;;  %v5040_v57 = vld [vmem:[#allocation11 + $0x1d0] sm:$0xf]  ;;  %vm5068_vm0 = vmpackc.low %vm6126_vm15, %vm6126_vm15 }
 0x1be   :  { %3302 = vmatpush.bf16.msrb.mxu1 %v4885_v22  ;;  %3313 = vmatpush.bf16.msrb.mxu2 %v4965_v59  ;;  %v5041_v0 = vor.u32 %v5468_v1, %v5040_v57  ;;  %v2776_v59 = vadd.s32 %v6015_v8, %v5734_v37 }
 0x1c0   :  { %3271 = vmatpush.bf16.msra.mxu3 %v5049_v42  ;;  %v2780_v15 = vxor.u32 %v2776_v59, %v5724_v32  ;;  %v5463_v42 = vld [vmem:[#allocation11 + $0x1b4] sm:$0xf] }
 0x1c1   :  { %3290 = vmatpush.bf16.msrb.mxu0 %v4813_v12  ;;  %v2613_v48 = vpop.f32.mrf.mxu0  ;;  %v5024_v12 = vld [vmem:[#allocation11 + $0x1b0] sm:$0xf] }
 0x1c2   :  { %3303 = vmatpush.bf16.msrb.mxu1 %v4877_v7  ;;  %3314 = vmatpush.bf16.msrb.mxu2 %v4957_v45  ;;  %v5025_v14 = vor.u32 %v5464_v13, %v5024_v12  ;;  %v5458_v45 = vld [vmem:[#allocation11 + $0x184] sm:$0xf0]  ;;  %v5457_v13 = vld [vmem:[#allocation11 + $0x184] sm:$0xf] }
 0x1c4   :  { %5076 = vmatmul.msk.bf16.vlgmr.msrb.gmra.mxu0 %vm5062_vm10, %v6081_v47  ;;  %v2575_v47 = vadd.f32 %v6108_v21, %v2562_v23  ;;  %v2626_v53 = vpop.f32.mrf.mxu1  ;;  %3272 = vmatpush.bf16.msra.mxu3 %v5041_v0  ;;  %v5009_v23 = vor.u32 %v5460_v11, %v5008_v58 }
 0x1c5   :  { %5079 = vmatmul.msk.bf16.vlgmr.msrb.gmra.mxu1 %vm5065_vm13, %v6096_v43  ;;  %v5441_v43 = vld [vmem:[#allocation11 + $0x104] sm:$0xf] }
 0x1c6   :  { %v2588_v17 = vadd.f32 %v2587_v36, %v2575_v47  ;;  %3315 = vmatpush.bf16.msrb.mxu2 %v4949_v26  ;;  %v4941_v31 = vor.u32 %v5441_v43, %v4938_v35  ;;  %v5466_v36 = vld [vmem:[#allocation11 + $0x1c4] sm:$0xf0]  ;;  %v5001_v47 = vor.u32 %v5458_v45, %v5000_v40  ;;  %v2784_v26 = vxor.u32 198677718, %v2780_v15 }
 0x1c7   :  { %v5033_v9 = vor.u32 %v5466_v36, %v5032_v44  ;;  %v5010_v44 = vld [vmem:[#allocation11 + $0x198] sm:$0xf0] }
 0x1c8   :  { %v2601_v54 = vadd.f32 %v2600_v10, %v2588_v17  ;;  %v2788_v8 = vshrl.u32 %v2784_v26, 16 }
 0x1c9   :  { %v2615_v21 = vpop.f32.mrf.mxu0  ;;  %3273 = vmatpush.bf16.msra.mxu3 %v5033_v9 }
 0x1ca   :  { %3316 = vmatpush.bf16.msrb.mxu2 %v4941_v31  ;;  %v2614_v38 = vadd.f32 %v2613_v48, %v2601_v54  ;;  %v5061_v48 = vor.u32 %v5471_v51, %v5058_v24  ;;  %v5467_v31 = vld [vmem:[#allocation11 + $0x1d4] sm:$0xf]  ;;  %v2792_v55 = vxor.u32 %v2788_v8, %v2784_v26 }
 0x1cb   :  { %v5045_v54 = vor.u32 %v5467_v31, %v5042_v56 }
 0x1cc   :  { %v2628_v4 = vpop.f32.mrf.mxu1  ;;  %v2627_v52 = vadd.f32 %v2626_v53, %v2614_v38  ;;  %v5469_v53 = vld [vmem:[#allocation11 + $0x1e4] sm:$0xf]  ;;  %v5034_v38 = vld [vmem:[#allocation11 + $0x1c8] sm:$0xf0]  ;;  %v2796_v39 = vmul.u32 2146121005, %v2792_v55 }
 0x1cd   :  { %3274 = vmatpush.bf16.msra.mxu3 %v5025_v14  ;;  %v5053_v37 = vor.u32 %v5469_v53, %v5050_v25  ;;  %v5037_v21 = vor.u32 %v5465_v34, %v5034_v38 }
 0x1ce   :  { %v2652_v60 = vpop.f32.mrf.mxu3  ;;  %v2800_v57 = vshrl.u32 %v2796_v39, 15 }
 0x1cf   :  { %v2639_v50 = vpop.f32.mrf.mxu2 }
 0x1d0   :  { %v2640_v22 = vadd.f32 %v2639_v50, %v2627_v52  ;;  %v5029_v50 = vor.u32 %v5463_v42, %v5026_v49  ;;  %v2804_v2 = vxor.u32 %v2800_v57, %v2796_v39  ;;  %v3341_v42 = vmul.u32 256, %v5709_v27 }
 0x1d1   :  { %3275 = vmatpush.bf16.msra.mxu3 %v5017_v19 }
 0x1d2   :  { %v2653_v33 = vadd.f32 %v2652_v60, %v2640_v22  ;;  %v5461_v22 = vld [vmem:[#allocation11 + $0x1a4] sm:$0xf]  ;;  %v5018_v60 = vld [vmem:[#allocation11 + $0x1a8] sm:$0xf0]  ;;  %v2808_v12 = vmul.u32 2221713035, %v2804_v2  ;;  %v3342_v49 = vadd.s32 %v3341_v42, %v5711_v28 }
 0x1d3   :  { %v5021_v0 = vor.u32 %v5461_v22, %v5018_v60 }
 0x1d4   :  { %vm2762_vm14 = vcmp.ge.f32.partialorder %v2653_v33, 0.0  ;;  %v2766_v5 = vmul.f32 0.2, %v2653_v33 }
 0x1d5   :  { %3276 = vmatpush.bf16.msra.mxu3 %v5009_v23 }
 0x1d6   :  { %v2770_v7 = vsel %vm2762_vm14, %v2653_v33, %v2766_v5  ;;  %v2654_v16 = vpop.f32.mrf.mxu3  ;;  %v5459_v33 = vld [vmem:[#allocation11 + $0x194] sm:$0xf] }
 0x1d7   :  { %v2831_v3 = vmul.f32 1.4285715, %v2770_v7  ;;  %v2641_v62 = vpop.f32.mrf.mxu2  ;;  %v5013_v5 = vor.u32 %v5459_v33, %v5010_v44  ;;  %v5002_v7 = vld [vmem:[#allocation11 + $0x188] sm:$0xf0] }
 0x1d8   :  { %v5005_v14 = vor.u32 %v5457_v13, %v5002_v7  ;;  %v2812_v62 = vshrl.u32 %v2808_v12, 16 }
 0x1d9   :  { %v5069_v63 = vpack.c.bf16 %v2831_v3, %v2831_v3  ;;  %3277 = vmatpush.bf16.msra.mxu3 %v5001_v47 }
 0x1da   :  { %v2816_v18 = vxor.u32 %v2812_v62, %v2808_v12 }
 0x1db   :  { %5070 = vmatmul.msk.bf16.vlgmr.msra.gmra.mxu2 %vm5068_vm0, %v5069_v63 }
 0x1dd   :  { %3322 = vmatpush.bf16.msrb.mxu3 %v5061_v48  ;;  %v2905_v48 = vld [vmem:[%s6175_s7] sm:$0x3] }
 0x1de   :  { %v2907_v26 = vperm.slane %v2905_v48, 0 }
 0x1e1   :  { %v2665_v20 = vpop.f32.mrf.mxu0  ;;  %3323 = vmatpush.bf16.msrb.mxu3 %v5053_v37 }
 0x1e2   :  { %v2666_v1 = vadd.f32 %v2665_v20, %v1059_v41  ;;  %v4805_v20 = vxor.u32 2147483648, %v2816_v18 }
 0x1e4   :  { %v2678_v46 = vpop.f32.mrf.mxu1  ;;  %vm6147_vm2 = vcmp.ge.s32.totalorder %v4805_v20, 3435973836 }
 0x1e5   :  { %3324 = vmatpush.bf16.msrb.mxu3 %v5045_v54  ;;  %v2679_v36 = vadd.f32 %v2678_v46, %v2666_v1  ;;  %vm5071_vm3 = vmpackc.low %vm6147_vm2, %vm6147_vm2 }
 0x1e9   :  { %v2667_v17 = vpop.f32.mrf.mxu0  ;;  %3325 = vmatpush.bf16.msrb.mxu3 %v5037_v21 }
 0x1eb   :  { %5082 = vmatmul.msk.bf16.vlgmr.msrb.gmra.mxu2 %vm5068_vm0, %v5069_v63 }
 0x1ec   :  { %v2680_v43 = vpop.f32.mrf.mxu1 }
 0x1ed   :  { %3326 = vmatpush.bf16.msrb.mxu3 %v5029_v50  ;;  %v3344_v50 = vxor.u32 %v3342_v49, %v5724_v32 }
 0x1ee   :  { %v2704_v61 = vpop.f32.mrf.mxu3 }
 0x1ef   :  { %v2691_v35 = vpop.f32.mrf.mxu2  ;;  %v3346_v1 = vxor.u32 2445500225, %v3344_v50 }
 0x1f0   :  { %v2692_v10 = vadd.f32 %v2691_v35, %v2679_v36  ;;  %v2908_v35 = vperm.slane %v2905_v48, 1 }
 0x1f1   :  { %3327 = vmatpush.bf16.msrb.mxu3 %v5021_v0  ;;  %v3348_v60 = vshrl.u32 %v3346_v1, 16 }
 0x1f2   :  { %v2705_v3 = vadd.f32 %v2704_v61, %v2692_v10 }
 0x1f3   :  { %v3350_v2 = vxor.u32 %v3348_v60, %v3346_v1 }
 0x1f5   :  { %3328 = vmatpush.bf16.msrb.mxu3 %v5013_v5  ;;  %v3352_v44 = vmul.u32 2146121005, %v3350_v2 }
 0x1f6   :  { %v2706_v52 = vpop.f32.mrf.mxu3 }
 0x1f7   :  { %v2693_v4 = vpop.f32.mrf.mxu2  ;;  %v3343_v52 = vadd.s32 %v3341_v42, %v5720_v30  ;;  %v3354_v5 = vshrl.u32 %v3352_v44, 15 }
 0x1f9   :  { %3329 = vmatpush.bf16.msrb.mxu3 %v5005_v14  ;;  %v3345_v57 = vxor.u32 %v3343_v52, %v5724_v32  ;;  %v3356_v10 = vxor.u32 %v3354_v5, %v3352_v44 }
 0x1fb   :  { %v3347_v22 = vxor.u32 2445500225, %v3345_v57  ;;  %v3358_v28 = vmul.u32 2221713035, %v3356_v10 }
 0x1fd   :  { %v3349_v0 = vshrl.u32 %v3347_v22, 16  ;;  %v3360_v13 = vshrl.u32 %v3358_v28, 16 }
 0x1ff   :  { %v3351_v33 = vxor.u32 %v3349_v0, %v3347_v22 }
 0x201   :  { %v2717_v9 = vpop.f32.mrf.mxu0  ;;  %v3353_v36 = vmul.u32 2146121005, %v3351_v33 }
 0x202   :  { %v2718_v16 = vadd.f32 %v2717_v9, %v2705_v3  ;;  %v3362_v3 = vxor.u32 %v3360_v13, %v3358_v28 }
 0x203   :  { %v3355_v9 = vshrl.u32 %v3353_v36, 15 }
 0x204   :  { %v2730_v6 = vpop.f32.mrf.mxu1 }
 0x205   :  { %v2731_v19 = vadd.f32 %v2730_v6, %v2718_v16  ;;  %v3357_v6 = vxor.u32 %v3355_v9, %v3353_v36 }
 0x207   :  { %v3359_v12 = vmul.u32 2221713035, %v3357_v6 }
 0x209   :  { %v2719_v63 = vpop.f32.mrf.mxu0  ;;  %v3361_v14 = vshrl.u32 %v3359_v12, 16 }
 0x20b   :  { %v3363_v62 = vxor.u32 %v3361_v14, %v3359_v12 }
 0x20c   :  { %v2732_v29 = vpop.f32.mrf.mxu1 }
 0x20d   :  { %v5086_v29 = vxor.u32 2147483648, %v3362_v3 }
 0x20e   :  { %v2756_v59 = vpop.f32.mrf.mxu3 }
 0x20f   :  { %v2743_v58 = vpop.f32.mrf.mxu2  ;;  %vm3366_vm8 = vcmp.ge.s32.totalorder %v5086_v29, 3435973836 }
 0x210   :  { %v2744_v11 = vadd.f32 %v2743_v58, %v2731_v19  ;;  %v5087_v58 = vxor.u32 2147483648, %v3363_v62 }
 0x212   :  { %v2757_v23 = vadd.f32 %v2756_v59, %v2744_v11  ;;  %v3374_v59 = vld [vmem:[%s6176_s8] sm:$0x3]  ;;  %vm3369_vm9 = vcmp.ge.s32.totalorder %v5087_v58, 3435973836 }
 0x213   :  { %v3377_v40 = vperm.slane %v3374_v59, 1 }
 0x214   :  { %vm2763_vm1 = vcmp.ge.f32.partialorder %v2757_v23, 0.0  ;;  %v2767_v46 = vmul.f32 0.2, %v2757_v23 }
 0x216   :  { %v2771_v45 = vsel %vm2763_vm1, %v2757_v23, %v2767_v46  ;;  %v2758_v51 = vpop.f32.mrf.mxu3  ;;  %v3376_v46 = vperm.slane %v3374_v59, 0 }
 0x217   :  { %v2832_v15 = vmul.f32 1.4285715, %v2771_v45  ;;  %v2745_v47 = vpop.f32.mrf.mxu2 }
 0x219   :  { %v5072_v24 = vpack.c.bf16 %v2832_v15, %v2832_v15 }
 0x21b   :  { %5073 = vmatmul.msk.bf16.vlgmr.msra.gmra.mxu3 %vm5071_vm3, %v5072_v24 }
 0x221   :  { %v3240_v17 = vpop.f32.mrf.mxu0 }
 0x222   :  { %v3241_v53 = vadd.f32 %v3240_v17, %v2907_v26  ;;  %v3253_v25 = vpop.f32.mrf.mxu1  ;;  %v5484_v17 = vld [vmem:[#allocation3] ss:$0 sm:$0xff] }
 0x224   :  { %v3254_v43 = vadd.f32 %v3253_v25, %v3241_v53 }
 0x229   :  { %v3242_v37 = vpop.f32.mrf.mxu0 }
 0x22a   :  { %v3255_v8 = vpop.f32.mrf.mxu1 }
 0x22b   :  { %5085 = vmatmul.msk.bf16.vlgmr.msrb.gmra.mxu3 %vm5071_vm3, %v5072_v24 }
 0x241   :  { %v3292_v31 = vpop.f32.mrf.mxu0 }
 0x242   :  { %v3293_v56 = vadd.f32 %v3292_v31, %v2908_v35  ;;  %v3305_v61 = vpop.f32.mrf.mxu1 }
 0x244   :  { %v3306_v54 = vadd.f32 %v3305_v61, %v3293_v56 }
 0x249   :  { %v3294_v55 = vpop.f32.mrf.mxu0 }
 0x24a   :  { %v3307_v34 = vpop.f32.mrf.mxu1 }
 0x25e   :  { %v3266_v38 = vpop.f32.mrf.mxu2 }
 0x25f   :  { %v3267_v21 = vadd.f32 %v3266_v38, %v3254_v43 }
 0x266   :  { %v3268_v39 = vpop.f32.mrf.mxu2 }
 0x26e   :  { %v3318_v41 = vpop.f32.mrf.mxu2 }
 0x26f   :  { %v3319_v16 = vadd.f32 %v3318_v41, %v3306_v54 }
 0x276   :  { %v3320_v4 = vpop.f32.mrf.mxu2 }
 0x29e   :  { %v3279_v27 = vpop.f32.mrf.mxu3 }
 0x29f   :  { %v3280_v30 = vadd.f32 %v3279_v27, %v3267_v21 }
 0x2a1   :  { %v3337_v32 = vmul.f32 0.2, %v3280_v30  ;;  %vm3335_vm6 = vcmp.ge.f32.partialorder %v3280_v30, 0.0 }
 0x2a3   :  { %v3339_v63 = vsel %vm3335_vm6, %v3280_v30, %v3337_v32 }
 0x2a4   :  { %v3370_v11 = vmul.f32 1.4285715, %v3339_v63 }
 0x2a6   :  { %v3281_v7 = vpop.f32.mrf.mxu3  ;;  %v3372_v15 = vsel %vm3366_vm8, %v3370_v11, 0.0 }
 0x2a7   :  { %v3380_v24 = vmul.f32 %v3376_v46, %v3372_v15 }
 0x2ae   :  { %v3331_v18 = vpop.f32.mrf.mxu3 }
 0x2af   :  { %v3332_v19 = vadd.f32 %v3331_v18, %v3319_v16 }
 0x2b1   :  { %vm3336_vm7 = vcmp.ge.f32.partialorder %v3332_v19, 0.0  ;;  %v3338_v20 = vmul.f32 0.2, %v3332_v19 }
 0x2b3   :  { %v3340_v23 = vsel %vm3336_vm7, %v3332_v19, %v3338_v20 }
 0x2b4   :  { %v3371_v45 = vmul.f32 1.4285715, %v3340_v23 }
 0x2b6   :  { %v3333_v47 = vpop.f32.mrf.mxu3  ;;  %v3373_v51 = vsel %vm3369_vm9, %v3371_v45, 0.0 }
 0x2b7   :  { %v3381_v48 = vmul.f32 %v3377_v40, %v3373_v51 }
 0x2b9   :  { %v3382_v26 = vadd.f32 %v3381_v48, %v3380_v24 }
 0x2bb   :  { %3383 = vadd.xlane.f32.xlu0 %v3382_v26 }
 0x32e   :  { %v3384_v53 = vpop.xlane.xlu0 %3383 }
 0x32f   :  { %v3389_v25 = vadd.f32 %v5484_v17, %v3384_v53 }
 0x331   :  { %v5088_v43 = vmul.f32 -1.442695, %v3389_v25 }
 0x333   :  { %5485 = vpow2.f32 %v5088_v43 }
 0x339   :  { %v5486_v37 = vpop.eup %5485 }
 0x33a   :  { %v3393_v8 = vadd.f32 1.0, %v5486_v37 }
 0x33c   :  { %5487 = vrcp.f32 %v3393_v8  ;;  %v3405_v61 = vand.u32 2147483648, %v3393_v8  ;;  %v3403_v55 = vand.u32 2147483647, %v3393_v8  ;;  %vm3399_vm5 = vweird.f32 %v3393_v8 }
 0x33e   :  { %v3406_v38 = vor.u32 1.1754944e-38, %v3405_v61  ;;  %vm3404_vm12 = vcmp.eq.f32.partialorder %v3403_v55, 8.507059e+37 }
 0x342   :  { %v5488_v35 = vpop.eup %5487 }
 0x343   :  { %v3395_v31 = vmul.f32 %v5488_v35, %v3393_v8  ;;  %vm3400_vm4 = vweird.f32 %v5488_v35 }
 0x344   :  { %vm3401_vm10 = vmor %vm3399_vm5, %vm3400_vm4 }
 0x345   :  { %v3396_v56 = vsub.f32 1.0, %v3395_v31 }
 0x347   :  { %v3397_v54 = vmul.f32 %v5488_v35, %v3396_v56 }
 0x349   :  { %v3398_v34 = vadd.f32 %v5488_v35, %v3397_v54 }
 0x34b   :  { %v3402_v21 = vsel %vm3401_vm10, %v5488_v35, %v3398_v34 }
 0x34c   :  { %v3407_v39 = vsel %vm3404_vm12, %v3406_v38, %v3402_v21 }
 0x34d   :  { %3410 = vst.msk [vmem:[%s6178_s10] sm:$0xff] %vm3409_vm11, %v3407_v39 }
 0x34e   :  { %3415 = vsyncpa [#allocation5], 1 }
 0x34f   :  { %3416 = vsyncpa [#allocation7], 1 }
 0x350   :  { %3417 = vsyncpa [#allocation10], 1 }

</bundles_post_ra>
